<compile_context>
chip_gen: v7x
topology: tpu7x:2x2x1
jax: 0.10.0
libtpu: 0.0.40
codegen_flags: <defaults>
</compile_context>

<pallas_src>
import functools

import jax
import jax.numpy as jnp
import numpy as np
from jax.experimental import pallas as pl
from jax.experimental.pallas import tpu as pltpu

# --- module hyper-parameters (NeRF_Chromatic defaults) ----------------------
D = 8
W = 256
HID = W // 2        # dir_encoding width (128)
C_XYZ = 63          # in_channels_xyz
C_DIR = 27          # in_channels_dir
C_CHR = 27          # in_channels_chroma_code
SKIPS = (4,)
NEG_SLOPE = 0.01    # LeakyReLU slope used everywhere in the module
OUT_W = 8           # lane width of the single fused output (padded)

BF = jnp.bfloat16


def _leaky(x):
    # identical to LeakyReLU(0.01) for 0 < slope < 1; 2 VALU ops instead of 3
    return jnp.maximum(x, NEG_SLOPE * x)


def _dot(a_f32, w_bf16):
    """bf16 MXU matmul with f32 accumulation (casts the f32 LHS once)."""
    return jnp.dot(a_f32.astype(BF), w_bf16, preferred_element_type=jnp.float32)


def _param_names(mode, sigma_only):
    names = ["w_first", "w_sq", "b_xyz", "w_fds", "b_fds"]
    if sigma_only:
        return tuple(names)
    names.append("wd_d")
    if mode == "train":
        names += ["wd_c2", "w_rgb2", "b_rgb2"]
    else:
        names += ["w_rgb", "b_rgb"]
    return tuple(names)


# --- core forward math (shared by the kernel (refs) and the reference) -------
def _forward_core(xyz, dirs, chroma, contrib, p, mode, sigma_only):
    """Exact NeRF_Chromatic forward on a (tile_B, .) block.

    xyz (B,63) bf16, dirs (B,27) bf16 | None, chroma (B,54) bf16 | None,
    contrib (1,128) f32 | None.  p values may be jnp arrays or Pallas refs.
    Returns a (B, OUT_W) f32 block: [rgb1|rgb2|sigma|pad] / [rgb|sigma|pad] /
    [sigma|pad].
    """
    B = xyz.shape[0]
    b_xyz = p["b_xyz"][...]                       # (8, 256) f32, loaded once

    # xyz MLP: 8 layers, skip connection at layer 4 done as a K-split matmul.
    # Weight slabs are indexed at the matmul site (one slab live at a time).
    h = _leaky(jnp.dot(xyz, p["w_first"][0], preferred_element_type=jnp.float32)
               + b_xyz[0:1])
    for i in range(1, D):
        y = _dot(h, p["w_sq"][i - 1])
        if i in SKIPS:
            y = y + jnp.dot(xyz, p["w_first"][1],
                            preferred_element_type=jnp.float32)
        h = _leaky(y + b_xyz[i:i + 1])

    # fused head: [xyz_encoding_final folded through dir_encoding | sigma]
    y = _dot(h, p["w_fds"][...]) + p["b_fds"][...]          # (B, 129)
    sigma = y[:, HID:HID + 1]                               # (B, 1), no act.
    if sigma_only:
        return jnp.concatenate(
            [sigma, jnp.zeros((B, OUT_W - 1), jnp.float32)], axis=-1)

    partial = y[:, :HID] + jnp.dot(dirs, p["wd_d"][...],
                                   preferred_element_type=jnp.float32)  # (B,128)

    if mode == "train":
        # both colour branches at once via block-diagonal weights
        contrib2 = jnp.dot(chroma, p["wd_c2"][...],
                           preferred_element_type=jnp.float32)          # (B,256)
        y1 = _leaky(jnp.concatenate([partial, partial], axis=-1) + contrib2)
        y2 = _leaky(y1 + y1)                 # ResidualBlock(Identity): leaky(2*y1)
        logits = _dot(y2, p["w_rgb2"][...]) + p["b_rgb2"][...]          # (B, 6)
        rgb12 = jax.nn.sigmoid(logits)
        return jnp.concatenate(
            [rgb12, sigma, jnp.zeros((B, OUT_W - 7), jnp.float32)], axis=-1)
    else:
        y1 = _leaky(partial + contrib)       # (1,128) contribution broadcasts
        y2 = _leaky(y1 + y1)
        logits = _dot(y2, p["w_rgb"][...]) + p["b_rgb"][...]            # (B, 3)
        rgb = jax.nn.sigmoid(logits)
        return jnp.concatenate(
            [rgb, sigma, jnp.zeros((B, OUT_W - 4), jnp.float32)], axis=-1)


# --- Pallas kernel -----------------------------------------------------------
def nerf_kernel(mode, sigma_only, *refs):
    out_ref = refs[-1]
    in_refs = refs[:-1]
    dirs = chroma = contrib = None
    if sigma_only:
        xyz = in_refs[0][...]
        n_x = 1
    elif mode == "train":
        xyz, dirs, chroma = in_refs[0][...], in_refs[1][...], in_refs[2][...]
        n_x = 3
    else:
        xyz, dirs, contrib = in_refs[0][...], in_refs[1][...], in_refs[2][...]
        n_x = 3
    p = dict(zip(_param_names(mode, sigma_only), in_refs[n_x:]))
    out_ref[...] = _forward_core(xyz, dirs, chroma, contrib, p, mode, sigma_only)


# --- parameter init (deterministic, PyTorch-Linear-like uniform) -------------
def init_raw_params(key):
    """Raw per-layer (W, b) in (in, out) / (1, out) layout, f32."""
    dims = []
    for i in range(D):
        if i == 0:
            din = C_XYZ
        elif i in SKIPS:
            din = W + C_XYZ
        else:
            din = W
        dims.append((din, W))
    dims.append((W, 1))                          # sigma
    dims.append((W, W))                          # xyz_encoding_final
    dims.append((W + C_DIR + C_CHR, HID))        # dir_encoding
    dims.append((HID, 3))                        # rgb
    keys = jax.random.split(key, len(dims))
    raw = []
    for k, (din, dout) in zip(keys, dims):
        kw, kb = jax.random.split(k)
        bound = 1.0 / float(np.sqrt(din))
        raw.append((jax.random.uniform(kw, (din, dout), jnp.float32, -bound, bound),
                    jax.random.uniform(kb, (1, dout), jnp.float32, -bound, bound)))
    return raw


def prepare_params(raw):
    """Host-side splits / algebraic folds / stacking / bf16 casts."""
    xyz = raw[:D]
    w_sigma, b_sigma = raw[D]          # (256,1), (1,1)
    w_final, b_final = raw[D + 1]      # (256,256), (1,256)
    w_dir, b_dir = raw[D + 2]          # (310,128), (1,128)
    w_rgb, b_rgb = raw[D + 3]          # (128,3),  (1,3)

    skip = SKIPS[0]
    w4_full = xyz[skip][0]
    w4a, w4b = w4_full[:C_XYZ], w4_full[C_XYZ:]

    w_first = jnp.stack([xyz[0][0], w4a]).astype(BF)                 # (2, 63, 256)
    sq = [w4b if i == skip else xyz[i][0] for i in range(1, D)]
    w_sq = jnp.stack(sq).astype(BF)                                  # (7, 256, 256)
    b_xyz = jnp.concatenate([xyz[i][1] for i in range(D)], axis=0)   # (8, 256) f32

    wd_f = w_dir[:W]                   # (256,128)
    wd_d = w_dir[W:W + C_DIR]          # (27,128)
    wd_c = w_dir[W + C_DIR:]           # (27,128)

    # fold the activation-free xyz_encoding_final through dir_encoding
    w_fd = w_final @ wd_f                                           # (256,128) f32
    b_fd = b_dir + b_final @ wd_f                                   # (1,128)  f32
    w_fds = jnp.concatenate([w_fd, w_sigma], axis=1).astype(BF)     # (256,129)
    b_fds = jnp.concatenate([b_fd, b_sigma], axis=1)                # (1,129)  f32

    # block-diagonal fusions for the two training colour branches
    zc = jnp.zeros_like(wd_c)
    wd_c2 = jnp.concatenate(
        [jnp.concatenate([wd_c, zc], axis=1),
         jnp.concatenate([zc, wd_c], axis=1)], axis=0).astype(BF)   # (54, 256)
    zr = jnp.zeros_like(w_rgb)
    w_rgb2 = jnp.concatenate(
        [jnp.concatenate([w_rgb, zr], axis=1),
         jnp.concatenate([zr, w_rgb], axis=1)], axis=0).astype(BF)  # (256, 6)
    b_rgb2 = jnp.concatenate([b_rgb, b_rgb], axis=1)                # (1, 6)

    return dict(w_first=w_first, w_sq=w_sq, b_xyz=b_xyz,
                w_fds=w_fds, b_fds=b_fds,
                wd_d=wd_d.astype(BF), wd_c=wd_c.astype(BF),
                wd_c2=wd_c2, w_rgb2=w_rgb2, b_rgb2=b_rgb2,
                w_rgb=w_rgb.astype(BF), b_rgb=b_rgb)


def default_chroma_code():
    """Embedding(3, 4) applied to zeros(1, 3) -> (1, 27)."""
    x = jnp.zeros((1, 3), jnp.float32)
    parts = [x]
    for k in range(4):
        f = 2.0 ** k
        parts += [jnp.sin(f * x), jnp.cos(f * x)]
    return jnp.concatenate(parts, axis=-1)


# --- host-side input splitting (shared by wrapper and reference) --------------
def _split_inputs(x, prepared, chroma_code, sigma_only):
    x = jnp.asarray(x)
    F = x.shape[-1]
    mode = "train" if F > C_XYZ + C_DIR else "inference"
    xb = x.astype(BF)
    xyz = xb[:, :C_XYZ]
    dirs = chroma = contrib = None
    if not sigma_only:
        dirs = xb[:, C_XYZ:C_XYZ + C_DIR]
        if mode == "train":
            chroma = xb[:, C_XYZ + C_DIR:C_XYZ + C_DIR + 2 * C_CHR]
        else:
            code = (default_chroma_code() if chroma_code is None
                    else jnp.asarray(chroma_code, jnp.float32))
            assert code.shape[0] == 1, "only a (1, 27) broadcast chroma code is supported"
            # precompute the broadcastable (1, 128) dir_encoding contribution
            contrib = jnp.dot(code.astype(BF), prepared["wd_c"],
                              preferred_element_type=jnp.float32)
    return xyz, dirs, chroma, contrib, mode


# --- wrapper -----------------------------------------------------------------
def nerf_chromatic_forward(x, prepared, chroma_code=None, sigma_only=False,
                           block_b=128, vmem_limit_mb=32):
    xyz, dirs, chroma, contrib, mode = _split_inputs(x, prepared, chroma_code,
                                                     sigma_only)
    B = xyz.shape[0]
    pad = (-B) % block_b
    Bp = B + pad

    def _pad(a):
        if a is None or pad == 0:
            return a
        return jnp.concatenate([a, jnp.zeros((pad,) + a.shape[1:], a.dtype)], 0)

    xyz, dirs, chroma = _pad(xyz), _pad(dirs), _pad(chroma)

    names = _param_names(mode, sigma_only)

    x_inputs = [xyz]
    x_specs = [pl.BlockSpec((block_b, C_XYZ), lambda i: (i, 0))]
    if not sigma_only:
        x_inputs.append(dirs)
        x_specs.append(pl.BlockSpec((block_b, C_DIR), lambda i: (i, 0)))
        if mode == "train":
            x_inputs.append(chroma)
            x_specs.append(pl.BlockSpec((block_b, 2 * C_CHR), lambda i: (i, 0)))
        else:
            x_inputs.append(contrib)
            x_specs.append(pl.BlockSpec(contrib.shape, lambda i: (0, 0)))

    p_inputs = [prepared[k] for k in names]
    p_specs = [pl.BlockSpec(prepared[k].shape,
                            lambda i, nd=prepared[k].ndim: (0,) * nd)
               for k in names]

    out_shape = jax.ShapeDtypeStruct((Bp, OUT_W), jnp.float32)
    out_spec = pl.BlockSpec((block_b, OUT_W), lambda i: (i, 0))

    kern = functools.partial(nerf_kernel, mode, sigma_only)
    out = pl.pallas_call(
        kern,
        out_shape=out_shape,
        grid_spec=pltpu.PrefetchScalarGridSpec(
            num_scalar_prefetch=0,
            grid=(Bp // block_b,),
            in_specs=x_specs + p_specs,
            out_specs=out_spec,
        ),
        compiler_params=pltpu.CompilerParams(
            dimension_semantics=("parallel",),
            vmem_limit_bytes=vmem_limit_mb * 1024 * 1024,
        ),
    )(*(x_inputs + p_inputs))

    n = 1 if sigma_only else (7 if mode == "train" else 4)
    return out[:B, :n]


# --- pure-JAX reference (identical math / dtypes, no Pallas) ------------------
def reference_forward(x, prepared, chroma_code=None, sigma_only=False):
    xyz, dirs, chroma, contrib, mode = _split_inputs(x, prepared, chroma_code,
                                                     sigma_only)
    p = {k: prepared[k] for k in _param_names(mode, sigma_only)}
    out = _forward_core(xyz, dirs, chroma, contrib, p, mode, sigma_only)
    n = 1 if sigma_only else (7 if mode == "train" else 4)
    return out[:, :n]


if __name__ == "__main__":
    key = jax.random.PRNGKey(0)
    k_p, k_x1, k_x2 = jax.random.split(key, 3)

    raw = init_raw_params(k_p)
    prepared = prepare_params(raw)

    B = 512           # small demo batch; with block_b=128 -> 4 grid steps
    block_b = 128
    # training path: x = [xyz(63) | dir(27) | chroma1(27) | chroma2(27)] = 144
    x_train = jax.random.uniform(k_x1, (B, C_XYZ + C_DIR + 2 * C_CHR),
                                 jnp.float32, -1.0, 1.0)
    # inference path: x = [xyz(63) | dir(27)] = 90
    x_infer = jax.random.uniform(k_x2, (B, C_XYZ + C_DIR),
                                 jnp.float32, -1.0, 1.0)

    out_train = jax.block_until_ready(
        nerf_chromatic_forward(x_train, prepared, block_b=block_b))
    out_infer = jax.block_until_ready(
        nerf_chromatic_forward(x_infer, prepared, block_b=block_b))

    ref_train = jax.block_until_ready(reference_forward(x_train, prepared))
    ref_infer = jax.block_until_ready(reference_forward(x_infer, prepared))

    assert out_train.shape == (B, 7) and out_infer.shape == (B, 4)
    np.testing.assert_allclose(np.asarray(out_train), np.asarray(ref_train),
                               rtol=5e-3, atol=5e-3)
    np.testing.assert_allclose(np.asarray(out_infer), np.asarray(ref_infer),
                               rtol=5e-3, atol=5e-3)
    print("KERNEL_OK")
</pallas_src>

<mosaic_0001>
module attributes {stable_mosaic.version = 11 : i64} {
  func.func @nerf_kernel(%arg0: i32, %arg1: memref<128x63xbf16, #tpu.memory_space<vmem>>, %arg2: memref<128x27xbf16, #tpu.memory_space<vmem>>, %arg3: memref<128x54xbf16, #tpu.memory_space<vmem>>, %arg4: memref<2x63x256xbf16, #tpu.memory_space<vmem>>, %arg5: memref<7x256x256xbf16, #tpu.memory_space<vmem>>, %arg6: memref<8x256xf32, #tpu.memory_space<vmem>>, %arg7: memref<256x129xbf16, #tpu.memory_space<vmem>>, %arg8: memref<1x129xf32, #tpu.memory_space<vmem>>, %arg9: memref<27x128xbf16, #tpu.memory_space<vmem>>, %arg10: memref<54x256xbf16, #tpu.memory_space<vmem>>, %arg11: memref<256x6xbf16, #tpu.memory_space<vmem>>, %arg12: memref<1x6xf32, #tpu.memory_space<vmem>>, %arg13: memref<128x8xf32, #tpu.memory_space<vmem>>) attributes {dimension_semantics = [#tpu.dimension_semantics<parallel>], iteration_bounds = array<i64: 4>, scalar_prefetch = 0 : i64, scratch_operands = 0 : i64, tpu.core_type = #tpu.core_type<tc>, window_params = [{transform_indices = @transform_0, window_bounds = array<i64: 128, 63>}, {transform_indices = @transform_1, window_bounds = array<i64: 128, 27>}, {transform_indices = @transform_2, window_bounds = array<i64: 128, 54>}, {pipeline_mode = #tpu.pipeline_mode<synchronous>, transform_indices = @transform_3, window_bounds = array<i64: 2, 63, 256>}, {pipeline_mode = #tpu.pipeline_mode<synchronous>, transform_indices = @transform_4, window_bounds = array<i64: 7, 256, 256>}, {pipeline_mode = #tpu.pipeline_mode<synchronous>, transform_indices = @transform_5, window_bounds = array<i64: 8, 256>}, {pipeline_mode = #tpu.pipeline_mode<synchronous>, transform_indices = @transform_6, window_bounds = array<i64: 256, 129>}, {pipeline_mode = #tpu.pipeline_mode<synchronous>, transform_indices = @transform_7, window_bounds = array<i64: 1, 129>}, {pipeline_mode = #tpu.pipeline_mode<synchronous>, transform_indices = @transform_8, window_bounds = array<i64: 27, 128>}, {pipeline_mode = #tpu.pipeline_mode<synchronous>, transform_indices = @transform_9, window_bounds = array<i64: 54, 256>}, {pipeline_mode = #tpu.pipeline_mode<synchronous>, transform_indices = @transform_10, window_bounds = array<i64: 256, 6>}, {pipeline_mode = #tpu.pipeline_mode<synchronous>, transform_indices = @transform_11, window_bounds = array<i64: 1, 6>}, {transform_indices = @transform_12, window_bounds = array<i64: 128, 8>}]} {
    %c0 = arith.constant 0 : index
    %c0_0 = arith.constant 0 : index
    %0 = vector.load %arg1[%c0, %c0_0] : memref<128x63xbf16, #tpu.memory_space<vmem>>, vector<128x63xbf16>
    %c0_1 = arith.constant 0 : index
    %c0_2 = arith.constant 0 : index
    %1 = vector.load %arg2[%c0_1, %c0_2] : memref<128x27xbf16, #tpu.memory_space<vmem>>, vector<128x27xbf16>
    %c0_3 = arith.constant 0 : index
    %c0_4 = arith.constant 0 : index
    %2 = vector.load %arg3[%c0_3, %c0_4] : memref<128x54xbf16, #tpu.memory_space<vmem>>, vector<128x54xbf16>
    %c0_5 = arith.constant 0 : index
    %c0_6 = arith.constant 0 : index
    %3 = vector.load %arg6[%c0_5, %c0_6] : memref<8x256xf32, #tpu.memory_space<vmem>>, vector<8x256xf32>
    %c0_7 = arith.constant 0 : index
    %c0_8 = arith.constant 0 : index
    %c0_9 = arith.constant 0 : index
    %4 = vector.load %arg4[%c0_7, %c0_8, %c0_9] : memref<2x63x256xbf16, #tpu.memory_space<vmem>>, vector<1x63x256xbf16>
    %5 = vector.shape_cast %4 : vector<1x63x256xbf16> to vector<63x256xbf16>
    %cst = arith.constant dense<0.000000e+00> : vector<128x256xf32>
    %6 = tpu.matmul %0, %5, %cst {dimension_numbers = #tpu.dot_dimension_numbers<[1], [0], [0], [1], [0, 0, 1, 1], [], []>} : vector<128x63xbf16>, vector<63x256xbf16>, vector<128x256xf32> -> vector<128x256xf32>
    %7 = vector.extract_strided_slice %3 {offsets = [0, 0], sizes = [1, 256], strides = [1, 1]} : vector<8x256xf32> to vector<1x256xf32>
    %8 = vector.broadcast %7 : vector<1x256xf32> to vector<128x256xf32>
    %9 = arith.addf %6, %8 : vector<128x256xf32>
    %cst_10 = arith.constant 0.00999999977 : f32
    %10 = vector.broadcast %cst_10 : f32 to vector<128x256xf32>
    %11 = arith.mulf %10, %9 : vector<128x256xf32>
    %12 = arith.maximumf %9, %11 : vector<128x256xf32>
    %c0_11 = arith.constant 0 : index
    %c0_12 = arith.constant 0 : index
    %c0_13 = arith.constant 0 : index
    %13 = vector.load %arg5[%c0_11, %c0_12, %c0_13] : memref<7x256x256xbf16, #tpu.memory_space<vmem>>, vector<1x256x256xbf16>
    %14 = vector.shape_cast %13 : vector<1x256x256xbf16> to vector<256x256xbf16>
    %15 = arith.truncf %12 : vector<128x256xf32> to vector<128x256xbf16>
    %cst_14 = arith.constant dense<0.000000e+00> : vector<128x256xf32>
    %16 = tpu.matmul %15, %14, %cst_14 {dimension_numbers = #tpu.dot_dimension_numbers<[1], [0], [0], [1], [0, 0, 1, 1], [], []>} : vector<128x256xbf16>, vector<256x256xbf16>, vector<128x256xf32> -> vector<128x256xf32>
    %17 = vector.extract_strided_slice %3 {offsets = [1, 0], sizes = [1, 256], strides = [1, 1]} : vector<8x256xf32> to vector<1x256xf32>
    %18 = vector.broadcast %17 : vector<1x256xf32> to vector<128x256xf32>
    %19 = arith.addf %16, %18 : vector<128x256xf32>
    %cst_15 = arith.constant 0.00999999977 : f32
    %20 = vector.broadcast %cst_15 : f32 to vector<128x256xf32>
    %21 = arith.mulf %20, %19 : vector<128x256xf32>
    %22 = arith.maximumf %19, %21 : vector<128x256xf32>
    %c1 = arith.constant 1 : index
    %c0_16 = arith.constant 0 : index
    %c0_17 = arith.constant 0 : index
    %23 = vector.load %arg5[%c1, %c0_16, %c0_17] : memref<7x256x256xbf16, #tpu.memory_space<vmem>>, vector<1x256x256xbf16>
    %24 = vector.shape_cast %23 : vector<1x256x256xbf16> to vector<256x256xbf16>
    %25 = arith.truncf %22 : vector<128x256xf32> to vector<128x256xbf16>
    %cst_18 = arith.constant dense<0.000000e+00> : vector<128x256xf32>
    %26 = tpu.matmul %25, %24, %cst_18 {dimension_numbers = #tpu.dot_dimension_numbers<[1], [0], [0], [1], [0, 0, 1, 1], [], []>} : vector<128x256xbf16>, vector<256x256xbf16>, vector<128x256xf32> -> vector<128x256xf32>
    %27 = vector.extract_strided_slice %3 {offsets = [2, 0], sizes = [1, 256], strides = [1, 1]} : vector<8x256xf32> to vector<1x256xf32>
    %28 = vector.broadcast %27 : vector<1x256xf32> to vector<128x256xf32>
    %29 = arith.addf %26, %28 : vector<128x256xf32>
    %cst_19 = arith.constant 0.00999999977 : f32
    %30 = vector.broadcast %cst_19 : f32 to vector<128x256xf32>
    %31 = arith.mulf %30, %29 : vector<128x256xf32>
    %32 = arith.maximumf %29, %31 : vector<128x256xf32>
    %c2 = arith.constant 2 : index
    %c0_20 = arith.constant 0 : index
    %c0_21 = arith.constant 0 : index
    %33 = vector.load %arg5[%c2, %c0_20, %c0_21] : memref<7x256x256xbf16, #tpu.memory_space<vmem>>, vector<1x256x256xbf16>
    %34 = vector.shape_cast %33 : vector<1x256x256xbf16> to vector<256x256xbf16>
    %35 = arith.truncf %32 : vector<128x256xf32> to vector<128x256xbf16>
    %cst_22 = arith.constant dense<0.000000e+00> : vector<128x256xf32>
    %36 = tpu.matmul %35, %34, %cst_22 {dimension_numbers = #tpu.dot_dimension_numbers<[1], [0], [0], [1], [0, 0, 1, 1], [], []>} : vector<128x256xbf16>, vector<256x256xbf16>, vector<128x256xf32> -> vector<128x256xf32>
    %37 = vector.extract_strided_slice %3 {offsets = [3, 0], sizes = [1, 256], strides = [1, 1]} : vector<8x256xf32> to vector<1x256xf32>
    %38 = vector.broadcast %37 : vector<1x256xf32> to vector<128x256xf32>
    %39 = arith.addf %36, %38 : vector<128x256xf32>
    %cst_23 = arith.constant 0.00999999977 : f32
    %40 = vector.broadcast %cst_23 : f32 to vector<128x256xf32>
    %41 = arith.mulf %40, %39 : vector<128x256xf32>
    %42 = arith.maximumf %39, %41 : vector<128x256xf32>
    %c3 = arith.constant 3 : index
    %c0_24 = arith.constant 0 : index
    %c0_25 = arith.constant 0 : index
    %43 = vector.load %arg5[%c3, %c0_24, %c0_25] : memref<7x256x256xbf16, #tpu.memory_space<vmem>>, vector<1x256x256xbf16>
    %44 = vector.shape_cast %43 : vector<1x256x256xbf16> to vector<256x256xbf16>
    %45 = arith.truncf %42 : vector<128x256xf32> to vector<128x256xbf16>
    %cst_26 = arith.constant dense<0.000000e+00> : vector<128x256xf32>
    %46 = tpu.matmul %45, %44, %cst_26 {dimension_numbers = #tpu.dot_dimension_numbers<[1], [0], [0], [1], [0, 0, 1, 1], [], []>} : vector<128x256xbf16>, vector<256x256xbf16>, vector<128x256xf32> -> vector<128x256xf32>
    %c1_27 = arith.constant 1 : index
    %c0_28 = arith.constant 0 : index
    %c0_29 = arith.constant 0 : index
    %47 = vector.load %arg4[%c1_27, %c0_28, %c0_29] : memref<2x63x256xbf16, #tpu.memory_space<vmem>>, vector<1x63x256xbf16>
    %48 = vector.shape_cast %47 : vector<1x63x256xbf16> to vector<63x256xbf16>
    %cst_30 = arith.constant dense<0.000000e+00> : vector<128x256xf32>
    %49 = tpu.matmul %0, %48, %cst_30 {dimension_numbers = #tpu.dot_dimension_numbers<[1], [0], [0], [1], [0, 0, 1, 1], [], []>} : vector<128x63xbf16>, vector<63x256xbf16>, vector<128x256xf32> -> vector<128x256xf32>
    %50 = arith.addf %46, %49 : vector<128x256xf32>
    %51 = vector.extract_strided_slice %3 {offsets = [4, 0], sizes = [1, 256], strides = [1, 1]} : vector<8x256xf32> to vector<1x256xf32>
    %52 = vector.broadcast %51 : vector<1x256xf32> to vector<128x256xf32>
    %53 = arith.addf %50, %52 : vector<128x256xf32>
    %cst_31 = arith.constant 0.00999999977 : f32
    %54 = vector.broadcast %cst_31 : f32 to vector<128x256xf32>
    %55 = arith.mulf %54, %53 : vector<128x256xf32>
    %56 = arith.maximumf %53, %55 : vector<128x256xf32>
    %c4 = arith.constant 4 : index
    %c0_32 = arith.constant 0 : index
    %c0_33 = arith.constant 0 : index
    %57 = vector.load %arg5[%c4, %c0_32, %c0_33] : memref<7x256x256xbf16, #tpu.memory_space<vmem>>, vector<1x256x256xbf16>
    %58 = vector.shape_cast %57 : vector<1x256x256xbf16> to vector<256x256xbf16>
    %59 = arith.truncf %56 : vector<128x256xf32> to vector<128x256xbf16>
    %cst_34 = arith.constant dense<0.000000e+00> : vector<128x256xf32>
    %60 = tpu.matmul %59, %58, %cst_34 {dimension_numbers = #tpu.dot_dimension_numbers<[1], [0], [0], [1], [0, 0, 1, 1], [], []>} : vector<128x256xbf16>, vector<256x256xbf16>, vector<128x256xf32> -> vector<128x256xf32>
    %61 = vector.extract_strided_slice %3 {offsets = [5, 0], sizes = [1, 256], strides = [1, 1]} : vector<8x256xf32> to vector<1x256xf32>
    %62 = vector.broadcast %61 : vector<1x256xf32> to vector<128x256xf32>
    %63 = arith.addf %60, %62 : vector<128x256xf32>
    %cst_35 = arith.constant 0.00999999977 : f32
    %64 = vector.broadcast %cst_35 : f32 to vector<128x256xf32>
    %65 = arith.mulf %64, %63 : vector<128x256xf32>
    %66 = arith.maximumf %63, %65 : vector<128x256xf32>
    %c5 = arith.constant 5 : index
    %c0_36 = arith.constant 0 : index
    %c0_37 = arith.constant 0 : index
    %67 = vector.load %arg5[%c5, %c0_36, %c0_37] : memref<7x256x256xbf16, #tpu.memory_space<vmem>>, vector<1x256x256xbf16>
    %68 = vector.shape_cast %67 : vector<1x256x256xbf16> to vector<256x256xbf16>
    %69 = arith.truncf %66 : vector<128x256xf32> to vector<128x256xbf16>
    %cst_38 = arith.constant dense<0.000000e+00> : vector<128x256xf32>
    %70 = tpu.matmul %69, %68, %cst_38 {dimension_numbers = #tpu.dot_dimension_numbers<[1], [0], [0], [1], [0, 0, 1, 1], [], []>} : vector<128x256xbf16>, vector<256x256xbf16>, vector<128x256xf32> -> vector<128x256xf32>
    %71 = vector.extract_strided_slice %3 {offsets = [6, 0], sizes = [1, 256], strides = [1, 1]} : vector<8x256xf32> to vector<1x256xf32>
    %72 = vector.broadcast %71 : vector<1x256xf32> to vector<128x256xf32>
    %73 = arith.addf %70, %72 : vector<128x256xf32>
    %cst_39 = arith.constant 0.00999999977 : f32
    %74 = vector.broadcast %cst_39 : f32 to vector<128x256xf32>
    %75 = arith.mulf %74, %73 : vector<128x256xf32>
    %76 = arith.maximumf %73, %75 : vector<128x256xf32>
    %c6 = arith.constant 6 : index
    %c0_40 = arith.constant 0 : index
    %c0_41 = arith.constant 0 : index
    %77 = vector.load %arg5[%c6, %c0_40, %c0_41] : memref<7x256x256xbf16, #tpu.memory_space<vmem>>, vector<1x256x256xbf16>
    %78 = vector.shape_cast %77 : vector<1x256x256xbf16> to vector<256x256xbf16>
    %79 = arith.truncf %76 : vector<128x256xf32> to vector<128x256xbf16>
    %cst_42 = arith.constant dense<0.000000e+00> : vector<128x256xf32>
    %80 = tpu.matmul %79, %78, %cst_42 {dimension_numbers = #tpu.dot_dimension_numbers<[1], [0], [0], [1], [0, 0, 1, 1], [], []>} : vector<128x256xbf16>, vector<256x256xbf16>, vector<128x256xf32> -> vector<128x256xf32>
    %81 = vector.extract_strided_slice %3 {offsets = [7, 0], sizes = [1, 256], strides = [1, 1]} : vector<8x256xf32> to vector<1x256xf32>
    %82 = vector.broadcast %81 : vector<1x256xf32> to vector<128x256xf32>
    %83 = arith.addf %80, %82 : vector<128x256xf32>
    %cst_43 = arith.constant 0.00999999977 : f32
    %84 = vector.broadcast %cst_43 : f32 to vector<128x256xf32>
    %85 = arith.mulf %84, %83 : vector<128x256xf32>
    %86 = arith.maximumf %83, %85 : vector<128x256xf32>
    %c0_44 = arith.constant 0 : index
    %c0_45 = arith.constant 0 : index
    %87 = vector.load %arg7[%c0_44, %c0_45] : memref<256x129xbf16, #tpu.memory_space<vmem>>, vector<256x129xbf16>
    %88 = arith.truncf %86 : vector<128x256xf32> to vector<128x256xbf16>
    %cst_46 = arith.constant dense<0.000000e+00> : vector<128x129xf32>
    %89 = tpu.matmul %88, %87, %cst_46 {dimension_numbers = #tpu.dot_dimension_numbers<[1], [0], [0], [1], [0, 0, 1, 1], [], []>} : vector<128x256xbf16>, vector<256x129xbf16>, vector<128x129xf32> -> vector<128x129xf32>
    %c0_47 = arith.constant 0 : index
    %c0_48 = arith.constant 0 : index
    %90 = vector.load %arg8[%c0_47, %c0_48] : memref<1x129xf32, #tpu.memory_space<vmem>>, vector<1x129xf32>
    %91 = vector.broadcast %90 : vector<1x129xf32> to vector<128x129xf32>
    %92 = arith.addf %89, %91 : vector<128x129xf32>
    %93 = vector.extract_strided_slice %92 {offsets = [0, 128], sizes = [128, 1], strides = [1, 1]} : vector<128x129xf32> to vector<128x1xf32>
    %94 = vector.extract_strided_slice %92 {offsets = [0, 0], sizes = [128, 128], strides = [1, 1]} : vector<128x129xf32> to vector<128x128xf32>
    %c0_49 = arith.constant 0 : index
    %c0_50 = arith.constant 0 : index
    %95 = vector.load %arg9[%c0_49, %c0_50] : memref<27x128xbf16, #tpu.memory_space<vmem>>, vector<27x128xbf16>
    %cst_51 = arith.constant dense<0.000000e+00> : vector<128x128xf32>
    %96 = tpu.matmul %1, %95, %cst_51 {dimension_numbers = #tpu.dot_dimension_numbers<[1], [0], [0], [1], [0, 0, 1, 1], [], []>} : vector<128x27xbf16>, vector<27x128xbf16>, vector<128x128xf32> -> vector<128x128xf32>
    %97 = arith.addf %94, %96 : vector<128x128xf32>
    %c0_52 = arith.constant 0 : index
    %c0_53 = arith.constant 0 : index
    %98 = vector.load %arg10[%c0_52, %c0_53] : memref<54x256xbf16, #tpu.memory_space<vmem>>, vector<54x256xbf16>
    %cst_54 = arith.constant dense<0.000000e+00> : vector<128x256xf32>
    %99 = tpu.matmul %2, %98, %cst_54 {dimension_numbers = #tpu.dot_dimension_numbers<[1], [0], [0], [1], [0, 0, 1, 1], [], []>} : vector<128x54xbf16>, vector<54x256xbf16>, vector<128x256xf32> -> vector<128x256xf32>
    %100 = tpu.concatenate %97, %97 in 1 : vector<128x128xf32>, vector<128x128xf32> -> vector<128x256xf32>
    %101 = arith.addf %100, %99 : vector<128x256xf32>
    %cst_55 = arith.constant 0.00999999977 : f32
    %102 = vector.broadcast %cst_55 : f32 to vector<128x256xf32>
    %103 = arith.mulf %102, %101 : vector<128x256xf32>
    %104 = arith.maximumf %101, %103 : vector<128x256xf32>
    %105 = arith.addf %104, %104 : vector<128x256xf32>
    %cst_56 = arith.constant 0.00999999977 : f32
    %106 = vector.broadcast %cst_56 : f32 to vector<128x256xf32>
    %107 = arith.mulf %106, %105 : vector<128x256xf32>
    %108 = arith.maximumf %105, %107 : vector<128x256xf32>
    %c0_57 = arith.constant 0 : index
    %c0_58 = arith.constant 0 : index
    %109 = vector.load %arg11[%c0_57, %c0_58] : memref<256x6xbf16, #tpu.memory_space<vmem>>, vector<256x6xbf16>
    %110 = arith.truncf %108 : vector<128x256xf32> to vector<128x256xbf16>
    %cst_59 = arith.constant dense<0.000000e+00> : vector<128x6xf32>
    %111 = tpu.matmul %110, %109, %cst_59 {dimension_numbers = #tpu.dot_dimension_numbers<[1], [0], [0], [1], [0, 0, 1, 1], [], []>} : vector<128x256xbf16>, vector<256x6xbf16>, vector<128x6xf32> -> vector<128x6xf32>
    %c0_60 = arith.constant 0 : index
    %c0_61 = arith.constant 0 : index
    %112 = vector.load %arg12[%c0_60, %c0_61] : memref<1x6xf32, #tpu.memory_space<vmem>>, vector<1x6xf32>
    %113 = vector.broadcast %112 : vector<1x6xf32> to vector<128x6xf32>
    %114 = arith.addf %111, %113 : vector<128x6xf32>
    %115 = arith.negf %114 : vector<128x6xf32>
    %116 = math.exp %115 : vector<128x6xf32>
    %cst_62 = arith.constant 1.000000e+00 : f32
    %117 = vector.broadcast %cst_62 : f32 to vector<128x6xf32>
    %118 = arith.addf %117, %116 : vector<128x6xf32>
    %119 = arith.divf %117, %118 : vector<128x6xf32>
    %cst_63 = arith.constant 0.000000e+00 : f32
    %120 = vector.broadcast %cst_63 : f32 to vector<128x1xf32>
    %121 = tpu.concatenate %119, %93, %120 in 1 : vector<128x6xf32>, vector<128x1xf32>, vector<128x1xf32> -> vector<128x8xf32>
    %c0_64 = arith.constant 0 : index
    %c0_65 = arith.constant 0 : index
    %122 = vector.load %arg13[%c0_64, %c0_65] : memref<128x8xf32, #tpu.memory_space<vmem>>, vector<128x8xf32>
    tpu.vector_store %arg13[%c0_64, %c0_65], %121 {strides = array<i32>} : memref<128x8xf32, #tpu.memory_space<vmem>>, vector<128x8xf32>,
    return
  }
  func.func @transform_0(%arg0: i32) -> (i32, i32) {
    %c0_i32 = arith.constant 0 : i32
    %c0_i32_0 = arith.constant 0 : i32
    return %arg0, %c0_i32 : i32, i32
  }
  func.func @transform_1(%arg0: i32) -> (i32, i32) {
    %c0_i32 = arith.constant 0 : i32
    %c0_i32_0 = arith.constant 0 : i32
    return %arg0, %c0_i32 : i32, i32
  }
  func.func @transform_2(%arg0: i32) -> (i32, i32) {
    %c0_i32 = arith.constant 0 : i32
    %c0_i32_0 = arith.constant 0 : i32
    return %arg0, %c0_i32 : i32, i32
  }
  func.func @transform_3(%arg0: i32) -> (i32, i32, i32) {
    %c0_i32 = arith.constant 0 : i32
    %c0_i32_0 = arith.constant 0 : i32
    %c0_i32_1 = arith.constant 0 : i32
    %c0_i32_2 = arith.constant 0 : i32
    return %c0_i32, %c0_i32_0, %c0_i32_1 : i32, i32, i32
  }
  func.func @transform_4(%arg0: i32) -> (i32, i32, i32) {
    %c0_i32 = arith.constant 0 : i32
    %c0_i32_0 = arith.constant 0 : i32
    %c0_i32_1 = arith.constant 0 : i32
    %c0_i32_2 = arith.constant 0 : i32
    return %c0_i32, %c0_i32_0, %c0_i32_1 : i32, i32, i32
  }
  func.func @transform_5(%arg0: i32) -> (i32, i32) {
    %c0_i32 = arith.constant 0 : i32
    %c0_i32_0 = arith.constant 0 : i32
    %c0_i32_1 = arith.constant 0 : i32
    return %c0_i32, %c0_i32_0 : i32, i32
  }
  func.func @transform_6(%arg0: i32) -> (i32, i32) {
    %c0_i32 = arith.constant 0 : i32
    %c0_i32_0 = arith.constant 0 : i32
    %c0_i32_1 = arith.constant 0 : i32
    return %c0_i32, %c0_i32_0 : i32, i32
  }
  func.func @transform_7(%arg0: i32) -> (i32, i32) {
    %c0_i32 = arith.constant 0 : i32
    %c0_i32_0 = arith.constant 0 : i32
    %c0_i32_1 = arith.constant 0 : i32
    return %c0_i32, %c0_i32_0 : i32, i32
  }
  func.func @transform_8(%arg0: i32) -> (i32, i32) {
    %c0_i32 = arith.constant 0 : i32
    %c0_i32_0 = arith.constant 0 : i32
    %c0_i32_1 = arith.constant 0 : i32
    return %c0_i32, %c0_i32_0 : i32, i32
  }
  func.func @transform_9(%arg0: i32) -> (i32, i32) {
    %c0_i32 = arith.constant 0 : i32
    %c0_i32_0 = arith.constant 0 : i32
    %c0_i32_1 = arith.constant 0 : i32
    return %c0_i32, %c0_i32_0 : i32, i32
  }
  func.func @transform_10(%arg0: i32) -> (i32, i32) {
    %c0_i32 = arith.constant 0 : i32
    %c0_i32_0 = arith.constant 0 : i32
    %c0_i32_1 = arith.constant 0 : i32
    return %c0_i32, %c0_i32_0 : i32, i32
  }
  func.func @transform_11(%arg0: i32) -> (i32, i32) {
    %c0_i32 = arith.constant 0 : i32
    %c0_i32_0 = arith.constant 0 : i32
    %c0_i32_1 = arith.constant 0 : i32
    return %c0_i32, %c0_i32_0 : i32, i32
  }
  func.func @transform_12(%arg0: i32) -> (i32, i32) {
    %c0_i32 = arith.constant 0 : i32
    %c0_i32_0 = arith.constant 0 : i32
    return %arg0, %c0_i32 : i32, i32
  }
}

</mosaic_0001>

<bundles_post_ra>
// kernel: tpu_custom_call.1
= control target key start
LH: loop header
LB: loop body
LE: loop exit
PB: predicated region body
PF: predicated region fallthrough
CT: control target
= control target key end

     0   :  { %17 = vsyncpa [#allocation3], 0  ;;  %s8545_s0 = inlined_call_operand.vmem [shape: bf16[512,63], index: 0, kind: input, shape index: {}]   ;;  %s8546_s1 = inlined_call_operand.vmem [shape: bf16[512,27], index: 1, kind: input, shape index: {}]   ;;  %s8547_s2 = inlined_call_operand.vmem [shape: bf16[512,54], index: 2, kind: input, shape index: {}]   ;;  %s8548_s3 = inlined_call_operand.vmem [shape: bf16[2,63,256], index: 3, kind: input, shape index: {}]   ;;  %s8549_s4 = inlined_call_operand.vmem [shape: bf16[7,256,256], index: 4, kind: input, shape index: {}]   ;;  %s8550_s5 = inlined_call_operand.vmem [shape: f32[8,256], index: 5, kind: input, shape index: {}]   ;;  %s8551_s6 = inlined_call_operand.vmem [shape: bf16[256,129], index: 6, kind: input, shape index: {}]   ;;  %s8552_s7 = inlined_call_operand.hbm [shape: f32[1,129], index: 7, kind: input, shape index: {}]   ;;  %s8553_s8 = inlined_call_operand.hbm [shape: bf16[27,128], index: 8, kind: input, shape index: {}]   ;;  %s8554_s9 = inlined_call_operand.vmem [shape: bf16[54,256], index: 9, kind: input, shape index: {}]   ;;  %s8555_s10 = inlined_call_operand.vmem [shape: bf16[256,6], index: 10, kind: input, shape index: {}]   ;;  %s8556_s11 = inlined_call_operand.vmem [shape: f32[1,6], index: 11, kind: input, shape index: {}]   ;;  %s8557_s12 = inlined_call_operand.vmem [shape: f32[512,8], index: 12, kind: output, shape index: {}]  }
   0x1   :  { %18 = vsyncpa [#allocation5], 0  ;;  %s6778_s21 = smov 0  }
   0x2 LB: > { %s5314_s22 = sadd.s32 4294967295, %s6704_s21   ;;  %p5316_p0 = scmp.ge.s32.totalorder %s6704_s21, 1  ;;  %s6704_s21 = sphi %s6778_s21, %s24_s21  }
   0x3   : > { %p322_p1 = scmp.lt.s32.totalorder %s6704_s21, 5  ;;  %p6788_p2 = scmp.eq.s32.totalorder %s5314_s22, 0 }
   0x4   : > { %s6706_s24 = smov [#allocation2]   ;;  %s6707_s27 = smov [#allocation4]  }
   0x5   : > { %s8561_s23 = scalar_select %p6788_p2, 1, 0 }
   0x6   : > { %s347_s25 = sshll.u32 %s6706_s24, 4  ;;  %p6792_p3 = pnand %p5316_p0, %p322_p1  ;;  %s348_s25 = int_to_ptr.vmem [resolvable:$true] %s347_s25 }
   0x7   : > { %s357_s28 = sshll.u32 %s6707_s27, 4  ;;  %s6634_s14 = scalar_lea.hbm %s8552_s7, 32  ;;  %s6804_s28 = int_to_ptr.vmem [resolvable:$true] %s357_s28 }
   0x8   : > { %s8562_s26 = scalar_select %p6792_p3, 1, 0 }
   0x9   : > { %p6071_p4 = pneg %p6792_p3  ;;  %p6635_p6 = scmp.ne.s32.totalorder %s8552_s7, %s6634_s14 }
   0xa   : > { %p6641_p10 = scmp.lt.u32.totalorder %s6634_s14, %s8552_s7 }
   0xb   : > { %p6800_p5 = pnand %p6788_p2, %p6071_p4 }
   0xd   : > { %p6636_p7 = pneg %p6800_p5 }
   0xf   : > { %p6637_p8 = pnand %p6636_p7, %p6635_p6 }
  0x11   : > { %p6638_p9 = pneg %p6637_p8 }
  0x13   : > { %p6643_p11 = pnand %p6641_p10, %p6638_p9 }
  0x15   : > { %6646 = shalt.err (!%p6643_p11)
}
  0x16   : > { %s6647_s19 = scalar_lea.vmem %s348_s25, 32  ;;  %p6655_p1 = scmp.lt.s32.totalorder %s348_s25, %s348_s25 }
  0x17   : > { %p6648_p12 = scmp.ne.s32.totalorder %s348_s25, %s6647_s19  ;;  %p6656_p4 = scmp.lt.s32.totalorder %s6647_s19, %s6647_s19 }
  0x19   : > { %p6650_p13 = pnand %p6648_p12, %p6636_p7  ;;  %p6657_p2 = por %p6656_p4, %p6655_p1 }
  0x1b   : > { %p6651_p0 = pneg %p6650_p13 }
  0x1d   : > { %p6658_p3 = pnand %p6657_p2, %p6651_p0 }
  0x1f   : > { %6661 = shalt.err (!%p6658_p3)
}
  0x20   : > { %6074 = dma.hbm_to_vmem [thread:$0]  (!%p6800_p5), %s8552_s7, 32, %s348_s25, [#allocation3]  }
  0x21   : > { %s6662_s13 = scalar_lea.hbm %s8553_s8, 256 }
  0x22   : > { %p6663_p6 = scmp.ne.s32.totalorder %s8553_s8, %s6662_s13  ;;  %p6669_p3 = scmp.lt.u32.totalorder %s6662_s13, %s8553_s8 }
  0x24   : > { %p6665_p8 = pnand %p6663_p6, %p6636_p7 }
  0x26   : > { %p6666_p2 = pneg %p6665_p8 }
  0x28   : > { %p6671_p9 = pnand %p6669_p3, %p6666_p2 }
  0x2a   : > { %6674 = shalt.err (!%p6671_p9)
}
  0x2b   : > { %s6675_s25 = scalar_lea.vmem %s6804_s28, 256  ;;  %p6683_p13 = scmp.lt.s32.totalorder %s6804_s28, %s6804_s28 }
  0x2c   : > { %p6676_p10 = scmp.ne.s32.totalorder %s6804_s28, %s6675_s25  ;;  %p6684_p0 = scmp.lt.s32.totalorder %s6675_s25, %s6675_s25 }
  0x2e   : > { %p6678_p11 = pnand %p6676_p10, %p6636_p7  ;;  %p6685_p1 = por %p6684_p0, %p6683_p13 }
  0x30   : > { %p6679_p12 = pneg %p6678_p11 }
  0x32   : > { %p6686_p4 = pnand %p6685_p1, %p6679_p12 }
  0x34   : > { %6689 = shalt.err (!%p6686_p4)
}
  0x35   : > { %s6708_s18 = smov 64   ;;  %s6709_s19 = smov 4  }
  0x36   : > { %6077 = dma.hbm_to_vmem [thread:$0]  (!%p6800_p5), %s8553_s8, 256, %s6804_s28, [#allocation5], %s6708_s18, %s6708_s18, %s6709_s19  }
  0x37   : > { %p8564_p6 = scmp.ne.s32.totalorder %s8562_s26, 0 }
  0x38   : > { %p8565_p7 = scmp.ne.s32.totalorder (!%p8564_p6), %s8561_s23, 0 }
  0x39   : > { %409 = sbr.rel (%p8564_p6) target bundleno = 2452 (0x994), region = 68 }
  0x40   : > { %6695 = dma.done.wait (%p8565_p7), [#allocation3], 32  }
  0x41   : > { %6697 = vsyncadd (%p8565_p7), [#allocation3], 4294967264 }
  0x42   : > { %6699 = dma.done.wait (%p8565_p7), [#allocation5], 256  }
  0x43   : > { %6701 = vsyncadd (%p8565_p7), [#allocation5], 4294967040  ;;  %v6710_v0 = vmov 0   ;;  %s5323_s28 = sshll.u32 %s5314_s22, 4  ;;  %vm659_vm0 = vcmask 1046528   ;;  %vm660_vm1 = vcmask 1047552  }
  0x44   : > { %701 = vmatprep.mubr.bf16.mxu0 %v6710_v0  ;;  %p466_p5 = scmp.lt.s32.totalorder %s5323_s28, 63  ;;  %v6097_v1 = vld [vmem:[%s8548_s3 + $0x4] ss:$8 sps:$4 sm:$0xff]   ;;  %v6099_v2 = vld [vmem:[%s8548_s3] ss:$8 sps:$4 sm:$0xff]   ;;  %v6711_v4 = vmov 65535  }
  0x45   : > { %669 = vmatprep.subr.bf16.mxu0 %v6097_v1  ;;  %v6100_v3 = vld [vmem:[%s8548_s3 + $0x14] ss:$8 sps:$4 sm:$0xff]   ;;  %v661_v5 = vsel %vm659_vm0, 4294967295, %v6711_v4  ;;  %v6102_v6 = vld [vmem:[%s8548_s3 + $0x10] ss:$8 sps:$4 sm:$0xff]   ;;  %vm634_vm2 = vcmask 515072  }
  0x46   : > { %s8567_s28 = smov (!%p466_p5, %s5323_s28), 63  ;;  %670 = vmatpush1.bf16.msra.mxu0 %v6099_v2  ;;  %v6103_v7 = vld [vmem:[%s8548_s3 + $0x24] ss:$8 sps:$4 sm:$0xff]   ;;  %v6106_v8 = vld [vmem:[%s8548_s3 + $0x34] ss:$8 sps:$4 sm:$0xff]   ;;  %v6896_v9 = vsel %vm660_vm1, %v661_v5, 0 }
  0x47   : > { %s6875_s23 = sshll.u32 %s8567_s28, 2  ;;  %671 = vmatprep.subr.bf16.mxu0 %v6100_v3  ;;  %v6105_v10 = vld [vmem:[%s8548_s3 + $0x20] ss:$8 sps:$4 sm:$0xff]   ;;  %v6108_v11 = vld [vmem:[%s8548_s3 + $0x30] ss:$8 sps:$4 sm:$0xff]   ;;  %v667_v12 = vand.u32 %v6106_v8, %v6896_v9  ;;  %vm4214_vm3 = vcmask 1044480  }
  0x48   : > { %s6894_s24 = scalar_lea.vmem %s8545_s0, %s6875_s23  ;;  %v664_v13 = vand.u32 %v6108_v11, %v6896_v9  ;;  %v6117_v15 = vld [vmem:[%s8549_s4 + $0x4] ss:$8 sps:$4 sm:$0xff]   ;;  %v6119_v16 = vld [vmem:[%s8549_s4] ss:$8 sps:$4 sm:$0xff]   ;;  %v6120_v17 = vld [vmem:[%s8549_s4 + $0x14] ss:$8 sps:$4 sm:$0xff]   ;;  %s7029_s26 = scalar_lea.vmem %s8547_s2, %s6875_s23 }
  0x49   : > { %v6109_v14 = vld [vmem:[%s6894_s24] sm:$0xff]   ;;  %1062 = vmatprep.subr.bf16.mxu1 %v6117_v15  ;;  %v6122_v18 = vld [vmem:[%s8549_s4 + $0x10] ss:$8 sps:$4 sm:$0xff]   ;;  %v6110_v21 = vld [vmem:[%s6894_s24 + $0x8] sm:$0xff]   ;;  %s8170_s13 = scalar_lea.vmem %s8546_s1, %s6875_s23  ;;  %vm4215_vm4 = vcmask 1045504   ;;  %vm4189_vm5 = vcmask 220160  }
  0x4a   : > { %672 = vmatpush1.bf16.msra.mxu0 %v6102_v6  ;;  %1063 = vmatpush1.bf16.msra.mxu1 %v6119_v16  ;;  %v6123_v19 = vld [vmem:[%s8549_s4 + $0x24] ss:$8 sps:$4 sm:$0xff]   ;;  %v6125_v20 = vld [vmem:[%s8549_s4 + $0x20] ss:$8 sps:$4 sm:$0xff]   ;;  %v6126_v22 = vld [vmem:[%s8549_s4 + $0x34] ss:$8 sps:$4 sm:$0xff]  }
  0x4b   : > { %673 = vmatprep.subr.bf16.mxu0 %v6103_v7  ;;  %1064 = vmatprep.subr.bf16.mxu1 %v6120_v17  ;;  %v6128_v23 = vld [vmem:[%s8549_s4 + $0x30] ss:$8 sps:$4 sm:$0xff]   ;;  %v6129_v24 = vld [vmem:[%s8549_s4 + $0x44] ss:$8 sps:$4 sm:$0xff]   ;;  %v6131_v25 = vld [vmem:[%s8549_s4 + $0x40] ss:$8 sps:$4 sm:$0xff]   ;;  %v548_v17 = vlaneseq }
  0x4c   : > { %v6111_v26 = vld [vmem:[%s6894_s24 + $0x10] sm:$0xff]   ;;  %v6135_v29 = vld [vmem:[%s8549_s4 + $0x64] ss:$8 sps:$4 sm:$0xff]   ;;  %v6137_v30 = vld [vmem:[%s8549_s4 + $0x60] ss:$8 sps:$4 sm:$0xff]   ;;  %vm4441_vm6 = vcmask 1042432  }
  0x4d   : > { %v6132_v27 = vld [vmem:[%s8549_s4 + $0x54] ss:$8 sps:$4 sm:$0xff]   ;;  %v6134_v28 = vld [vmem:[%s8549_s4 + $0x50] ss:$8 sps:$4 sm:$0xff]   ;;  %v6141_v34 = vld [vmem:[%s8549_s4 + $0x84] ss:$8 sps:$4 sm:$0xff]  }
  0x4e   : > { %674 = vmatpush1.bf16.msra.mxu0 %v6105_v10  ;;  %1065 = vmatpush1.bf16.msra.mxu1 %v6122_v18  ;;  %v6112_v31 = vld [vmem:[%s6894_s24 + $0x18] sm:$0xff]   ;;  %v6143_v35 = vld [vmem:[%s8549_s4 + $0x80] ss:$8 sps:$4 sm:$0xff]   ;;  %v6147_v39 = vld [vmem:[%s8549_s4 + $0xa4] ss:$8 sps:$4 sm:$0xff]   ;;  %vm4416_vm7 = vcmask 441344  }
  0x4f   : > { %675 = vmatprep.subr.bf16.mxu0 %v667_v12  ;;  %1066 = vmatprep.subr.bf16.mxu1 %v6123_v19  ;;  %v6138_v32 = vld [vmem:[%s8549_s4 + $0x74] ss:$8 sps:$4 sm:$0xff]   ;;  %v6140_v33 = vld [vmem:[%s8549_s4 + $0x70] ss:$8 sps:$4 sm:$0xff]   ;;  %v6113_v36 = vld [vmem:[%s6894_s24 + $0x20] sm:$0xff]   ;;  %vm5161_vm8 = vcmask 48128  }
  0x50   : > { %v6144_v37 = vld [vmem:[%s8549_s4 + $0x94] ss:$8 sps:$4 sm:$0xff]   ;;  %v6146_v38 = vld [vmem:[%s8549_s4 + $0x90] ss:$8 sps:$4 sm:$0xff]   ;;  %v6149_v40 = vld [vmem:[%s8549_s4 + $0xa0] ss:$8 sps:$4 sm:$0xff]  }
  0x51   : > { %v6114_v41 = vld [vmem:[%s6894_s24 + $0x28] sm:$0xff]   ;;  %v6150_v42 = vld [vmem:[%s8549_s4 + $0xb4] ss:$8 sps:$4 sm:$0xff]   ;;  %v6152_v43 = vld [vmem:[%s8549_s4 + $0xb0] ss:$8 sps:$4 sm:$0xff]   ;;  %vm5178_vm9 = vcmask 56320  }
  0x52   : > { %676 = vmatpush1.bf16.msra.mxu0 %v664_v13  ;;  %1067 = vmatpush1.bf16.msra.mxu1 %v6125_v20  ;;  %v6153_v44 = vld [vmem:[%s8549_s4 + $0xc4] ss:$8 sps:$4 sm:$0xff]   ;;  %v6155_v45 = vld [vmem:[%s8549_s4 + $0xc0] ss:$8 sps:$4 sm:$0xff]   ;;  %v6115_v46 = vld [vmem:[%s6894_s24 + $0x30] sm:$0xff]   ;;  %v7109_v20 = vshrl.u32 %v548_v17, 7 }
  0x53   : > { %1068 = vmatprep.subr.bf16.mxu1 %v6126_v22  ;;  %v6116_v47 = vld [vmem:[%s6894_s24 + $0x38] sm:$0xff]   ;;  %v6159_v50 = vld [vmem:[%s8549_s4 + $0xe4] ss:$8 sps:$4 sm:$0xff]   ;;  %v6161_v51 = vld [vmem:[%s8549_s4 + $0xe0] ss:$8 sps:$4 sm:$0xff]   ;;  %vm5195_vm10 = vcmask 64512  }
  0x54   : > { %v6156_v48 = vld [vmem:[%s8549_s4 + $0xd4] ss:$8 sps:$4 sm:$0xff]   ;;  %v6158_v49 = vld [vmem:[%s8549_s4 + $0xd0] ss:$8 sps:$4 sm:$0xff]   ;;  %v6165_v54 = vld [vmem:[%s8549_s4 + $0x100] ss:$8 sps:$4 sm:$0xff]  }
  0x55   : > { %5347 = vmatmul.mubr.msk.bf16.vlgmr.msra.gmra.mrb[0].mxu0 %vm634_vm2, %v6109_v14  ;;  %v6162_v52 = vld [vmem:[%s8549_s4 + $0xf4] ss:$8 sps:$4 sm:$0xff]   ;;  %v6164_v53 = vld [vmem:[%s8549_s4 + $0xf0] ss:$8 sps:$4 sm:$0xff]   ;;  %v6167_v55 = vld [vmem:[%s8549_s4 + $0x104] ss:$8 sps:$4 sm:$0xff]  }
  0x56   : > { %711 = vmatprep.mubr.bf16.mxu0 %v6710_v0  ;;  %1069 = vmatpush1.bf16.msra.mxu1 %v6128_v23  ;;  %v6170_v56 = vld [vmem:[%s8549_s4 + $0x114] ss:$8 sps:$4 sm:$0xff]   ;;  %v6168_v57 = vld [vmem:[%s8549_s4 + $0x110] ss:$8 sps:$4 sm:$0xff]   ;;  %v6173_v58 = vld [vmem:[%s8549_s4 + $0x124] ss:$8 sps:$4 sm:$0xff]  }
  0x57   : > { %1070 = vmatprep.subr.bf16.mxu1 %v6129_v24  ;;  %1456 = vmatprep.subr.bf16.mxu0 %v6167_v55  ;;  %v6171_v59 = vld [vmem:[%s8549_s4 + $0x120] ss:$8 sps:$4 sm:$0xff]   ;;  %v6176_v60 = vld [vmem:[%s8549_s4 + $0x134] ss:$8 sps:$4 sm:$0xff]   ;;  %v6174_v61 = vld [vmem:[%s8549_s4 + $0x130] ss:$8 sps:$4 sm:$0xff]  }
  0x58   : > { %1457 = vmatpush1.bf16.msra.mxu0 %v6165_v54  ;;  %v6179_v62 = vld [vmem:[%s8549_s4 + $0x144] ss:$8 sps:$4 sm:$0xff]   ;;  %v6177_v63 = vld [vmem:[%s8549_s4 + $0x140] ss:$8 sps:$4 sm:$0xff]   ;;  %v6182_v1 = vld [vmem:[%s8549_s4 + $0x154] ss:$8 sps:$4 sm:$0xff]  }
  0x59   : > { %1458 = vmatprep.subr.bf16.mxu0 %v6170_v56  ;;  %v6180_v2 = vld [vmem:[%s8549_s4 + $0x150] ss:$8 sps:$4 sm:$0xff]   ;;  %v6185_v3 = vld [vmem:[%s8549_s4 + $0x164] ss:$8 sps:$4 sm:$0xff]   ;;  %v6183_v5 = vld [vmem:[%s8549_s4 + $0x160] ss:$8 sps:$4 sm:$0xff]  }
  0x5a   : > { %1071 = vmatpush1.bf16.msra.mxu1 %v6131_v25  ;;  %v6188_v6 = vld [vmem:[%s8549_s4 + $0x174] ss:$8 sps:$4 sm:$0xff]   ;;  %v6186_v7 = vld [vmem:[%s8549_s4 + $0x170] ss:$8 sps:$4 sm:$0xff]   ;;  %v6191_v8 = vld [vmem:[%s8549_s4 + $0x184] ss:$8 sps:$4 sm:$0xff]  }
  0x5b   : > { %1072 = vmatprep.subr.bf16.mxu1 %v6132_v27  ;;  %v6189_v10 = vld [vmem:[%s8549_s4 + $0x180] ss:$8 sps:$4 sm:$0xff]   ;;  %v6194_v11 = vld [vmem:[%s8549_s4 + $0x194] ss:$8 sps:$4 sm:$0xff]   ;;  %v6192_v12 = vld [vmem:[%s8549_s4 + $0x190] ss:$8 sps:$4 sm:$0xff]  }
  0x5c   : > { %1459 = vmatpush1.bf16.msra.mxu0 %v6168_v57  ;;  %v6197_v13 = vld [vmem:[%s8549_s4 + $0x1a4] ss:$8 sps:$4 sm:$0xff]   ;;  %v6195_v14 = vld [vmem:[%s8549_s4 + $0x1a0] ss:$8 sps:$4 sm:$0xff]   ;;  %v6200_v15 = vld [vmem:[%s8549_s4 + $0x1b4] ss:$8 sps:$4 sm:$0xff]  }
  0x5d   : > { %5348 = vmatmul.mubr.msk.bf16.gmra.mrb[4].mxu0 %vm634_vm2, %v6110_v21  ;;  %1460 = vmatprep.subr.bf16.mxu0 %v6173_v58  ;;  %v6198_v16 = vld [vmem:[%s8549_s4 + $0x1b0] ss:$8 sps:$4 sm:$0xff]   ;;  %v6203_v18 = vld [vmem:[%s8549_s4 + $0x1c4] ss:$8 sps:$4 sm:$0xff]   ;;  %v6201_v19 = vld [vmem:[%s8549_s4 + $0x1c0] ss:$8 sps:$4 sm:$0xff]  }
  0x5e   : > { %721 = vmatprep.mubr.bf16.mxu0 %v6710_v0  ;;  %1073 = vmatpush1.bf16.msra.mxu1 %v6134_v28  ;;  %v7112_v21 = vsub.s32 0, %v7109_v20  ;;  %v7117_v22 = vld [vmem:[%s8550_s5] sm:$0xff]  ;;  %v7122_v23 = vld [vmem:[%s8550_s5 + $0x8] sm:$0xff] }
  0x5f   : > { %1074 = vmatprep.subr.bf16.mxu1 %v6135_v29 }
  0x60   : > { %1461 = vmatpush1.bf16.msra.mxu0 %v6171_v59  ;;  %v7126_v24 = vrot.slane %v7117_v22, %v7112_v21  ;;  %v7130_v25 = vrot.slane %v7122_v23, %v7112_v21 }
  0x61   : > { %1462 = vmatprep.subr.bf16.mxu0 %v6176_v60 }
  0x62   : > { %1075 = vmatpush1.bf16.msra.mxu1 %v6137_v30 }
  0x63   : > { %1076 = vmatprep.subr.bf16.mxu1 %v6138_v32 }
  0x64   : > { %1463 = vmatpush1.bf16.msra.mxu0 %v6174_v61 }
  0x65   : > { %5349 = vmatmul.mubr.msk.bf16.gmra.mrb[8].mxu0 %vm634_vm2, %v6111_v26  ;;  %1464 = vmatprep.subr.bf16.mxu0 %v6179_v62 }
  0x66   : > { %731 = vmatprep.mubr.bf16.mxu0 %v6710_v0  ;;  %1077 = vmatpush1.bf16.msra.mxu1 %v6140_v33 }
  0x67   : > { %1078 = vmatprep.subr.bf16.mxu1 %v6141_v34 }
  0x68   : > { %1465 = vmatpush1.bf16.msra.mxu0 %v6177_v63 }
  0x69   : > { %1466 = vmatprep.subr.bf16.mxu0 %v6182_v1 }
  0x6a   : > { %1079 = vmatpush1.bf16.msra.mxu1 %v6143_v35 }
  0x6b   : > { %1080 = vmatprep.subr.bf16.mxu1 %v6144_v37 }
  0x6c   : > { %1467 = vmatpush1.bf16.msra.mxu0 %v6180_v2 }
  0x6d   : > { %5350 = vmatmul.mubr.msk.bf16.gmra.mrb[12].mxu0 %vm634_vm2, %v6112_v31  ;;  %1468 = vmatprep.subr.bf16.mxu0 %v6185_v3 }
  0x6e   : > { %741 = vmatprep.mubr.bf16.mxu0 %v6710_v0  ;;  %1081 = vmatpush1.bf16.msra.mxu1 %v6146_v38 }
  0x6f   : > { %1082 = vmatprep.subr.bf16.mxu1 %v6147_v39 }
  0x70   : > { %1469 = vmatpush1.bf16.msra.mxu0 %v6183_v5 }
  0x71   : > { %1470 = vmatprep.subr.bf16.mxu0 %v6188_v6 }
  0x72   : > { %1083 = vmatpush1.bf16.msra.mxu1 %v6149_v40 }
  0x73   : > { %1084 = vmatprep.subr.bf16.mxu1 %v6150_v42 }
  0x74   : > { %1471 = vmatpush1.bf16.msra.mxu0 %v6186_v7 }
  0x75   : > { %5351 = vmatmul.mubr.msk.bf16.gmra.mrb[16].mxu0 %vm634_vm2, %v6113_v36  ;;  %1472 = vmatprep.subr.bf16.mxu0 %v6191_v8 }
  0x76   : > { %751 = vmatprep.mubr.bf16.mxu0 %v6710_v0  ;;  %1085 = vmatpush1.bf16.msra.mxu1 %v6152_v43 }
  0x77   : > { %1086 = vmatprep.subr.bf16.mxu1 %v6153_v44 }
  0x78   : > { %1473 = vmatpush1.bf16.msra.mxu0 %v6189_v10 }
  0x79   : > { %1474 = vmatprep.subr.bf16.mxu0 %v6194_v11 }
  0x7a   : > { %1087 = vmatpush1.bf16.msra.mxu1 %v6155_v45 }
  0x7b   : > { %1088 = vmatprep.subr.bf16.mxu1 %v6156_v48 }
  0x7c   : > { %1475 = vmatpush1.bf16.msra.mxu0 %v6192_v12 }
  0x7d   : > { %5352 = vmatmul.mubr.msk.bf16.gmra.mrb[20].mxu0 %vm634_vm2, %v6114_v41  ;;  %1476 = vmatprep.subr.bf16.mxu0 %v6197_v13 }
  0x7e   : > { %761 = vmatprep.mubr.bf16.mxu0 %v6710_v0  ;;  %1089 = vmatpush1.bf16.msra.mxu1 %v6158_v49 }
  0x7f   : > { %1090 = vmatprep.subr.bf16.mxu1 %v6159_v50 }
  0x80   : > { %1477 = vmatpush1.bf16.msra.mxu0 %v6195_v14 }
  0x81   : > { %1478 = vmatprep.subr.bf16.mxu0 %v6200_v15 }
  0x82   : > { %1091 = vmatpush1.bf16.msra.mxu1 %v6161_v51 }
  0x83   : > { %1092 = vmatprep.subr.bf16.mxu1 %v6162_v52 }
  0x84   : > { %1479 = vmatpush1.bf16.msra.mxu0 %v6198_v16 }
  0x85   : > { %5353 = vmatmul.mubr.msk.bf16.gmra.mrb[24].mxu0 %vm634_vm2, %v6115_v46  ;;  %1480 = vmatprep.subr.bf16.mxu0 %v6203_v18 }
  0x86   : > { %771 = vmatprep.mubr.bf16.mxu0 %v6710_v0  ;;  %1093 = vmatpush1.bf16.msra.mxu1 %v6164_v53 }
  0x88   : > { %1481 = vmatpush1.bf16.msra.mxu0 %v6201_v19 }
  0x8d   : > { %5354 = vmatmul.mubr.msk.bf16.gmra.mrb[28].mxu0 %vm634_vm2, %v6116_v47 }
 0x128   : > { %v703_v26 = vpop.f32.mrb[0].mxu0 }
 0x129   : > { %v704_v27 = vadd.f32 %v703_v26, %v7126_v24  ;;  %v705_v28 = vpop.f32.mrb[1].mxu0 }
 0x12a   : > { %v706_v29 = vadd.f32 %v705_v28, %v7130_v25  ;;  %v707_v30 = vpop.f32.mrb[2].mxu0 }
 0x12b   : > { %v782_v31 = vmul.f32 0.01, %v704_v27  ;;  %v708_v32 = vadd.f32 %v707_v30, %v7126_v24  ;;  %v709_v33 = vpop.f32.mrb[3].mxu0 }
 0x12c   : > { %v783_v34 = vmul.f32 0.01, %v706_v29  ;;  %v710_v35 = vadd.f32 %v709_v33, %v7130_v25 }
 0x12d   : > { %v784_v36 = vmul.f32 0.01, %v708_v32  ;;  %v814_v38 = vmax.f32 %v704_v27, %v782_v31 }
 0x12e   : > { %v785_v37 = vmul.f32 0.01, %v710_v35  ;;  %v815_v41 = vmax.f32 %v706_v29, %v783_v34 }
 0x12f   : > { %v816_v39 = vmax.f32 %v708_v32, %v784_v36 }
 0x130   : > { %v713_v40 = vpop.f32.mrb[4].mxu0  ;;  %v817_v42 = vmax.f32 %v710_v35, %v785_v37 }
 0x131   : > { %v714_v43 = vadd.f32 %v713_v40, %v7126_v24  ;;  %v715_v44 = vpop.f32.mrb[5].mxu0  ;;  %v878_v45 = vpack.c.bf16 %v816_v39, %v814_v38 }
 0x132   : > { %v716_v46 = vadd.f32 %v715_v44, %v7130_v25  ;;  %v717_v47 = vpop.f32.mrb[6].mxu0  ;;  %v879_v48 = vpack.c.bf16 %v817_v42, %v815_v41 }
 0x133   : > { %v786_v49 = vmul.f32 0.01, %v714_v43  ;;  %v718_v50 = vadd.f32 %v717_v47, %v7126_v24  ;;  %v719_v51 = vpop.f32.mrb[7].mxu0 }
 0x134   : > { %v787_v52 = vmul.f32 0.01, %v716_v46  ;;  %v720_v53 = vadd.f32 %v719_v51, %v7130_v25  ;;  %1094 = vmatprep.mubr.bf16.mxu1 %v879_v48 }
 0x135   : > { %v818_v54 = vmax.f32 %v714_v43, %v786_v49  ;;  %v788_v55 = vmul.f32 0.01, %v718_v50  ;;  %1095 = vmatmul.mubr.bf16.vlgmr.msra.gmra.mrb[0].mxu1 %v878_v45 }
 0x136   : > { %v819_v56 = vmax.f32 %v716_v46, %v787_v52  ;;  %v789_v57 = vmul.f32 0.01, %v720_v53 }
 0x137   : > { %v820_v58 = vmax.f32 %v718_v50, %v788_v55 }
 0x138   : > { %v821_v59 = vmax.f32 %v720_v53, %v789_v57  ;;  %v723_v60 = vpop.f32.mrb[8].mxu0 }
 0x139   : > { %v724_v61 = vadd.f32 %v723_v60, %v7126_v24  ;;  %v725_v62 = vpop.f32.mrb[9].mxu0  ;;  %v880_v63 = vpack.c.bf16 %v820_v58, %v818_v54 }
 0x13a   : > { %v726_v1 = vadd.f32 %v725_v62, %v7130_v25  ;;  %v727_v2 = vpop.f32.mrb[10].mxu0  ;;  %v881_v3 = vpack.c.bf16 %v821_v59, %v819_v56 }
 0x13b   : > { %v790_v5 = vmul.f32 0.01, %v724_v61  ;;  %v728_v6 = vadd.f32 %v727_v2, %v7126_v24  ;;  %v729_v7 = vpop.f32.mrb[11].mxu0 }
 0x13c   : > { %v791_v8 = vmul.f32 0.01, %v726_v1  ;;  %v730_v10 = vadd.f32 %v729_v7, %v7130_v25  ;;  %1104 = vmatprep.mubr.bf16.mxu1 %v881_v3 }
 0x13d   : > { %v822_v11 = vmax.f32 %v724_v61, %v790_v5  ;;  %v792_v12 = vmul.f32 0.01, %v728_v6  ;;  %1105 = vmatmul.mubr.bf16.gmra.mrb[4].mxu1 %v880_v63 }
 0x13e   : > { %v823_v13 = vmax.f32 %v726_v1, %v791_v8  ;;  %v793_v14 = vmul.f32 0.01, %v730_v10 }
 0x13f   : > { %v824_v15 = vmax.f32 %v728_v6, %v792_v12 }
 0x140   : > { %v825_v16 = vmax.f32 %v730_v10, %v793_v14  ;;  %v733_v17 = vpop.f32.mrb[12].mxu0 }
 0x141   : > { %v734_v18 = vadd.f32 %v733_v17, %v7126_v24  ;;  %v735_v19 = vpop.f32.mrb[13].mxu0  ;;  %v882_v26 = vpack.c.bf16 %v824_v15, %v822_v11 }
 0x142   : > { %v736_v27 = vadd.f32 %v735_v19, %v7130_v25  ;;  %v737_v28 = vpop.f32.mrb[14].mxu0  ;;  %v883_v29 = vpack.c.bf16 %v825_v16, %v823_v13 }
 0x143   : > { %v794_v30 = vmul.f32 0.01, %v734_v18  ;;  %v738_v31 = vadd.f32 %v737_v28, %v7126_v24  ;;  %v739_v32 = vpop.f32.mrb[15].mxu0 }
 0x144   : > { %v795_v33 = vmul.f32 0.01, %v736_v27  ;;  %v740_v34 = vadd.f32 %v739_v32, %v7130_v25  ;;  %1114 = vmatprep.mubr.bf16.mxu1 %v883_v29 }
 0x145   : > { %v826_v35 = vmax.f32 %v734_v18, %v794_v30  ;;  %v796_v36 = vmul.f32 0.01, %v738_v31  ;;  %1115 = vmatmul.mubr.bf16.gmra.mrb[8].mxu1 %v882_v26 }
 0x146   : > { %v827_v37 = vmax.f32 %v736_v27, %v795_v33  ;;  %v797_v38 = vmul.f32 0.01, %v740_v34 }
 0x147   : > { %v828_v39 = vmax.f32 %v738_v31, %v796_v36 }
 0x148   : > { %v829_v40 = vmax.f32 %v740_v34, %v797_v38  ;;  %v743_v41 = vpop.f32.mrb[16].mxu0 }
 0x149   : > { %v744_v42 = vadd.f32 %v743_v41, %v7126_v24  ;;  %v745_v43 = vpop.f32.mrb[17].mxu0  ;;  %v884_v44 = vpack.c.bf16 %v828_v39, %v826_v35 }
 0x14a   : > { %v746_v45 = vadd.f32 %v745_v43, %v7130_v25  ;;  %v747_v46 = vpop.f32.mrb[18].mxu0  ;;  %v885_v47 = vpack.c.bf16 %v829_v40, %v827_v37 }
 0x14b   : > { %v798_v48 = vmul.f32 0.01, %v744_v42  ;;  %v748_v49 = vadd.f32 %v747_v46, %v7126_v24  ;;  %v749_v50 = vpop.f32.mrb[19].mxu0 }
 0x14c   : > { %v799_v51 = vmul.f32 0.01, %v746_v45  ;;  %v750_v52 = vadd.f32 %v749_v50, %v7130_v25  ;;  %1124 = vmatprep.mubr.bf16.mxu1 %v885_v47 }
 0x14d   : > { %v830_v53 = vmax.f32 %v744_v42, %v798_v48  ;;  %v800_v54 = vmul.f32 0.01, %v748_v49  ;;  %1125 = vmatmul.mubr.bf16.gmra.mrb[12].mxu1 %v884_v44 }
 0x14e   : > { %v831_v55 = vmax.f32 %v746_v45, %v799_v51  ;;  %v801_v56 = vmul.f32 0.01, %v750_v52 }
 0x14f   : > { %v832_v57 = vmax.f32 %v748_v49, %v800_v54 }
 0x150   : > { %v833_v58 = vmax.f32 %v750_v52, %v801_v56  ;;  %v753_v59 = vpop.f32.mrb[20].mxu0 }
 0x151   : > { %v754_v60 = vadd.f32 %v753_v59, %v7126_v24  ;;  %v755_v61 = vpop.f32.mrb[21].mxu0  ;;  %v886_v62 = vpack.c.bf16 %v832_v57, %v830_v53 }
 0x152   : > { %v756_v63 = vadd.f32 %v755_v61, %v7130_v25  ;;  %v757_v1 = vpop.f32.mrb[22].mxu0  ;;  %v887_v2 = vpack.c.bf16 %v833_v58, %v831_v55  ;;  %v6207_v61 = vld [vmem:[%s8549_s4 + $0x1e0] ss:$8 sps:$4 sm:$0xff]  }
 0x153   : > { %v802_v3 = vmul.f32 0.01, %v754_v60  ;;  %v758_v5 = vadd.f32 %v757_v1, %v7126_v24  ;;  %v759_v6 = vpop.f32.mrb[23].mxu0  ;;  %v6213_v1 = vld [vmem:[%s8549_s4 + $0x200] ss:$8 sps:$4 sm:$0xff]  }
 0x154   : > { %v803_v7 = vmul.f32 0.01, %v756_v63  ;;  %v760_v8 = vadd.f32 %v759_v6, %v7130_v25  ;;  %1134 = vmatprep.mubr.bf16.mxu1 %v887_v2  ;;  %v6215_v2 = vld [vmem:[%s8549_s4 + $0x204] ss:$8 sps:$4 sm:$0xff]  }
 0x155   : > { %v834_v10 = vmax.f32 %v754_v60, %v802_v3  ;;  %v804_v11 = vmul.f32 0.01, %v758_v5  ;;  %1135 = vmatmul.mubr.bf16.gmra.mrb[16].mxu1 %v886_v62  ;;  %v6209_v60 = vld [vmem:[%s8549_s4 + $0x1e4] ss:$8 sps:$4 sm:$0xff]   ;;  %v6212_v62 = vld [vmem:[%s8549_s4 + $0x1f4] ss:$8 sps:$4 sm:$0xff]   ;;  %1850 = vmatprep.subr.bf16.mxu1 %v6215_v2 }
 0x156   : > { %v835_v12 = vmax.f32 %v756_v63, %v803_v7  ;;  %v805_v13 = vmul.f32 0.01, %v760_v8  ;;  %v6210_v63 = vld [vmem:[%s8549_s4 + $0x1f0] ss:$8 sps:$4 sm:$0xff]   ;;  %v6218_v3 = vld [vmem:[%s8549_s4 + $0x214] ss:$8 sps:$4 sm:$0xff]   ;;  %1851 = vmatpush1.bf16.msra.mxu1 %v6213_v1 }
 0x157   : > { %v836_v14 = vmax.f32 %v758_v5, %v804_v11  ;;  %v6216_v5 = vld [vmem:[%s8549_s4 + $0x210] ss:$8 sps:$4 sm:$0xff]   ;;  %1852 = vmatprep.subr.bf16.mxu1 %v6218_v3  ;;  %v6221_v6 = vld [vmem:[%s8549_s4 + $0x224] ss:$8 sps:$4 sm:$0xff]   ;;  %v6219_v7 = vld [vmem:[%s8549_s4 + $0x220] ss:$8 sps:$4 sm:$0xff]  }
 0x158   : > { %v837_v15 = vmax.f32 %v760_v8, %v805_v13  ;;  %v763_v16 = vpop.f32.mrb[24].mxu0  ;;  %v6224_v8 = vld [vmem:[%s8549_s4 + $0x234] ss:$8 sps:$4 sm:$0xff]   ;;  %v6227_v11 = vld [vmem:[%s8549_s4 + $0x244] ss:$8 sps:$4 sm:$0xff]  }
 0x159   : > { %v764_v17 = vadd.f32 %v763_v16, %v7126_v24  ;;  %v765_v18 = vpop.f32.mrb[25].mxu0  ;;  %v888_v19 = vpack.c.bf16 %v836_v14, %v834_v10  ;;  %v6222_v10 = vld [vmem:[%s8549_s4 + $0x230] ss:$8 sps:$4 sm:$0xff]   ;;  %v6230_v13 = vld [vmem:[%s8549_s4 + $0x254] ss:$8 sps:$4 sm:$0xff]  }
 0x15a   : > { %v766_v26 = vadd.f32 %v765_v18, %v7130_v25  ;;  %v767_v27 = vpop.f32.mrb[26].mxu0  ;;  %v889_v28 = vpack.c.bf16 %v837_v15, %v835_v12  ;;  %1853 = vmatpush1.bf16.msra.mxu1 %v6216_v5  ;;  %v6225_v12 = vld [vmem:[%s8549_s4 + $0x240] ss:$8 sps:$4 sm:$0xff]   ;;  %v6228_v14 = vld [vmem:[%s8549_s4 + $0x250] ss:$8 sps:$4 sm:$0xff]  }
 0x15b   : > { %v806_v29 = vmul.f32 0.01, %v764_v17  ;;  %v768_v30 = vadd.f32 %v767_v27, %v7126_v24  ;;  %v769_v31 = vpop.f32.mrb[27].mxu0  ;;  %1854 = vmatprep.subr.bf16.mxu1 %v6221_v6  ;;  %v6233_v15 = vld [vmem:[%s8549_s4 + $0x264] ss:$8 sps:$4 sm:$0xff]  }
 0x15c   : > { %v807_v32 = vmul.f32 0.01, %v766_v26  ;;  %v770_v33 = vadd.f32 %v769_v31, %v7130_v25  ;;  %1144 = vmatprep.mubr.bf16.mxu1 %v889_v28  ;;  %v6231_v16 = vld [vmem:[%s8549_s4 + $0x260] ss:$8 sps:$4 sm:$0xff]   ;;  %v6234_v18 = vld [vmem:[%s8549_s4 + $0x270] ss:$8 sps:$4 sm:$0xff]  }
 0x15d   : > { %v838_v34 = vmax.f32 %v764_v17, %v806_v29  ;;  %v808_v35 = vmul.f32 0.01, %v768_v30  ;;  %1145 = vmatmul.mubr.bf16.gmra.mrb[20].mxu1 %v888_v19  ;;  %v6236_v17 = vld [vmem:[%s8549_s4 + $0x274] ss:$8 sps:$4 sm:$0xff]   ;;  %v6239_v19 = vld [vmem:[%s8549_s4 + $0x284] ss:$8 sps:$4 sm:$0xff]  }
 0x15e   : > { %v839_v36 = vmax.f32 %v766_v26, %v807_v32  ;;  %v809_v37 = vmul.f32 0.01, %v770_v33  ;;  %1855 = vmatpush1.bf16.msra.mxu1 %v6219_v7  ;;  %v6237_v26 = vld [vmem:[%s8549_s4 + $0x280] ss:$8 sps:$4 sm:$0xff]   ;;  %v6242_v27 = vld [vmem:[%s8549_s4 + $0x294] ss:$8 sps:$4 sm:$0xff]  }
 0x15f   : > { %v840_v38 = vmax.f32 %v768_v30, %v808_v35  ;;  %1856 = vmatprep.subr.bf16.mxu1 %v6224_v8  ;;  %v6240_v28 = vld [vmem:[%s8549_s4 + $0x290] ss:$8 sps:$4 sm:$0xff]   ;;  %v6245_v29 = vld [vmem:[%s8549_s4 + $0x2a4] ss:$8 sps:$4 sm:$0xff]   ;;  %v6243_v30 = vld [vmem:[%s8549_s4 + $0x2a0] ss:$8 sps:$4 sm:$0xff]  }
 0x160   : > { %v841_v39 = vmax.f32 %v770_v33, %v809_v37  ;;  %v773_v40 = vpop.f32.mrb[28].mxu0  ;;  %v6248_v31 = vld [vmem:[%s8549_s4 + $0x2b4] ss:$8 sps:$4 sm:$0xff]   ;;  %v6246_v32 = vld [vmem:[%s8549_s4 + $0x2b0] ss:$8 sps:$4 sm:$0xff]   ;;  %v7261_v35 = vsub.s32 1, %v7109_v20 }
 0x161   : > { %v774_v41 = vadd.f32 %v773_v40, %v7126_v24  ;;  %v775_v42 = vpop.f32.mrb[29].mxu0  ;;  %v890_v43 = vpack.c.bf16 %v840_v38, %v838_v34  ;;  %v6251_v33 = vld [vmem:[%s8549_s4 + $0x2c4] ss:$8 sps:$4 sm:$0xff]   ;;  %v6249_v34 = vld [vmem:[%s8549_s4 + $0x2c0] ss:$8 sps:$4 sm:$0xff]  }
 0x162   : > { %v776_v44 = vadd.f32 %v775_v42, %v7130_v25  ;;  %v777_v45 = vpop.f32.mrb[30].mxu0  ;;  %v891_v46 = vpack.c.bf16 %v841_v39, %v839_v36  ;;  %1857 = vmatpush1.bf16.msra.mxu1 %v6222_v10  ;;  %v7265_v36 = vrot.slane %v7117_v22, %v7261_v35  ;;  %v7269_v37 = vrot.slane %v7122_v23, %v7261_v35 }
 0x163   : > { %v810_v47 = vmul.f32 0.01, %v774_v41  ;;  %v778_v48 = vadd.f32 %v777_v45, %v7126_v24  ;;  %v779_v49 = vpop.f32.mrb[31].mxu0  ;;  %v6206_v24 = vld [vmem:[%s8549_s4 + $0x1d4] ss:$8 sps:$4 sm:$0xff]   ;;  %1858 = vmatprep.subr.bf16.mxu1 %v6227_v11 }
 0x164   : > { %v811_v50 = vmul.f32 0.01, %v776_v44  ;;  %v780_v51 = vadd.f32 %v779_v49, %v7130_v25  ;;  %1154 = vmatprep.mubr.bf16.mxu1 %v891_v46  ;;  %v6204_v25 = vld [vmem:[%s8549_s4 + $0x1d0] ss:$8 sps:$4 sm:$0xff]   ;;  %1482 = vmatprep.subr.bf16.mxu0 %v6206_v24 }
 0x165   : > { %v842_v52 = vmax.f32 %v774_v41, %v810_v47  ;;  %v812_v53 = vmul.f32 0.01, %v778_v48  ;;  %1155 = vmatmul.mubr.bf16.gmra.mrb[24].mxu1 %v890_v43  ;;  %1483 = vmatpush1.bf16.msra.mxu0 %v6204_v25 }
 0x166   : > { %v843_v54 = vmax.f32 %v776_v44, %v811_v50  ;;  %v813_v55 = vmul.f32 0.01, %v780_v51  ;;  %1484 = vmatprep.subr.bf16.mxu0 %v6209_v60  ;;  %1859 = vmatpush1.bf16.msra.mxu1 %v6225_v12 }
 0x167   : > { %v844_v56 = vmax.f32 %v778_v48, %v812_v53  ;;  %1860 = vmatprep.subr.bf16.mxu1 %v6230_v13 }
 0x168   : > { %v845_v57 = vmax.f32 %v780_v51, %v813_v55 }
 0x169   : > { %v892_v58 = vpack.c.bf16 %v844_v56, %v842_v52  ;;  %1485 = vmatpush1.bf16.msra.mxu0 %v6207_v61 }
 0x16a   : > { %v893_v59 = vpack.c.bf16 %v845_v57, %v843_v54  ;;  %1486 = vmatprep.subr.bf16.mxu0 %v6212_v62  ;;  %1861 = vmatpush1.bf16.msra.mxu1 %v6228_v14 }
 0x16b   : > { %1862 = vmatprep.subr.bf16.mxu1 %v6233_v15 }
 0x16c   : > { %1164 = vmatprep.mubr.bf16.mxu1 %v893_v59 }
 0x16d   : > { %1165 = vmatmul.mubr.bf16.gmra.mrb[28].mxu1 %v892_v58  ;;  %1487 = vmatpush1.bf16.msra.mxu0 %v6210_v63 }
 0x16e   : > { %1863 = vmatpush1.bf16.msra.mxu1 %v6231_v16 }
 0x16f   : > { %1864 = vmatprep.subr.bf16.mxu1 %v6236_v17 }
 0x172   : > { %1865 = vmatpush1.bf16.msra.mxu1 %v6234_v18 }
 0x173   : > { %1866 = vmatprep.subr.bf16.mxu1 %v6239_v19 }
 0x176   : > { %1867 = vmatpush1.bf16.msra.mxu1 %v6237_v26 }
 0x177   : > { %1868 = vmatprep.subr.bf16.mxu1 %v6242_v27 }
 0x17a   : > { %1869 = vmatpush1.bf16.msra.mxu1 %v6240_v28 }
 0x17b   : > { %1870 = vmatprep.subr.bf16.mxu1 %v6245_v29 }
 0x17e   : > { %1871 = vmatpush1.bf16.msra.mxu1 %v6243_v30 }
 0x17f   : > { %1872 = vmatprep.subr.bf16.mxu1 %v6248_v31 }
 0x182   : > { %1873 = vmatpush1.bf16.msra.mxu1 %v6246_v32 }
 0x183   : > { %1874 = vmatprep.subr.bf16.mxu1 %v6251_v33 }
 0x186   : > { %1875 = vmatpush1.bf16.msra.mxu1 %v6249_v34 }
 0x208   : > { %v1096_v38 = vpop.f32.mrb[0].mxu1 }
 0x209   : > { %v1097_v39 = vadd.f32 %v1096_v38, %v7265_v36  ;;  %v1098_v40 = vpop.f32.mrb[1].mxu1 }
 0x20a   : > { %v1099_v41 = vadd.f32 %v1098_v40, %v7269_v37  ;;  %v1100_v42 = vpop.f32.mrb[2].mxu1 }
 0x20b   : > { %v1175_v43 = vmul.f32 0.01, %v1097_v39  ;;  %v1101_v44 = vadd.f32 %v1100_v42, %v7265_v36  ;;  %v1102_v45 = vpop.f32.mrb[3].mxu1 }
 0x20c   : > { %v1176_v46 = vmul.f32 0.01, %v1099_v41  ;;  %v1103_v47 = vadd.f32 %v1102_v45, %v7269_v37 }
 0x20d   : > { %v1177_v48 = vmul.f32 0.01, %v1101_v44  ;;  %v1207_v50 = vmax.f32 %v1097_v39, %v1175_v43 }
 0x20e   : > { %v1178_v49 = vmul.f32 0.01, %v1103_v47  ;;  %v1208_v52 = vmax.f32 %v1099_v41, %v1176_v46 }
 0x20f   : > { %v1209_v51 = vmax.f32 %v1101_v44, %v1177_v48 }
 0x210   : > { %v1210_v53 = vmax.f32 %v1103_v47, %v1178_v49  ;;  %v1106_v54 = vpop.f32.mrb[4].mxu1 }
 0x211   : > { %v1272_v55 = vpack.c.bf16 %v1209_v51, %v1207_v50  ;;  %v1107_v56 = vadd.f32 %v1106_v54, %v7265_v36  ;;  %v1108_v57 = vpop.f32.mrb[5].mxu1 }
 0x212   : > { %v1109_v58 = vadd.f32 %v1108_v57, %v7269_v37  ;;  %v1110_v59 = vpop.f32.mrb[6].mxu1  ;;  %v1273_v24 = vpack.c.bf16 %v1210_v53, %v1208_v52 }
 0x213   : > { %v1179_v25 = vmul.f32 0.01, %v1107_v56  ;;  %v1111_v60 = vadd.f32 %v1110_v59, %v7265_v36  ;;  %v1112_v61 = vpop.f32.mrb[7].mxu1 }
 0x214   : > { %v1180_v62 = vmul.f32 0.01, %v1109_v58  ;;  %v1113_v63 = vadd.f32 %v1112_v61, %v7269_v37  ;;  %1488 = vmatprep.mubr.bf16.mxu0 %v1273_v24 }
 0x215   : > { %v1211_v1 = vmax.f32 %v1107_v56, %v1179_v25  ;;  %v1181_v2 = vmul.f32 0.01, %v1111_v60  ;;  %1489 = vmatmul.mubr.bf16.vlgmr.msra.gmra.mrb[32].mxu0 %v1272_v55 }
 0x216   : > { %v1212_v3 = vmax.f32 %v1109_v58, %v1180_v62  ;;  %v1182_v5 = vmul.f32 0.01, %v1113_v63 }
 0x217   : > { %v1213_v6 = vmax.f32 %v1111_v60, %v1181_v2 }
 0x218   : > { %v1214_v7 = vmax.f32 %v1113_v63, %v1182_v5  ;;  %v1116_v8 = vpop.f32.mrb[8].mxu1 }
 0x219   : > { %v1117_v10 = vadd.f32 %v1116_v8, %v7265_v36  ;;  %v1118_v11 = vpop.f32.mrb[9].mxu1  ;;  %v1274_v12 = vpack.c.bf16 %v1213_v6, %v1211_v1 }
 0x21a   : > { %v1119_v13 = vadd.f32 %v1118_v11, %v7269_v37  ;;  %v1120_v14 = vpop.f32.mrb[10].mxu1  ;;  %v1275_v15 = vpack.c.bf16 %v1214_v7, %v1212_v3 }
 0x21b   : > { %v1183_v16 = vmul.f32 0.01, %v1117_v10  ;;  %v1121_v17 = vadd.f32 %v1120_v14, %v7265_v36  ;;  %v1122_v18 = vpop.f32.mrb[11].mxu1 }
 0x21c   : > { %v1184_v19 = vmul.f32 0.01, %v1119_v13  ;;  %v1123_v26 = vadd.f32 %v1122_v18, %v7269_v37  ;;  %1498 = vmatprep.mubr.bf16.mxu0 %v1275_v15 }
 0x21d   : > { %v1215_v27 = vmax.f32 %v1117_v10, %v1183_v16  ;;  %v1185_v28 = vmul.f32 0.01, %v1121_v17  ;;  %1499 = vmatmul.mubr.bf16.gmra.mrb[36].mxu0 %v1274_v12 }
 0x21e   : > { %v1216_v29 = vmax.f32 %v1119_v13, %v1184_v19  ;;  %v1186_v30 = vmul.f32 0.01, %v1123_v26 }
 0x21f   : > { %v1217_v31 = vmax.f32 %v1121_v17, %v1185_v28 }
 0x220   : > { %v1218_v32 = vmax.f32 %v1123_v26, %v1186_v30  ;;  %v1126_v33 = vpop.f32.mrb[12].mxu1 }
 0x221   : > { %v1127_v34 = vadd.f32 %v1126_v33, %v7265_v36  ;;  %v1128_v38 = vpop.f32.mrb[13].mxu1  ;;  %v1276_v39 = vpack.c.bf16 %v1217_v31, %v1215_v27 }
 0x222   : > { %v1129_v40 = vadd.f32 %v1128_v38, %v7269_v37  ;;  %v1130_v41 = vpop.f32.mrb[14].mxu1  ;;  %v1277_v42 = vpack.c.bf16 %v1218_v32, %v1216_v29 }
 0x223   : > { %v1187_v43 = vmul.f32 0.01, %v1127_v34  ;;  %v1131_v44 = vadd.f32 %v1130_v41, %v7265_v36  ;;  %v1132_v45 = vpop.f32.mrb[15].mxu1 }
 0x224   : > { %v1188_v46 = vmul.f32 0.01, %v1129_v40  ;;  %v1133_v47 = vadd.f32 %v1132_v45, %v7269_v37  ;;  %1508 = vmatprep.mubr.bf16.mxu0 %v1277_v42 }
 0x225   : > { %v1219_v48 = vmax.f32 %v1127_v34, %v1187_v43  ;;  %v1189_v49 = vmul.f32 0.01, %v1131_v44  ;;  %1509 = vmatmul.mubr.bf16.gmra.mrb[40].mxu0 %v1276_v39 }
 0x226   : > { %v1220_v50 = vmax.f32 %v1129_v40, %v1188_v46  ;;  %v1190_v51 = vmul.f32 0.01, %v1133_v47 }
 0x227   : > { %v1221_v52 = vmax.f32 %v1131_v44, %v1189_v49 }
 0x228   : > { %v1222_v53 = vmax.f32 %v1133_v47, %v1190_v51  ;;  %v1136_v54 = vpop.f32.mrb[16].mxu1 }
 0x229   : > { %v1137_v55 = vadd.f32 %v1136_v54, %v7265_v36  ;;  %v1138_v56 = vpop.f32.mrb[17].mxu1  ;;  %v1278_v57 = vpack.c.bf16 %v1221_v52, %v1219_v48 }
 0x22a   : > { %v1139_v58 = vadd.f32 %v1138_v56, %v7269_v37  ;;  %v1140_v59 = vpop.f32.mrb[18].mxu1  ;;  %v1279_v24 = vpack.c.bf16 %v1222_v53, %v1220_v50 }
 0x22b   : > { %v1191_v25 = vmul.f32 0.01, %v1137_v55  ;;  %v1141_v60 = vadd.f32 %v1140_v59, %v7265_v36  ;;  %v1142_v61 = vpop.f32.mrb[19].mxu1 }
 0x22c   : > { %v1192_v62 = vmul.f32 0.01, %v1139_v58  ;;  %v1143_v63 = vadd.f32 %v1142_v61, %v7269_v37  ;;  %1518 = vmatprep.mubr.bf16.mxu0 %v1279_v24 }
 0x22d   : > { %v1223_v1 = vmax.f32 %v1137_v55, %v1191_v25  ;;  %v1193_v2 = vmul.f32 0.01, %v1141_v60  ;;  %1519 = vmatmul.mubr.bf16.gmra.mrb[44].mxu0 %v1278_v57 }
 0x22e   : > { %v1224_v3 = vmax.f32 %v1139_v58, %v1192_v62  ;;  %v1194_v5 = vmul.f32 0.01, %v1143_v63 }
 0x22f   : > { %v1225_v6 = vmax.f32 %v1141_v60, %v1193_v2 }
 0x230   : > { %v1226_v7 = vmax.f32 %v1143_v63, %v1194_v5  ;;  %v1146_v8 = vpop.f32.mrb[20].mxu1 }
 0x231   : > { %v1147_v10 = vadd.f32 %v1146_v8, %v7265_v36  ;;  %v1148_v11 = vpop.f32.mrb[21].mxu1  ;;  %v1280_v12 = vpack.c.bf16 %v1225_v6, %v1223_v1 }
 0x232   : > { %v1149_v13 = vadd.f32 %v1148_v11, %v7269_v37  ;;  %v1150_v14 = vpop.f32.mrb[22].mxu1  ;;  %v1281_v15 = vpack.c.bf16 %v1226_v7, %v1224_v3  ;;  %v6257_v11 = vld [vmem:[%s8549_s4 + $0x2e4] ss:$8 sps:$4 sm:$0xff]  }
 0x233   : > { %v1195_v16 = vmul.f32 0.01, %v1147_v10  ;;  %v1151_v17 = vadd.f32 %v1150_v14, %v7265_v36  ;;  %v1152_v18 = vpop.f32.mrb[23].mxu1  ;;  %v6258_v14 = vld [vmem:[%s8549_s4 + $0x2f0] ss:$8 sps:$4 sm:$0xff]  }
 0x234   : > { %v1196_v19 = vmul.f32 0.01, %v1149_v13  ;;  %v1153_v26 = vadd.f32 %v1152_v18, %v7269_v37  ;;  %1528 = vmatprep.mubr.bf16.mxu0 %v1281_v15  ;;  %v6261_v15 = vld [vmem:[%s8548_s3 + $0x40] ss:$8 sps:$4 sm:$0xff]   ;;  %v6264_v18 = vld [vmem:[%s8548_s3 + $0x50] ss:$8 sps:$4 sm:$0xff]  }
 0x235   : > { %v1227_v27 = vmax.f32 %v1147_v10, %v1195_v16  ;;  %v1197_v28 = vmul.f32 0.01, %v1151_v17  ;;  %1529 = vmatmul.mubr.bf16.gmra.mrb[48].mxu0 %v1280_v12  ;;  %v6255_v12 = vld [vmem:[%s8549_s4 + $0x2e0] ss:$8 sps:$4 sm:$0xff]   ;;  %v6263_v16 = vld [vmem:[%s8548_s3 + $0x44] ss:$8 sps:$4 sm:$0xff]  }
 0x236   : > { %v1228_v29 = vmax.f32 %v1149_v13, %v1196_v19  ;;  %v1198_v30 = vmul.f32 0.01, %v1153_v26  ;;  %v6260_v13 = vld [vmem:[%s8549_s4 + $0x2f4] ss:$8 sps:$4 sm:$0xff]   ;;  %2129 = vmatprep.subr.bf16.mxu0 %v6263_v16  ;;  %v6269_v19 = vld [vmem:[%s8548_s3 + $0x64] ss:$8 sps:$4 sm:$0xff]  }
 0x237   : > { %v1229_v31 = vmax.f32 %v1151_v17, %v1197_v28  ;;  %v6266_v17 = vld [vmem:[%s8548_s3 + $0x54] ss:$8 sps:$4 sm:$0xff]   ;;  %2130 = vmatpush1.bf16.msra.mxu0 %v6261_v15  ;;  %v6270_v28 = vld [vmem:[%s8548_s3 + $0x70] ss:$8 sps:$4 sm:$0xff]  }
 0x238   : > { %v1230_v32 = vmax.f32 %v1153_v26, %v1198_v30  ;;  %v1156_v33 = vpop.f32.mrb[24].mxu1  ;;  %2131 = vmatprep.subr.bf16.mxu0 %v6266_v17  ;;  %v6272_v26 = vld [vmem:[%s8548_s3 + $0x74] ss:$8 sps:$4 sm:$0xff]   ;;  %v2124_v30 = vand.u32 %v6270_v28, %v6896_v9 }
 0x239   : > { %v1157_v34 = vadd.f32 %v1156_v33, %v7265_v36  ;;  %v1158_v38 = vpop.f32.mrb[25].mxu1  ;;  %v1282_v39 = vpack.c.bf16 %v1229_v31, %v1227_v27  ;;  %v6267_v27 = vld [vmem:[%s8548_s3 + $0x60] ss:$8 sps:$4 sm:$0xff]   ;;  %v6275_v31 = vld [vmem:[%s8549_s4 + $0x304] ss:$8 sps:$4 sm:$0xff]   ;;  %v6628_v15 = vld [vmem:[%s6894_s24 + $0x30] sm:$0xff]  }
 0x23a   : > { %v1159_v40 = vadd.f32 %v1158_v38, %v7269_v37  ;;  %v1160_v41 = vpop.f32.mrb[26].mxu1  ;;  %v1283_v42 = vpack.c.bf16 %v1230_v32, %v1228_v29  ;;  %v2127_v29 = vand.u32 %v6272_v26, %v6896_v9  ;;  %v6273_v32 = vld [vmem:[%s8549_s4 + $0x300] ss:$8 sps:$4 sm:$0xff]   ;;  %v6278_v33 = vld [vmem:[%s8549_s4 + $0x314] ss:$8 sps:$4 sm:$0xff]  }
 0x23b   : > { %v1199_v43 = vmul.f32 0.01, %v1157_v34  ;;  %v1161_v44 = vadd.f32 %v1160_v41, %v7265_v36  ;;  %v1162_v45 = vpop.f32.mrb[27].mxu1  ;;  %2132 = vmatpush1.bf16.msra.mxu0 %v6264_v18  ;;  %v6276_v9 = vld [vmem:[%s8549_s4 + $0x310] ss:$8 sps:$4 sm:$0xff]   ;;  %v6623_v41 = vld [vmem:[%s6894_s24 + $0x8] sm:$0xff]  }
 0x23c   : > { %v1200_v46 = vmul.f32 0.01, %v1159_v40  ;;  %v1163_v47 = vadd.f32 %v1162_v45, %v7269_v37  ;;  %1538 = vmatprep.mubr.bf16.mxu0 %v1283_v42  ;;  %2133 = vmatprep.subr.bf16.mxu0 %v6269_v19  ;;  %v6281_v38 = vld [vmem:[%s8549_s4 + $0x324] ss:$8 sps:$4 sm:$0xff]   ;;  %v6282_v42 = vld [vmem:[%s8549_s4 + $0x330] ss:$8 sps:$4 sm:$0xff]  }
 0x23d   : > { %v1231_v48 = vmax.f32 %v1157_v34, %v1199_v43  ;;  %v1201_v49 = vmul.f32 0.01, %v1161_v44  ;;  %1539 = vmatmul.mubr.bf16.gmra.mrb[52].mxu0 %v1282_v39  ;;  %v6622_v34 = vld [vmem:[%s6894_s24] sm:$0xff]   ;;  %v6290_v45 = vld [vmem:[%s8549_s4 + $0x354] ss:$8 sps:$4 sm:$0xff]  }
 0x23e   : > { %v1232_v50 = vmax.f32 %v1159_v40, %v1200_v46  ;;  %v1202_v51 = vmul.f32 0.01, %v1163_v47  ;;  %v6279_v39 = vld [vmem:[%s8549_s4 + $0x320] ss:$8 sps:$4 sm:$0xff]   ;;  %v6284_v40 = vld [vmem:[%s8549_s4 + $0x334] ss:$8 sps:$4 sm:$0xff]  }
 0x23f   : > { %v1233_v52 = vmax.f32 %v1161_v44, %v1201_v49  ;;  %2134 = vmatpush1.bf16.msra.mxu0 %v6267_v27  ;;  %v6287_v43 = vld [vmem:[%s8549_s4 + $0x344] ss:$8 sps:$4 sm:$0xff]   ;;  %v6285_v44 = vld [vmem:[%s8549_s4 + $0x340] ss:$8 sps:$4 sm:$0xff]   ;;  %v6624_v46 = vld [vmem:[%s6894_s24 + $0x10] sm:$0xff]  }
 0x240   : > { %v1234_v53 = vmax.f32 %v1163_v47, %v1202_v51  ;;  %v1166_v54 = vpop.f32.mrb[28].mxu1  ;;  %2135 = vmatprep.subr.bf16.mxu0 %v2127_v29  ;;  %v6288_v47 = vld [vmem:[%s8549_s4 + $0x350] ss:$8 sps:$4 sm:$0xff]   ;;  %v6291_v49 = vld [vmem:[%s8549_s4 + $0x360] ss:$8 sps:$4 sm:$0xff]  }
 0x241   : > { %v1167_v55 = vadd.f32 %v1166_v54, %v7265_v36  ;;  %v1168_v56 = vpop.f32.mrb[29].mxu1  ;;  %v1284_v57 = vpack.c.bf16 %v1233_v52, %v1231_v48  ;;  %v6293_v48 = vld [vmem:[%s8549_s4 + $0x364] ss:$8 sps:$4 sm:$0xff]   ;;  %v6625_v51 = vld [vmem:[%s6894_s24 + $0x18] sm:$0xff]   ;;  %v6297_v54 = vld [vmem:[%s8549_s4 + $0x380] ss:$8 sps:$4 sm:$0xff]  }
 0x242   : > { %v1169_v58 = vadd.f32 %v1168_v56, %v7269_v37  ;;  %v1170_v59 = vpop.f32.mrb[30].mxu1  ;;  %v1285_v24 = vpack.c.bf16 %v1234_v53, %v1232_v50  ;;  %v6296_v50 = vld [vmem:[%s8549_s4 + $0x374] ss:$8 sps:$4 sm:$0xff]   ;;  %v6294_v52 = vld [vmem:[%s8549_s4 + $0x370] ss:$8 sps:$4 sm:$0xff]   ;;  %v6626_v56 = vld [vmem:[%s6894_s24 + $0x20] sm:$0xff]  }
 0x243   : > { %v1203_v25 = vmul.f32 0.01, %v1167_v55  ;;  %v1171_v60 = vadd.f32 %v1170_v59, %v7265_v36  ;;  %v1172_v61 = vpop.f32.mrb[31].mxu1  ;;  %v6254_v36 = vld [vmem:[%s8549_s4 + $0x2d4] ss:$8 sps:$4 sm:$0xff]   ;;  %2136 = vmatpush1.bf16.msra.mxu0 %v2124_v30 }
 0x244   : > { %v1204_v62 = vmul.f32 0.01, %v1169_v58  ;;  %v1173_v63 = vadd.f32 %v1172_v61, %v7269_v37  ;;  %1548 = vmatprep.mubr.bf16.mxu0 %v1285_v24  ;;  %v6252_v37 = vld [vmem:[%s8549_s4 + $0x2d0] ss:$8 sps:$4 sm:$0xff]   ;;  %1876 = vmatprep.subr.bf16.mxu1 %v6254_v36  ;;  %v6299_v53 = vld [vmem:[%s8549_s4 + $0x384] ss:$8 sps:$4 sm:$0xff]  }
 0x245   : > { %v1235_v1 = vmax.f32 %v1167_v55, %v1203_v25  ;;  %v1205_v2 = vmul.f32 0.01, %v1171_v60  ;;  %1549 = vmatmul.mubr.bf16.gmra.mrb[56].mxu0 %v1284_v57  ;;  %1877 = vmatpush1.bf16.msra.mxu1 %v6252_v37  ;;  %v6302_v55 = vld [vmem:[%s8549_s4 + $0x394] ss:$8 sps:$4 sm:$0xff]   ;;  %v6300_v57 = vld [vmem:[%s8549_s4 + $0x390] ss:$8 sps:$4 sm:$0xff]  }
 0x246   : > { %v1236_v3 = vmax.f32 %v1169_v58, %v1204_v62  ;;  %v1206_v5 = vmul.f32 0.01, %v1173_v63  ;;  %1878 = vmatprep.subr.bf16.mxu1 %v6257_v11  ;;  %2402 = vmatprep.subr.bf16.mxu0 %v6275_v31  ;;  %v1290_v58 = vsub.s32 2, %v7109_v20  ;;  %v6305_v59 = vld [vmem:[%s8549_s4 + $0x3a4] ss:$8 sps:$4 sm:$0xff]  }
 0x247   : > { %v1237_v6 = vmax.f32 %v1171_v60, %v1205_v2  ;;  %v6303_v24 = vld [vmem:[%s8549_s4 + $0x3a0] ss:$8 sps:$4 sm:$0xff]   ;;  %v6308_v60 = vld [vmem:[%s8549_s4 + $0x3b4] ss:$8 sps:$4 sm:$0xff]  }
 0x248   : > { %v1238_v7 = vmax.f32 %v1173_v63, %v1206_v5  ;;  %v7431_v25 = vrot.slane %v7117_v22, %v1290_v58  ;;  %v7437_v61 = vrot.slane %v7122_v23, %v1290_v58  ;;  %v6627_v62 = vld [vmem:[%s6894_s24 + $0x28] sm:$0xff]  }
 0x249   : > { %v1286_v8 = vpack.c.bf16 %v1237_v6, %v1235_v1  ;;  %1879 = vmatpush1.bf16.msra.mxu1 %v6255_v12  ;;  %v6306_v1 = vld [vmem:[%s8549_s4 + $0x3b0] ss:$8 sps:$4 sm:$0xff]   ;;  %v6311_v23 = vld [vmem:[%s8549_s4 + $0x3c4] ss:$8 sps:$4 sm:$0xff]   ;;  %v6309_v37 = vld [vmem:[%s8549_s4 + $0x3c0] ss:$8 sps:$4 sm:$0xff]  }
 0x24a   : > { %v1287_v10 = vpack.c.bf16 %v1238_v7, %v1236_v3  ;;  %1880 = vmatprep.subr.bf16.mxu1 %v6260_v13 }
 0x24c   : > { %1558 = vmatprep.mubr.bf16.mxu0 %v1287_v10 }
 0x24d   : > { %1559 = vmatmul.mubr.bf16.gmra.mrb[60].mxu0 %v1286_v8  ;;  %1881 = vmatpush1.bf16.msra.mxu1 %v6258_v14 }
 0x24e   : > { %2161 = vmatprep.mubr.bf16.mxu0 %v6710_v0 }
 0x255   : > { %5563 = vmatmul.mubr.msk.bf16.vlgmr.msra.gmra.mrb[64].mxu0 %vm634_vm2, %v6622_v34 }
 0x256   : > { %2403 = vmatpush1.bf16.msra.mxu0 %v6273_v32  ;;  %2171 = vmatprep.mubr.bf16.mxu0 %v6710_v0 }
 0x257   : > { %2404 = vmatprep.subr.bf16.mxu0 %v6278_v33 }
 0x25a   : > { %2405 = vmatpush1.bf16.msra.mxu0 %v6276_v9 }
 0x25b   : > { %2406 = vmatprep.subr.bf16.mxu0 %v6281_v38 }
 0x25d   : > { %5564 = vmatmul.mubr.msk.bf16.gmra.mrb[68].mxu0 %vm634_vm2, %v6623_v41 }
 0x25e   : > { %2407 = vmatpush1.bf16.msra.mxu0 %v6279_v39  ;;  %2181 = vmatprep.mubr.bf16.mxu0 %v6710_v0 }
 0x25f   : > { %2408 = vmatprep.subr.bf16.mxu0 %v6284_v40 }
 0x262   : > { %2409 = vmatpush1.bf16.msra.mxu0 %v6282_v42 }
 0x263   : > { %2410 = vmatprep.subr.bf16.mxu0 %v6287_v43  ;;  %v6629_v43 = vld [vmem:[%s6894_s24 + $0x38] sm:$0xff]   ;;  %s5330_s24 = sshll.u32 %s8567_s28, 3 }
 0x264   : > { %s8467_s16 = scalar_lea.vmem %s8557_s12, %s5330_s24 }
 0x265   : > { %5565 = vmatmul.mubr.msk.bf16.gmra.mrb[72].mxu0 %vm634_vm2, %v6624_v46 }
 0x266   : > { %2411 = vmatpush1.bf16.msra.mxu0 %v6285_v44  ;;  %2191 = vmatprep.mubr.bf16.mxu0 %v6710_v0 }
 0x267   : > { %2412 = vmatprep.subr.bf16.mxu0 %v6290_v45 }
 0x26a   : > { %2413 = vmatpush1.bf16.msra.mxu0 %v6288_v47 }
 0x26b   : > { %2414 = vmatprep.subr.bf16.mxu0 %v6293_v48 }
 0x26d   : > { %5566 = vmatmul.mubr.msk.bf16.gmra.mrb[76].mxu0 %vm634_vm2, %v6625_v51 }
 0x26e   : > { %2415 = vmatpush1.bf16.msra.mxu0 %v6291_v49  ;;  %2201 = vmatprep.mubr.bf16.mxu0 %v6710_v0 }
 0x26f   : > { %2416 = vmatprep.subr.bf16.mxu0 %v6296_v50 }
 0x272   : > { %2417 = vmatpush1.bf16.msra.mxu0 %v6294_v52 }
 0x273   : > { %2418 = vmatprep.subr.bf16.mxu0 %v6299_v53 }
 0x275   : > { %5567 = vmatmul.mubr.msk.bf16.gmra.mrb[80].mxu0 %vm634_vm2, %v6626_v56 }
 0x276   : > { %2419 = vmatpush1.bf16.msra.mxu0 %v6297_v54  ;;  %2211 = vmatprep.mubr.bf16.mxu0 %v6710_v0 }
 0x277   : > { %2420 = vmatprep.subr.bf16.mxu0 %v6302_v55 }
 0x27a   : > { %2421 = vmatpush1.bf16.msra.mxu0 %v6300_v57 }
 0x27b   : > { %2422 = vmatprep.subr.bf16.mxu0 %v6305_v59 }
 0x27d   : > { %5568 = vmatmul.mubr.msk.bf16.gmra.mrb[84].mxu0 %vm634_vm2, %v6627_v62 }
 0x27e   : > { %2423 = vmatpush1.bf16.msra.mxu0 %v6303_v24  ;;  %2221 = vmatprep.mubr.bf16.mxu0 %v6710_v0 }
 0x27f   : > { %2424 = vmatprep.subr.bf16.mxu0 %v6308_v60 }
 0x282   : > { %2425 = vmatpush1.bf16.msra.mxu0 %v6306_v1 }
 0x283   : > { %2426 = vmatprep.subr.bf16.mxu0 %v6311_v23 }
 0x285   : > { %5569 = vmatmul.mubr.msk.bf16.gmra.mrb[88].mxu0 %vm634_vm2, %v6628_v15 }
 0x286   : > { %2427 = vmatpush1.bf16.msra.mxu0 %v6309_v37  ;;  %2231 = vmatprep.mubr.bf16.mxu0 %v6710_v0 }
 0x28d   : > { %5570 = vmatmul.mubr.msk.bf16.gmra.mrb[92].mxu0 %vm634_vm2, %v6629_v43 }
 0x2e8   : > { %v1490_v63 = vpop.f32.mrb[32].mxu0 }
 0x2e9   : > { %v1491_v22 = vadd.f32 %v1490_v63, %v7431_v25  ;;  %v1492_v2 = vpop.f32.mrb[33].mxu0 }
 0x2ea   : > { %v1493_v3 = vadd.f32 %v1492_v2, %v7437_v61  ;;  %v1494_v5 = vpop.f32.mrb[34].mxu0 }
 0x2eb   : > { %v1569_v6 = vmul.f32 0.01, %v1491_v22  ;;  %v1495_v7 = vadd.f32 %v1494_v5, %v7431_v25  ;;  %v1496_v8 = vpop.f32.mrb[35].mxu0 }
 0x2ec   : > { %v1570_v10 = vmul.f32 0.01, %v1493_v3  ;;  %v1497_v36 = vadd.f32 %v1496_v8, %v7437_v61 }
 0x2ed   : > { %v1571_v11 = vmul.f32 0.01, %v1495_v7  ;;  %v1601_v13 = vmax.f32 %v1491_v22, %v1569_v6 }
 0x2ee   : > { %v1572_v12 = vmul.f32 0.01, %v1497_v36  ;;  %v1602_v16 = vmax.f32 %v1493_v3, %v1570_v10 }
 0x2ef   : > { %v1603_v14 = vmax.f32 %v1495_v7, %v1571_v11 }
 0x2f0   : > { %v1604_v17 = vmax.f32 %v1497_v36, %v1572_v12  ;;  %v1500_v18 = vpop.f32.mrb[36].mxu0 }
 0x2f1   : > { %v1666_v19 = vpack.c.bf16 %v1603_v14, %v1601_v13  ;;  %v1501_v26 = vadd.f32 %v1500_v18, %v7431_v25  ;;  %v1502_v27 = vpop.f32.mrb[37].mxu0 }
 0x2f2   : > { %v1503_v28 = vadd.f32 %v1502_v27, %v7437_v61  ;;  %v1504_v29 = vpop.f32.mrb[38].mxu0  ;;  %v1667_v30 = vpack.c.bf16 %v1604_v17, %v1602_v16 }
 0x2f3   : > { %v1573_v31 = vmul.f32 0.01, %v1501_v26  ;;  %v1505_v32 = vadd.f32 %v1504_v29, %v7431_v25  ;;  %v1506_v33 = vpop.f32.mrb[39].mxu0 }
 0x2f4   : > { %v1574_v34 = vmul.f32 0.01, %v1503_v28  ;;  %v1507_v9 = vadd.f32 %v1506_v33, %v7437_v61  ;;  %1882 = vmatprep.mubr.bf16.mxu1 %v1667_v30 }
 0x2f5   : > { %v1605_v38 = vmax.f32 %v1501_v26, %v1573_v31  ;;  %v1575_v39 = vmul.f32 0.01, %v1505_v32  ;;  %1883 = vmatmul.mubr.bf16.vlgmr.msra.gmra.mrb[32].mxu1 %v1666_v19 }
 0x2f6   : > { %v1606_v40 = vmax.f32 %v1503_v28, %v1574_v34  ;;  %v1576_v41 = vmul.f32 0.01, %v1507_v9 }
 0x2f7   : > { %v1607_v42 = vmax.f32 %v1505_v32, %v1575_v39 }
 0x2f8   : > { %v1608_v44 = vmax.f32 %v1507_v9, %v1576_v41  ;;  %v1510_v45 = vpop.f32.mrb[40].mxu0 }
 0x2f9   : > { %v1511_v46 = vadd.f32 %v1510_v45, %v7431_v25  ;;  %v1512_v47 = vpop.f32.mrb[41].mxu0  ;;  %v1668_v48 = vpack.c.bf16 %v1607_v42, %v1605_v38 }
 0x2fa   : > { %v1513_v49 = vadd.f32 %v1512_v47, %v7437_v61  ;;  %v1514_v50 = vpop.f32.mrb[42].mxu0  ;;  %v1669_v51 = vpack.c.bf16 %v1608_v44, %v1606_v40 }
 0x2fb   : > { %v1577_v52 = vmul.f32 0.01, %v1511_v46  ;;  %v1515_v53 = vadd.f32 %v1514_v50, %v7431_v25  ;;  %v1516_v54 = vpop.f32.mrb[43].mxu0 }
 0x2fc   : > { %v1578_v55 = vmul.f32 0.01, %v1513_v49  ;;  %v1517_v56 = vadd.f32 %v1516_v54, %v7437_v61  ;;  %1892 = vmatprep.mubr.bf16.mxu1 %v1669_v51 }
 0x2fd   : > { %v1609_v57 = vmax.f32 %v1511_v46, %v1577_v52  ;;  %v1579_v58 = vmul.f32 0.01, %v1515_v53  ;;  %1893 = vmatmul.mubr.bf16.gmra.mrb[36].mxu1 %v1668_v48 }
 0x2fe   : > { %v1610_v59 = vmax.f32 %v1513_v49, %v1578_v55  ;;  %v1580_v24 = vmul.f32 0.01, %v1517_v56 }
 0x2ff   : > { %v1611_v60 = vmax.f32 %v1515_v53, %v1579_v58 }
 0x300   : > { %v1612_v62 = vmax.f32 %v1517_v56, %v1580_v24  ;;  %v1520_v63 = vpop.f32.mrb[44].mxu0 }
 0x301   : > { %v1521_v1 = vadd.f32 %v1520_v63, %v7431_v25  ;;  %v1522_v22 = vpop.f32.mrb[45].mxu0  ;;  %v1670_v2 = vpack.c.bf16 %v1611_v60, %v1609_v57 }
 0x302   : > { %v1523_v23 = vadd.f32 %v1522_v22, %v7437_v61  ;;  %v1524_v3 = vpop.f32.mrb[46].mxu0  ;;  %v1671_v5 = vpack.c.bf16 %v1612_v62, %v1610_v59 }
 0x303   : > { %v1581_v6 = vmul.f32 0.01, %v1521_v1  ;;  %v1525_v7 = vadd.f32 %v1524_v3, %v7431_v25  ;;  %v1526_v8 = vpop.f32.mrb[47].mxu0 }
 0x304   : > { %v1582_v10 = vmul.f32 0.01, %v1523_v23  ;;  %v1527_v36 = vadd.f32 %v1526_v8, %v7437_v61  ;;  %1902 = vmatprep.mubr.bf16.mxu1 %v1671_v5 }
 0x305   : > { %v1613_v37 = vmax.f32 %v1521_v1, %v1581_v6  ;;  %v1583_v11 = vmul.f32 0.01, %v1525_v7  ;;  %1903 = vmatmul.mubr.bf16.gmra.mrb[40].mxu1 %v1670_v2 }
 0x306   : > { %v1614_v12 = vmax.f32 %v1523_v23, %v1582_v10  ;;  %v1584_v13 = vmul.f32 0.01, %v1527_v36 }
 0x307   : > { %v1615_v14 = vmax.f32 %v1525_v7, %v1583_v11 }
 0x308   : > { %v1616_v15 = vmax.f32 %v1527_v36, %v1584_v13  ;;  %v1530_v16 = vpop.f32.mrb[48].mxu0 }
 0x309   : > { %v1531_v17 = vadd.f32 %v1530_v16, %v7431_v25  ;;  %v1532_v18 = vpop.f32.mrb[49].mxu0  ;;  %v1672_v19 = vpack.c.bf16 %v1615_v14, %v1613_v37 }
 0x30a   : > { %v1533_v26 = vadd.f32 %v1532_v18, %v7437_v61  ;;  %v1534_v27 = vpop.f32.mrb[50].mxu0  ;;  %v1673_v28 = vpack.c.bf16 %v1616_v15, %v1614_v12 }
 0x30b   : > { %v1585_v29 = vmul.f32 0.01, %v1531_v17  ;;  %v1535_v30 = vadd.f32 %v1534_v27, %v7431_v25  ;;  %v1536_v31 = vpop.f32.mrb[51].mxu0 }
 0x30c   : > { %v1586_v32 = vmul.f32 0.01, %v1533_v26  ;;  %v1537_v33 = vadd.f32 %v1536_v31, %v7437_v61  ;;  %1912 = vmatprep.mubr.bf16.mxu1 %v1673_v28 }
 0x30d   : > { %v1617_v34 = vmax.f32 %v1531_v17, %v1585_v29  ;;  %v1587_v9 = vmul.f32 0.01, %v1535_v30  ;;  %1913 = vmatmul.mubr.bf16.gmra.mrb[44].mxu1 %v1672_v19 }
 0x30e   : > { %v1618_v38 = vmax.f32 %v1533_v26, %v1586_v32  ;;  %v1588_v39 = vmul.f32 0.01, %v1537_v33 }
 0x30f   : > { %v1619_v40 = vmax.f32 %v1535_v30, %v1587_v9 }
 0x310   : > { %v1620_v41 = vmax.f32 %v1537_v33, %v1588_v39  ;;  %v1540_v42 = vpop.f32.mrb[52].mxu0 }
 0x311   : > { %v1541_v43 = vadd.f32 %v1540_v42, %v7431_v25  ;;  %v1542_v44 = vpop.f32.mrb[53].mxu0  ;;  %v1674_v45 = vpack.c.bf16 %v1619_v40, %v1617_v34  ;;  %v6315_v42 = vld [vmem:[%s8549_s4 + $0x3e0] ss:$8 sps:$4 sm:$0xff]  }
 0x312   : > { %v1543_v46 = vadd.f32 %v1542_v44, %v7437_v61  ;;  %v1544_v47 = vpop.f32.mrb[54].mxu0  ;;  %v1675_v48 = vpack.c.bf16 %v1620_v41, %v1618_v38  ;;  %v6317_v41 = vld [vmem:[%s8549_s4 + $0x3e4] ss:$8 sps:$4 sm:$0xff]   ;;  %v6318_v44 = vld [vmem:[%s8549_s4 + $0x3f0] ss:$8 sps:$4 sm:$0xff]  }
 0x313   : > { %v1589_v49 = vmul.f32 0.01, %v1541_v43  ;;  %v1545_v50 = vadd.f32 %v1544_v47, %v7431_v25  ;;  %v1546_v51 = vpop.f32.mrb[55].mxu0  ;;  %v6326_v47 = vld [vmem:[%s8549_s4 + $0x414] ss:$8 sps:$4 sm:$0xff]  }
 0x314   : > { %v1590_v52 = vmul.f32 0.01, %v1543_v46  ;;  %v1547_v53 = vadd.f32 %v1546_v51, %v7437_v61  ;;  %1922 = vmatprep.mubr.bf16.mxu1 %v1675_v48  ;;  %v6324_v48 = vld [vmem:[%s8549_s4 + $0x410] ss:$8 sps:$4 sm:$0xff]   ;;  %v6332_v51 = vld [vmem:[%s8549_s4 + $0x434] ss:$8 sps:$4 sm:$0xff]  }
 0x315   : > { %v1621_v54 = vmax.f32 %v1541_v43, %v1589_v49  ;;  %v1591_v55 = vmul.f32 0.01, %v1545_v50  ;;  %1923 = vmatmul.mubr.bf16.gmra.mrb[48].mxu1 %v1674_v45  ;;  %v6320_v43 = vld [vmem:[%s8549_s4 + $0x3f4] ss:$8 sps:$4 sm:$0xff]   ;;  %v6321_v45 = vld [vmem:[%s8549_s4 + $0x400] ss:$8 sps:$4 sm:$0xff]  }
 0x316   : > { %v1622_v56 = vmax.f32 %v1543_v46, %v1590_v52  ;;  %v1592_v57 = vmul.f32 0.01, %v1547_v53  ;;  %v6323_v46 = vld [vmem:[%s8549_s4 + $0x404] ss:$8 sps:$4 sm:$0xff]   ;;  %v6330_v52 = vld [vmem:[%s8549_s4 + $0x430] ss:$8 sps:$4 sm:$0xff]  }
 0x317   : > { %v1623_v58 = vmax.f32 %v1545_v50, %v1591_v55  ;;  %2836 = vmatprep.subr.bf16.mxu1 %v6323_v46  ;;  %v6329_v49 = vld [vmem:[%s8549_s4 + $0x424] ss:$8 sps:$4 sm:$0xff]   ;;  %v6327_v50 = vld [vmem:[%s8549_s4 + $0x420] ss:$8 sps:$4 sm:$0xff]   ;;  %v6338_v55 = vld [vmem:[%s8549_s4 + $0x454] ss:$8 sps:$4 sm:$0xff]  }
 0x318   : > { %v1624_v59 = vmax.f32 %v1547_v53, %v1592_v57  ;;  %v1550_v24 = vpop.f32.mrb[56].mxu0  ;;  %2837 = vmatpush1.bf16.msra.mxu1 %v6321_v45  ;;  %v6335_v53 = vld [vmem:[%s8549_s4 + $0x444] ss:$8 sps:$4 sm:$0xff]  }
 0x319   : > { %v1551_v60 = vadd.f32 %v1550_v24, %v7431_v25  ;;  %v1552_v62 = vpop.f32.mrb[57].mxu0  ;;  %v1676_v63 = vpack.c.bf16 %v1623_v58, %v1621_v54  ;;  %2838 = vmatprep.subr.bf16.mxu1 %v6326_v47  ;;  %v6333_v54 = vld [vmem:[%s8549_s4 + $0x440] ss:$8 sps:$4 sm:$0xff]   ;;  %v6341_v57 = vld [vmem:[%s8549_s4 + $0x464] ss:$8 sps:$4 sm:$0xff]  }
 0x31a   : > { %v1553_v1 = vadd.f32 %v1552_v62, %v7437_v61  ;;  %v1554_v22 = vpop.f32.mrb[58].mxu0  ;;  %v1677_v2 = vpack.c.bf16 %v1624_v59, %v1622_v56  ;;  %v6336_v56 = vld [vmem:[%s8549_s4 + $0x450] ss:$8 sps:$4 sm:$0xff]   ;;  %v6339_v58 = vld [vmem:[%s8549_s4 + $0x460] ss:$8 sps:$4 sm:$0xff]  }
 0x31b   : > { %v1593_v23 = vmul.f32 0.01, %v1551_v60  ;;  %v1555_v3 = vadd.f32 %v1554_v22, %v7431_v25  ;;  %v1556_v5 = vpop.f32.mrb[59].mxu0  ;;  %v6344_v59 = vld [vmem:[%s8549_s4 + $0x474] ss:$8 sps:$4 sm:$0xff]  }
 0x31c   : > { %v1594_v6 = vmul.f32 0.01, %v1553_v1  ;;  %v1557_v7 = vadd.f32 %v1556_v5, %v7437_v61  ;;  %1932 = vmatprep.mubr.bf16.mxu1 %v1677_v2  ;;  %2839 = vmatpush1.bf16.msra.mxu1 %v6324_v48  ;;  %v6342_v24 = vld [vmem:[%s8549_s4 + $0x470] ss:$8 sps:$4 sm:$0xff]   ;;  %v6345_v62 = vld [vmem:[%s8549_s4 + $0x480] ss:$8 sps:$4 sm:$0xff]  }
 0x31d   : > { %v1625_v8 = vmax.f32 %v1551_v60, %v1593_v23  ;;  %v1595_v10 = vmul.f32 0.01, %v1555_v3  ;;  %1933 = vmatmul.mubr.bf16.gmra.mrb[52].mxu1 %v1676_v63  ;;  %2840 = vmatprep.subr.bf16.mxu1 %v6329_v49  ;;  %v6347_v60 = vld [vmem:[%s8549_s4 + $0x484] ss:$8 sps:$4 sm:$0xff]   ;;  %v6350_v63 = vld [vmem:[%s8549_s4 + $0x494] ss:$8 sps:$4 sm:$0xff]  }
 0x31e   : > { %v1626_v36 = vmax.f32 %v1553_v1, %v1594_v6  ;;  %v1596_v37 = vmul.f32 0.01, %v1557_v7  ;;  %v6348_v1 = vld [vmem:[%s8549_s4 + $0x490] ss:$8 sps:$4 sm:$0xff]   ;;  %v6353_v22 = vld [vmem:[%s8549_s4 + $0x4a4] ss:$8 sps:$4 sm:$0xff]  }
 0x31f   : > { %v1627_v11 = vmax.f32 %v1555_v3, %v1595_v10  ;;  %v6351_v2 = vld [vmem:[%s8549_s4 + $0x4a0] ss:$8 sps:$4 sm:$0xff]   ;;  %v6356_v23 = vld [vmem:[%s8549_s4 + $0x4b4] ss:$8 sps:$4 sm:$0xff]   ;;  %v6354_v3 = vld [vmem:[%s8549_s4 + $0x4b0] ss:$8 sps:$4 sm:$0xff]  }
 0x320   : > { %v1628_v12 = vmax.f32 %v1557_v7, %v1596_v37  ;;  %v1560_v13 = vpop.f32.mrb[60].mxu0  ;;  %2841 = vmatpush1.bf16.msra.mxu1 %v6327_v50  ;;  %v6359_v5 = vld [vmem:[%s8549_s4 + $0x4c4] ss:$8 sps:$4 sm:$0xff]   ;;  %v6357_v6 = vld [vmem:[%s8549_s4 + $0x4c0] ss:$8 sps:$4 sm:$0xff]   ;;  %v1684_v7 = vsub.s32 3, %v7109_v20 }
 0x321   : > { %v1561_v14 = vadd.f32 %v1560_v13, %v7431_v25  ;;  %v1562_v15 = vpop.f32.mrb[61].mxu0  ;;  %v1678_v16 = vpack.c.bf16 %v1627_v11, %v1625_v8  ;;  %2842 = vmatprep.subr.bf16.mxu1 %v6332_v51  ;;  %v7588_v8 = vld [vmem:[%s8550_s5] sm:$0xff] }
 0x322   : > { %v1563_v17 = vadd.f32 %v1562_v15, %v7437_v61  ;;  %v1564_v18 = vpop.f32.mrb[62].mxu0  ;;  %v1679_v19 = vpack.c.bf16 %v1628_v12, %v1626_v36  ;;  %v7591_v10 = vrot.slane %v7588_v8, %v1684_v7  ;;  %v7596_v36 = vld [vmem:[%s8550_s5 + $0x8] sm:$0xff] }
 0x323   : > { %v1597_v26 = vmul.f32 0.01, %v1561_v14  ;;  %v1565_v27 = vadd.f32 %v1564_v18, %v7431_v25  ;;  %v1566_v28 = vpop.f32.mrb[63].mxu0  ;;  %v6314_v25 = vld [vmem:[%s8549_s4 + $0x3d4] ss:$8 sps:$4 sm:$0xff]   ;;  %v7599_v37 = vrot.slane %v7596_v36, %v1684_v7 }
 0x324   : > { %v1598_v29 = vmul.f32 0.01, %v1563_v17  ;;  %v1567_v30 = vadd.f32 %v1566_v28, %v7437_v61  ;;  %1942 = vmatprep.mubr.bf16.mxu1 %v1679_v19  ;;  %v6312_v61 = vld [vmem:[%s8549_s4 + $0x3d0] ss:$8 sps:$4 sm:$0xff]   ;;  %2428 = vmatprep.subr.bf16.mxu0 %v6314_v25 }
 0x325   : > { %v1629_v31 = vmax.f32 %v1561_v14, %v1597_v26  ;;  %v1599_v32 = vmul.f32 0.01, %v1565_v27  ;;  %1943 = vmatmul.mubr.bf16.gmra.mrb[56].mxu1 %v1678_v16  ;;  %2429 = vmatpush1.bf16.msra.mxu0 %v6312_v61 }
 0x326   : > { %v1630_v33 = vmax.f32 %v1563_v17, %v1598_v29  ;;  %v1600_v34 = vmul.f32 0.01, %v1567_v30  ;;  %2430 = vmatprep.subr.bf16.mxu0 %v6317_v41  ;;  %2843 = vmatpush1.bf16.msra.mxu1 %v6330_v52 }
 0x327   : > { %v1631_v9 = vmax.f32 %v1565_v27, %v1599_v32  ;;  %2844 = vmatprep.subr.bf16.mxu1 %v6335_v53 }
 0x328   : > { %v1632_v38 = vmax.f32 %v1567_v30, %v1600_v34 }
 0x329   : > { %v1680_v39 = vpack.c.bf16 %v1631_v9, %v1629_v31  ;;  %2431 = vmatpush1.bf16.msra.mxu0 %v6315_v42 }
 0x32a   : > { %v1681_v40 = vpack.c.bf16 %v1632_v38, %v1630_v33  ;;  %2432 = vmatprep.subr.bf16.mxu0 %v6320_v43  ;;  %2845 = vmatpush1.bf16.msra.mxu1 %v6333_v54 }
 0x32b   : > { %2846 = vmatprep.subr.bf16.mxu1 %v6338_v55 }
 0x32c   : > { %1952 = vmatprep.mubr.bf16.mxu1 %v1681_v40 }
 0x32d   : > { %1953 = vmatmul.mubr.bf16.gmra.mrb[60].mxu1 %v1680_v39  ;;  %2433 = vmatpush1.bf16.msra.mxu0 %v6318_v44 }
 0x32e   : > { %2847 = vmatpush1.bf16.msra.mxu1 %v6336_v56 }
 0x32f   : > { %2848 = vmatprep.subr.bf16.mxu1 %v6341_v57 }
 0x332   : > { %2849 = vmatpush1.bf16.msra.mxu1 %v6339_v58 }
 0x333   : > { %2850 = vmatprep.subr.bf16.mxu1 %v6344_v59 }
 0x336   : > { %2851 = vmatpush1.bf16.msra.mxu1 %v6342_v24 }
 0x337   : > { %2852 = vmatprep.subr.bf16.mxu1 %v6347_v60 }
 0x33a   : > { %2853 = vmatpush1.bf16.msra.mxu1 %v6345_v62 }
 0x33b   : > { %2854 = vmatprep.subr.bf16.mxu1 %v6350_v63 }
 0x33e   : > { %2855 = vmatpush1.bf16.msra.mxu1 %v6348_v1 }
 0x33f   : > { %2856 = vmatprep.subr.bf16.mxu1 %v6353_v22 }
 0x342   : > { %2857 = vmatpush1.bf16.msra.mxu1 %v6351_v2 }
 0x343   : > { %2858 = vmatprep.subr.bf16.mxu1 %v6356_v23 }
 0x346   : > { %2859 = vmatpush1.bf16.msra.mxu1 %v6354_v3 }
 0x347   : > { %2860 = vmatprep.subr.bf16.mxu1 %v6359_v5 }
 0x34a   : > { %2861 = vmatpush1.bf16.msra.mxu1 %v6357_v6 }
 0x3c8   : > { %v1884_v11 = vpop.f32.mrb[32].mxu1 }
 0x3c9   : > { %v1885_v12 = vadd.f32 %v1884_v11, %v7591_v10  ;;  %v1886_v13 = vpop.f32.mrb[33].mxu1 }
 0x3ca   : > { %v1887_v14 = vadd.f32 %v1886_v13, %v7599_v37  ;;  %v1888_v15 = vpop.f32.mrb[34].mxu1 }
 0x3cb   : > { %v1963_v16 = vmul.f32 0.01, %v1885_v12  ;;  %v1889_v17 = vadd.f32 %v1888_v15, %v7591_v10  ;;  %v1890_v18 = vpop.f32.mrb[35].mxu1 }
 0x3cc   : > { %v1964_v19 = vmul.f32 0.01, %v1887_v14  ;;  %v1891_v26 = vadd.f32 %v1890_v18, %v7599_v37 }
 0x3cd   : > { %v1965_v27 = vmul.f32 0.01, %v1889_v17  ;;  %v1995_v29 = vmax.f32 %v1885_v12, %v1963_v16 }
 0x3ce   : > { %v1966_v28 = vmul.f32 0.01, %v1891_v26  ;;  %v1996_v31 = vmax.f32 %v1887_v14, %v1964_v19 }
 0x3cf   : > { %v1997_v30 = vmax.f32 %v1889_v17, %v1965_v27 }
 0x3d0   : > { %v1998_v32 = vmax.f32 %v1891_v26, %v1966_v28  ;;  %v1894_v33 = vpop.f32.mrb[36].mxu1 }
 0x3d1   : > { %v2060_v34 = vpack.c.bf16 %v1997_v30, %v1995_v29  ;;  %v1895_v9 = vadd.f32 %v1894_v33, %v7591_v10  ;;  %v1896_v38 = vpop.f32.mrb[37].mxu1 }
 0x3d2   : > { %v1897_v39 = vadd.f32 %v1896_v38, %v7599_v37  ;;  %v1898_v40 = vpop.f32.mrb[38].mxu1  ;;  %v2061_v25 = vpack.c.bf16 %v1998_v32, %v1996_v31 }
 0x3d3   : > { %v1967_v61 = vmul.f32 0.01, %v1895_v9  ;;  %v1899_v41 = vadd.f32 %v1898_v40, %v7591_v10  ;;  %v1900_v42 = vpop.f32.mrb[39].mxu1 }
 0x3d4   : > { %v1968_v43 = vmul.f32 0.01, %v1897_v39  ;;  %v1901_v44 = vadd.f32 %v1900_v42, %v7599_v37  ;;  %2434 = vmatprep.mubr.bf16.mxu0 %v2061_v25 }
 0x3d5   : > { %v1999_v45 = vmax.f32 %v1895_v9, %v1967_v61  ;;  %v1969_v46 = vmul.f32 0.01, %v1899_v41  ;;  %2435 = vmatmul.mubr.bf16.vlgmr.msra.gmra.mrb[64].mxu0 %v2060_v34 }
 0x3d6   : > { %v2000_v47 = vmax.f32 %v1897_v39, %v1968_v43  ;;  %v1970_v48 = vmul.f32 0.01, %v1901_v44 }
 0x3d7   : > { %v2001_v49 = vmax.f32 %v1899_v41, %v1969_v46 }
 0x3d8   : > { %v2002_v50 = vmax.f32 %v1901_v44, %v1970_v48  ;;  %v1904_v51 = vpop.f32.mrb[40].mxu1 }
 0x3d9   : > { %v1905_v52 = vadd.f32 %v1904_v51, %v7591_v10  ;;  %v1906_v53 = vpop.f32.mrb[41].mxu1  ;;  %v2062_v54 = vpack.c.bf16 %v2001_v49, %v1999_v45 }
 0x3da   : > { %v1907_v55 = vadd.f32 %v1906_v53, %v7599_v37  ;;  %v1908_v56 = vpop.f32.mrb[42].mxu1  ;;  %v2063_v57 = vpack.c.bf16 %v2002_v50, %v2000_v47 }
 0x3db   : > { %v1971_v58 = vmul.f32 0.01, %v1905_v52  ;;  %v1909_v59 = vadd.f32 %v1908_v56, %v7591_v10  ;;  %v1910_v24 = vpop.f32.mrb[43].mxu1 }
 0x3dc   : > { %v1972_v60 = vmul.f32 0.01, %v1907_v55  ;;  %v1911_v62 = vadd.f32 %v1910_v24, %v7599_v37  ;;  %2444 = vmatprep.mubr.bf16.mxu0 %v2063_v57 }
 0x3dd   : > { %v2003_v63 = vmax.f32 %v1905_v52, %v1971_v58  ;;  %v1973_v1 = vmul.f32 0.01, %v1909_v59  ;;  %2445 = vmatmul.mubr.bf16.gmra.mrb[68].mxu0 %v2062_v54 }
 0x3de   : > { %v2004_v22 = vmax.f32 %v1907_v55, %v1972_v60  ;;  %v1974_v2 = vmul.f32 0.01, %v1911_v62 }
 0x3df   : > { %v2005_v23 = vmax.f32 %v1909_v59, %v1973_v1 }
 0x3e0   : > { %v2006_v3 = vmax.f32 %v1911_v62, %v1974_v2  ;;  %v1914_v5 = vpop.f32.mrb[44].mxu1 }
 0x3e1   : > { %v1915_v6 = vadd.f32 %v1914_v5, %v7591_v10  ;;  %v1916_v7 = vpop.f32.mrb[45].mxu1  ;;  %v2064_v11 = vpack.c.bf16 %v2005_v23, %v2003_v63 }
 0x3e2   : > { %v1917_v12 = vadd.f32 %v1916_v7, %v7599_v37  ;;  %v1918_v13 = vpop.f32.mrb[46].mxu1  ;;  %v2065_v14 = vpack.c.bf16 %v2006_v3, %v2004_v22 }
 0x3e3   : > { %v1975_v15 = vmul.f32 0.01, %v1915_v6  ;;  %v1919_v16 = vadd.f32 %v1918_v13, %v7591_v10  ;;  %v1920_v17 = vpop.f32.mrb[47].mxu1 }
 0x3e4   : > { %v1976_v18 = vmul.f32 0.01, %v1917_v12  ;;  %v1921_v19 = vadd.f32 %v1920_v17, %v7599_v37  ;;  %2454 = vmatprep.mubr.bf16.mxu0 %v2065_v14 }
 0x3e5   : > { %v2007_v26 = vmax.f32 %v1915_v6, %v1975_v15  ;;  %v1977_v27 = vmul.f32 0.01, %v1919_v16  ;;  %2455 = vmatmul.mubr.bf16.gmra.mrb[72].mxu0 %v2064_v11 }
 0x3e6   : > { %v2008_v28 = vmax.f32 %v1917_v12, %v1976_v18  ;;  %v1978_v29 = vmul.f32 0.01, %v1921_v19 }
 0x3e7   : > { %v2009_v30 = vmax.f32 %v1919_v16, %v1977_v27 }
 0x3e8   : > { %v2010_v31 = vmax.f32 %v1921_v19, %v1978_v29  ;;  %v1924_v32 = vpop.f32.mrb[48].mxu1 }
 0x3e9   : > { %v1925_v33 = vadd.f32 %v1924_v32, %v7591_v10  ;;  %v1926_v34 = vpop.f32.mrb[49].mxu1  ;;  %v2066_v9 = vpack.c.bf16 %v2009_v30, %v2007_v26 }
 0x3ea   : > { %v1927_v38 = vadd.f32 %v1926_v34, %v7599_v37  ;;  %v1928_v39 = vpop.f32.mrb[50].mxu1  ;;  %v2067_v40 = vpack.c.bf16 %v2010_v31, %v2008_v28 }
 0x3eb   : > { %v1979_v25 = vmul.f32 0.01, %v1925_v33  ;;  %v1929_v61 = vadd.f32 %v1928_v39, %v7591_v10  ;;  %v1930_v41 = vpop.f32.mrb[51].mxu1 }
 0x3ec   : > { %v1980_v42 = vmul.f32 0.01, %v1927_v38  ;;  %v1931_v43 = vadd.f32 %v1930_v41, %v7599_v37  ;;  %2464 = vmatprep.mubr.bf16.mxu0 %v2067_v40 }
 0x3ed   : > { %v2011_v44 = vmax.f32 %v1925_v33, %v1979_v25  ;;  %v1981_v45 = vmul.f32 0.01, %v1929_v61  ;;  %2465 = vmatmul.mubr.bf16.gmra.mrb[76].mxu0 %v2066_v9 }
 0x3ee   : > { %v2012_v46 = vmax.f32 %v1927_v38, %v1980_v42  ;;  %v1982_v47 = vmul.f32 0.01, %v1931_v43 }
 0x3ef   : > { %v2013_v48 = vmax.f32 %v1929_v61, %v1981_v45 }
 0x3f0   : > { %v2014_v49 = vmax.f32 %v1931_v43, %v1982_v47  ;;  %v1934_v50 = vpop.f32.mrb[52].mxu1 }
 0x3f1   : > { %v1935_v51 = vadd.f32 %v1934_v50, %v7591_v10  ;;  %v1936_v52 = vpop.f32.mrb[53].mxu1  ;;  %v2068_v53 = vpack.c.bf16 %v2013_v48, %v2011_v44 }
 0x3f2   : > { %v1937_v54 = vadd.f32 %v1936_v52, %v7599_v37  ;;  %v1938_v55 = vpop.f32.mrb[54].mxu1  ;;  %v2069_v56 = vpack.c.bf16 %v2014_v49, %v2012_v46  ;;  %v6363_v52 = vld [vmem:[%s8549_s4 + $0x4e0] ss:$8 sps:$4 sm:$0xff]  }
 0x3f3   : > { %v1983_v57 = vmul.f32 0.01, %v1935_v51  ;;  %v1939_v58 = vadd.f32 %v1938_v55, %v7591_v10  ;;  %v1940_v59 = vpop.f32.mrb[55].mxu1  ;;  %v6371_v55 = vld [vmem:[%s8549_s4 + $0x504] ss:$8 sps:$4 sm:$0xff]  }
 0x3f4   : > { %v1984_v24 = vmul.f32 0.01, %v1937_v54  ;;  %v1941_v60 = vadd.f32 %v1940_v59, %v7599_v37  ;;  %2474 = vmatprep.mubr.bf16.mxu0 %v2069_v56  ;;  %v2517_v56 = vsub.s32 4, %v7109_v20 }
 0x3f5   : > { %v2015_v62 = vmax.f32 %v1935_v51, %v1983_v57  ;;  %v1985_v63 = vmul.f32 0.01, %v1939_v58  ;;  %2475 = vmatmul.mubr.bf16.gmra.mrb[80].mxu0 %v2068_v53  ;;  %v6365_v51 = vld [vmem:[%s8549_s4 + $0x4e4] ss:$8 sps:$4 sm:$0xff]   ;;  %v6368_v53 = vld [vmem:[%s8549_s4 + $0x4f4] ss:$8 sps:$4 sm:$0xff]  }
 0x3f6   : > { %v2016_v1 = vmax.f32 %v1937_v54, %v1984_v24  ;;  %v1986_v22 = vmul.f32 0.01, %v1941_v60  ;;  %v6366_v54 = vld [vmem:[%s8549_s4 + $0x4f0] ss:$8 sps:$4 sm:$0xff]   ;;  %v7656_v57 = vrot.slane %v7588_v8, %v2517_v56 }
 0x3f7   : > { %v2017_v2 = vmax.f32 %v1939_v58, %v1985_v63  ;;  %v7659_v58 = vrot.slane %v7596_v36, %v2517_v56  ;;  %v6378_v56 = vld [vmem:[%s8549_s4 + $0x530] ss:$8 sps:$4 sm:$0xff]  }
 0x3f8   : > { %v2018_v23 = vmax.f32 %v1941_v60, %v1986_v22  ;;  %v1944_v3 = vpop.f32.mrb[56].mxu1 }
 0x3f9   : > { %v1945_v5 = vadd.f32 %v1944_v3, %v7591_v10  ;;  %v1946_v6 = vpop.f32.mrb[57].mxu1  ;;  %v2070_v7 = vpack.c.bf16 %v2017_v2, %v2015_v62 }
 0x3fa   : > { %v1947_v11 = vadd.f32 %v1946_v6, %v7599_v37  ;;  %v1948_v12 = vpop.f32.mrb[58].mxu1  ;;  %v2071_v13 = vpack.c.bf16 %v2018_v23, %v2016_v1 }
 0x3fb   : > { %v1987_v14 = vmul.f32 0.01, %v1945_v5  ;;  %v1949_v15 = vadd.f32 %v1948_v12, %v7591_v10  ;;  %v1950_v16 = vpop.f32.mrb[59].mxu1 }
 0x3fc   : > { %v1988_v17 = vmul.f32 0.01, %v1947_v11  ;;  %v1951_v18 = vadd.f32 %v1950_v16, %v7599_v37  ;;  %2484 = vmatprep.mubr.bf16.mxu0 %v2071_v13 }
 0x3fd   : > { %v2019_v19 = vmax.f32 %v1945_v5, %v1987_v14  ;;  %v1989_v26 = vmul.f32 0.01, %v1949_v15  ;;  %2485 = vmatmul.mubr.bf16.gmra.mrb[84].mxu0 %v2070_v7 }
 0x3fe   : > { %v2020_v27 = vmax.f32 %v1947_v11, %v1988_v17  ;;  %v1990_v28 = vmul.f32 0.01, %v1951_v18 }
 0x3ff   : > { %v2021_v29 = vmax.f32 %v1949_v15, %v1989_v26 }
 0x400   : > { %v2022_v30 = vmax.f32 %v1951_v18, %v1990_v28  ;;  %v1954_v31 = vpop.f32.mrb[60].mxu1 }
 0x401   : > { %v1955_v32 = vadd.f32 %v1954_v31, %v7591_v10  ;;  %v1956_v33 = vpop.f32.mrb[61].mxu1  ;;  %v2072_v34 = vpack.c.bf16 %v2021_v29, %v2019_v19  ;;  %v6374_v31 = vld [vmem:[%s8549_s4 + $0x514] ss:$8 sps:$4 sm:$0xff]  }
 0x402   : > { %v1957_v9 = vadd.f32 %v1956_v33, %v7599_v37  ;;  %v1958_v38 = vpop.f32.mrb[62].mxu1  ;;  %v2073_v39 = vpack.c.bf16 %v2022_v30, %v2020_v27  ;;  %v6369_v27 = vld [vmem:[%s8549_s4 + $0x500] ss:$8 sps:$4 sm:$0xff]  }
 0x403   : > { %v1991_v40 = vmul.f32 0.01, %v1955_v32  ;;  %v1959_v25 = vadd.f32 %v1958_v38, %v7591_v10  ;;  %v1960_v61 = vpop.f32.mrb[63].mxu1  ;;  %v6362_v10 = vld [vmem:[%s8549_s4 + $0x4d4] ss:$8 sps:$4 sm:$0xff]  }
 0x404   : > { %v1992_v41 = vmul.f32 0.01, %v1957_v9  ;;  %v1961_v42 = vadd.f32 %v1960_v61, %v7599_v37  ;;  %2494 = vmatprep.mubr.bf16.mxu0 %v2073_v39  ;;  %v6360_v37 = vld [vmem:[%s8549_s4 + $0x4d0] ss:$8 sps:$4 sm:$0xff]   ;;  %2862 = vmatprep.subr.bf16.mxu1 %v6362_v10 }
 0x405   : > { %v2023_v43 = vmax.f32 %v1955_v32, %v1991_v40  ;;  %v1993_v44 = vmul.f32 0.01, %v1959_v25  ;;  %2495 = vmatmul.mubr.bf16.gmra.mrb[88].mxu0 %v2072_v34  ;;  %2863 = vmatpush1.bf16.msra.mxu1 %v6360_v37  ;;  %v6372_v38 = vld [vmem:[%s8549_s4 + $0x510] ss:$8 sps:$4 sm:$0xff]  }
 0x406   : > { %v2024_v45 = vmax.f32 %v1957_v9, %v1992_v41  ;;  %v1994_v46 = vmul.f32 0.01, %v1961_v42  ;;  %2864 = vmatprep.subr.bf16.mxu1 %v6365_v51  ;;  %v6380_v51 = vld [vmem:[%s8549_s4 + $0x534] ss:$8 sps:$4 sm:$0xff]  }
 0x407   : > { %v2025_v47 = vmax.f32 %v1959_v25, %v1993_v44  ;;  %v6377_v25 = vld [vmem:[%s8549_s4 + $0x524] ss:$8 sps:$4 sm:$0xff]  }
 0x408   : > { %v2026_v48 = vmax.f32 %v1961_v42, %v1994_v46 }
 0x409   : > { %v2074_v49 = vpack.c.bf16 %v2025_v47, %v2023_v43  ;;  %2865 = vmatpush1.bf16.msra.mxu1 %v6363_v52 }
 0x40a   : > { %v2075_v50 = vpack.c.bf16 %v2026_v48, %v2024_v45  ;;  %2866 = vmatprep.subr.bf16.mxu1 %v6368_v53 }
 0x40c   : > { %2504 = vmatprep.mubr.bf16.mxu0 %v2075_v50 }
 0x40d   : > { %2505 = vmatmul.mubr.bf16.gmra.mrb[92].mxu0 %v2074_v49  ;;  %2867 = vmatpush1.bf16.msra.mxu1 %v6366_v54  ;;  %v6375_v49 = vld [vmem:[%s8549_s4 + $0x520] ss:$8 sps:$4 sm:$0xff]  }
 0x40e   : > { %3230 = vmatprep.subr.bf16.mxu1 %v6371_v55 }
 0x4a8   : > { %v2436_v59 = vpop.f32.mrb[64].mxu0 }
 0x4a9   : > { %v2523_v24 = vadd.f32 %v7656_v57, %v2436_v59  ;;  %v2438_v60 = vpop.f32.mrb[65].mxu0 }
 0x4aa   : > { %v2524_v62 = vadd.f32 %v7659_v58, %v2438_v60  ;;  %v2440_v63 = vpop.f32.mrb[66].mxu0  ;;  %v6383_v60 = vld [vmem:[%s8549_s4 + $0x544] ss:$8 sps:$4 sm:$0xff]  }
 0x4ab   : > { %v2555_v1 = vmul.f32 0.01, %v2523_v24  ;;  %v2525_v22 = vadd.f32 %v7656_v57, %v2440_v63  ;;  %v2442_v2 = vpop.f32.mrb[67].mxu0 }
 0x4ac   : > { %v2556_v23 = vmul.f32 0.01, %v2524_v62  ;;  %v2526_v3 = vadd.f32 %v7659_v58, %v2442_v2 }
 0x4ad   : > { %v2557_v5 = vmul.f32 0.01, %v2525_v22  ;;  %v2587_v7 = vmax.f32 %v2523_v24, %v2555_v1 }
 0x4ae   : > { %v2558_v6 = vmul.f32 0.01, %v2526_v3  ;;  %v2588_v12 = vmax.f32 %v2524_v62, %v2556_v23 }
 0x4af   : > { %v2589_v11 = vmax.f32 %v2525_v22, %v2557_v5 }
 0x4b0   : > { %v2590_v13 = vmax.f32 %v2526_v3, %v2558_v6  ;;  %v2446_v14 = vpop.f32.mrb[68].mxu0 }
 0x4b1   : > { %v2652_v15 = vpack.c.bf16 %v2589_v11, %v2587_v7  ;;  %v2527_v16 = vadd.f32 %v7656_v57, %v2446_v14  ;;  %v2448_v17 = vpop.f32.mrb[69].mxu0  ;;  %v6381_v7 = vld [vmem:[%s8549_s4 + $0x540] ss:$8 sps:$4 sm:$0xff]   ;;  %v6386_v14 = vld [vmem:[%s8549_s4 + $0x554] ss:$8 sps:$4 sm:$0xff]  }
 0x4b2   : > { %v2528_v18 = vadd.f32 %v7659_v58, %v2448_v17  ;;  %v2450_v19 = vpop.f32.mrb[70].mxu0  ;;  %v2653_v26 = vpack.c.bf16 %v2590_v13, %v2588_v12 }
 0x4b3   : > { %v2559_v28 = vmul.f32 0.01, %v2527_v16  ;;  %v2529_v29 = vadd.f32 %v7656_v57, %v2450_v19  ;;  %v2452_v30 = vpop.f32.mrb[71].mxu0  ;;  %v6384_v19 = vld [vmem:[%s8549_s4 + $0x550] ss:$8 sps:$4 sm:$0xff]  }
 0x4b4   : > { %v2560_v32 = vmul.f32 0.01, %v2528_v18  ;;  %v2530_v33 = vadd.f32 %v7659_v58, %v2452_v30  ;;  %2868 = vmatprep.mubr.bf16.mxu1 %v2653_v26 }
 0x4b5   : > { %v2561_v34 = vmul.f32 0.01, %v2529_v29  ;;  %2869 = vmatmul.mubr.bf16.vlgmr.msra.gmra.mrb[64].mxu1 %v2652_v15  ;;  %v2591_v39 = vmax.f32 %v2527_v16, %v2559_v28  ;;  %v6389_v28 = vld [vmem:[%s8549_s4 + $0x564] ss:$8 sps:$4 sm:$0xff]  }
 0x4b6   : > { %v2562_v9 = vmul.f32 0.01, %v2530_v33  ;;  %3231 = vmatpush1.bf16.msra.mxu1 %v6369_v27  ;;  %v2592_v61 = vmax.f32 %v2528_v18, %v2560_v32 }
 0x4b7   : > { %v2593_v40 = vmax.f32 %v2529_v29, %v2561_v34  ;;  %3232 = vmatprep.subr.bf16.mxu1 %v6374_v31 }
 0x4b8   : > { %v2594_v41 = vmax.f32 %v2530_v33, %v2562_v9  ;;  %v2456_v42 = vpop.f32.mrb[72].mxu0 }
 0x4b9   : > { %v2531_v43 = vadd.f32 %v7656_v57, %v2456_v42  ;;  %v2458_v44 = vpop.f32.mrb[73].mxu0  ;;  %v2654_v45 = vpack.c.bf16 %v2593_v40, %v2591_v39  ;;  %v6387_v40 = vld [vmem:[%s8549_s4 + $0x560] ss:$8 sps:$4 sm:$0xff]   ;;  %v6392_v42 = vld [vmem:[%s8549_s4 + $0x574] ss:$8 sps:$4 sm:$0xff]  }
 0x4ba   : > { %v2532_v46 = vadd.f32 %v7659_v58, %v2458_v44  ;;  %v2460_v47 = vpop.f32.mrb[74].mxu0  ;;  %v2655_v48 = vpack.c.bf16 %v2594_v41, %v2592_v61  ;;  %3233 = vmatpush1.bf16.msra.mxu1 %v6372_v38 }
 0x4bb   : > { %v2563_v50 = vmul.f32 0.01, %v2531_v43  ;;  %v2533_v10 = vadd.f32 %v7656_v57, %v2460_v47  ;;  %v2462_v37 = vpop.f32.mrb[75].mxu0  ;;  %3234 = vmatprep.subr.bf16.mxu1 %v6377_v25  ;;  %v6390_v47 = vld [vmem:[%s8549_s4 + $0x570] ss:$8 sps:$4 sm:$0xff]  }
 0x4bc   : > { %v2564_v52 = vmul.f32 0.01, %v2532_v46  ;;  %v2534_v53 = vadd.f32 %v7659_v58, %v2462_v37  ;;  %2878 = vmatprep.mubr.bf16.mxu1 %v2655_v48 }
 0x4bd   : > { %v2565_v54 = vmul.f32 0.01, %v2533_v10  ;;  %2879 = vmatmul.mubr.bf16.gmra.mrb[68].mxu1 %v2654_v45  ;;  %v2595_v59 = vmax.f32 %v2531_v43, %v2563_v50  ;;  %v6395_v50 = vld [vmem:[%s8549_s4 + $0x584] ss:$8 sps:$4 sm:$0xff]  }
 0x4be   : > { %v2566_v55 = vmul.f32 0.01, %v2534_v53  ;;  %3235 = vmatpush1.bf16.msra.mxu1 %v6375_v49  ;;  %v2596_v62 = vmax.f32 %v2532_v46, %v2564_v52 }
 0x4bf   : > { %v2597_v24 = vmax.f32 %v2533_v10, %v2565_v54  ;;  %3236 = vmatprep.subr.bf16.mxu1 %v6380_v51 }
 0x4c0   : > { %v2598_v63 = vmax.f32 %v2534_v53, %v2566_v55  ;;  %v2466_v1 = vpop.f32.mrb[76].mxu0 }
 0x4c1   : > { %v2535_v22 = vadd.f32 %v7656_v57, %v2466_v1  ;;  %v2468_v2 = vpop.f32.mrb[77].mxu0  ;;  %v2656_v23 = vpack.c.bf16 %v2597_v24, %v2595_v59  ;;  %v6393_v24 = vld [vmem:[%s8549_s4 + $0x580] ss:$8 sps:$4 sm:$0xff]   ;;  %v6398_v1 = vld [vmem:[%s8549_s4 + $0x594] ss:$8 sps:$4 sm:$0xff]  }
 0x4c2   : > { %v2536_v3 = vadd.f32 %v7659_v58, %v2468_v2  ;;  %v2470_v5 = vpop.f32.mrb[78].mxu0  ;;  %v2657_v6 = vpack.c.bf16 %v2598_v63, %v2596_v62  ;;  %3237 = vmatpush1.bf16.msra.mxu1 %v6378_v56 }
 0x4c3   : > { %v2567_v11 = vmul.f32 0.01, %v2535_v22  ;;  %v2537_v12 = vadd.f32 %v7656_v57, %v2470_v5  ;;  %v2472_v13 = vpop.f32.mrb[79].mxu0  ;;  %3238 = vmatprep.subr.bf16.mxu1 %v6383_v60  ;;  %v6396_v5 = vld [vmem:[%s8549_s4 + $0x590] ss:$8 sps:$4 sm:$0xff]  }
 0x4c4   : > { %v2568_v15 = vmul.f32 0.01, %v2536_v3  ;;  %v2538_v16 = vadd.f32 %v7659_v58, %v2472_v13  ;;  %2888 = vmatprep.mubr.bf16.mxu1 %v2657_v6 }
 0x4c5   : > { %v2569_v17 = vmul.f32 0.01, %v2537_v12  ;;  %2889 = vmatmul.mubr.bf16.gmra.mrb[72].mxu1 %v2656_v23  ;;  %v2599_v26 = vmax.f32 %v2535_v22, %v2567_v11  ;;  %v6401_v11 = vld [vmem:[%s8549_s4 + $0x5a4] ss:$8 sps:$4 sm:$0xff]  }
 0x4c6   : > { %v2570_v18 = vmul.f32 0.01, %v2538_v16  ;;  %3239 = vmatpush1.bf16.msra.mxu1 %v6381_v7  ;;  %v2600_v29 = vmax.f32 %v2536_v3, %v2568_v15 }
 0x4c7   : > { %v2601_v27 = vmax.f32 %v2537_v12, %v2569_v17  ;;  %3240 = vmatprep.subr.bf16.mxu1 %v6386_v14 }
 0x4c8   : > { %v2602_v30 = vmax.f32 %v2538_v16, %v2570_v18  ;;  %v2476_v31 = vpop.f32.mrb[80].mxu0 }
 0x4c9   : > { %v2539_v32 = vadd.f32 %v7656_v57, %v2476_v31  ;;  %v2478_v33 = vpop.f32.mrb[81].mxu0  ;;  %v2658_v34 = vpack.c.bf16 %v2601_v27, %v2599_v26  ;;  %v6399_v27 = vld [vmem:[%s8549_s4 + $0x5a0] ss:$8 sps:$4 sm:$0xff]   ;;  %v6404_v31 = vld [vmem:[%s8549_s4 + $0x5b4] ss:$8 sps:$4 sm:$0xff]  }
 0x4ca   : > { %v2540_v9 = vadd.f32 %v7659_v58, %v2478_v33  ;;  %v2480_v38 = vpop.f32.mrb[82].mxu0  ;;  %v2659_v39 = vpack.c.bf16 %v2602_v30, %v2600_v29  ;;  %3241 = vmatpush1.bf16.msra.mxu1 %v6384_v19 }
 0x4cb   : > { %v2571_v25 = vmul.f32 0.01, %v2539_v32  ;;  %v2541_v61 = vadd.f32 %v7656_v57, %v2480_v38  ;;  %v2482_v41 = vpop.f32.mrb[83].mxu0  ;;  %3242 = vmatprep.subr.bf16.mxu1 %v6389_v28  ;;  %v6402_v38 = vld [vmem:[%s8549_s4 + $0x5b0] ss:$8 sps:$4 sm:$0xff]  }
 0x4cc   : > { %v2572_v43 = vmul.f32 0.01, %v2540_v9  ;;  %v2542_v44 = vadd.f32 %v7659_v58, %v2482_v41  ;;  %2898 = vmatprep.mubr.bf16.mxu1 %v2659_v39 }
 0x4cd   : > { %v2573_v45 = vmul.f32 0.01, %v2541_v61  ;;  %2899 = vmatmul.mubr.bf16.gmra.mrb[76].mxu1 %v2658_v34  ;;  %v2603_v48 = vmax.f32 %v2539_v32, %v2571_v25  ;;  %v6407_v25 = vld [vmem:[%s8549_s4 + $0x5c4] ss:$8 sps:$4 sm:$0xff]  }
 0x4ce   : > { %v2574_v46 = vmul.f32 0.01, %v2542_v44  ;;  %3243 = vmatpush1.bf16.msra.mxu1 %v6387_v40  ;;  %v2604_v10 = vmax.f32 %v2540_v9, %v2572_v43 }
 0x4cf   : > { %v2605_v49 = vmax.f32 %v2541_v61, %v2573_v45  ;;  %3244 = vmatprep.subr.bf16.mxu1 %v6392_v42 }
 0x4d0   : > { %v2606_v37 = vmax.f32 %v2542_v44, %v2574_v46  ;;  %v2486_v51 = vpop.f32.mrb[84].mxu0 }
 0x4d1   : > { %v2543_v52 = vadd.f32 %v7656_v57, %v2486_v51  ;;  %v2488_v53 = vpop.f32.mrb[85].mxu0  ;;  %v2660_v54 = vpack.c.bf16 %v2605_v49, %v2603_v48  ;;  %v6405_v49 = vld [vmem:[%s8549_s4 + $0x5c0] ss:$8 sps:$4 sm:$0xff]  }
 0x4d2   : > { %v2544_v55 = vadd.f32 %v7659_v58, %v2488_v53  ;;  %v2490_v56 = vpop.f32.mrb[86].mxu0  ;;  %v2661_v59 = vpack.c.bf16 %v2606_v37, %v2604_v10  ;;  %3245 = vmatpush1.bf16.msra.mxu1 %v6390_v47 }
 0x4d3   : > { %v2575_v60 = vmul.f32 0.01, %v2543_v52  ;;  %v2545_v62 = vadd.f32 %v7656_v57, %v2490_v56  ;;  %v2492_v63 = vpop.f32.mrb[87].mxu0  ;;  %3246 = vmatprep.subr.bf16.mxu1 %v6395_v50 }
 0x4d4   : > { %v2576_v22 = vmul.f32 0.01, %v2544_v55  ;;  %v2546_v2 = vadd.f32 %v7659_v58, %v2492_v63  ;;  %2908 = vmatprep.mubr.bf16.mxu1 %v2661_v59  ;;  %v6413_v63 = vld [vmem:[%s8549_s4 + $0x5e4] ss:$8 sps:$4 sm:$0xff]  }
 0x4d5   : > { %v2577_v23 = vmul.f32 0.01, %v2545_v62  ;;  %2909 = vmatmul.mubr.bf16.gmra.mrb[80].mxu1 %v2660_v54  ;;  %v2607_v6 = vmax.f32 %v2543_v52, %v2575_v60 }
 0x4d6   : > { %v2578_v3 = vmul.f32 0.01, %v2546_v2  ;;  %3247 = vmatpush1.bf16.msra.mxu1 %v6393_v24  ;;  %v2608_v12 = vmax.f32 %v2544_v55, %v2576_v22  ;;  %v6416_v22 = vld [vmem:[%s8549_s4 + $0x5f4] ss:$8 sps:$4 sm:$0xff]  }
 0x4d7   : > { %v2609_v7 = vmax.f32 %v2545_v62, %v2577_v23  ;;  %3248 = vmatprep.subr.bf16.mxu1 %v6398_v1  ;;  %v6411_v1 = vld [vmem:[%s8549_s4 + $0x5e0] ss:$8 sps:$4 sm:$0xff]  }
 0x4d8   : > { %v2610_v13 = vmax.f32 %v2546_v2, %v2578_v3  ;;  %v2496_v14 = vpop.f32.mrb[88].mxu0  ;;  %v6414_v2 = vld [vmem:[%s8549_s4 + $0x5f0] ss:$8 sps:$4 sm:$0xff]   ;;  %v6417_v23 = vld [vmem:[%s8549_s4 + $0x600] ss:$8 sps:$4 sm:$0xff]  }
 0x4d9   : > { %v2547_v15 = vadd.f32 %v7656_v57, %v2496_v14  ;;  %v2498_v16 = vpop.f32.mrb[89].mxu0  ;;  %v2662_v17 = vpack.c.bf16 %v2609_v7, %v2607_v6  ;;  %v6419_v3 = vld [vmem:[%s8549_s4 + $0x604] ss:$8 sps:$4 sm:$0xff]   ;;  %v6420_v6 = vld [vmem:[%s8549_s4 + $0x610] ss:$8 sps:$4 sm:$0xff]  }
 0x4da   : > { %v2548_v18 = vadd.f32 %v7659_v58, %v2498_v16  ;;  %v2500_v19 = vpop.f32.mrb[90].mxu0  ;;  %v2663_v26 = vpack.c.bf16 %v2610_v13, %v2608_v12  ;;  %3249 = vmatpush1.bf16.msra.mxu1 %v6396_v5  ;;  %v6422_v5 = vld [vmem:[%s8549_s4 + $0x614] ss:$8 sps:$4 sm:$0xff]   ;;  %3624 = vmatprep.subr.bf16.mxu0 %v6419_v3  ;;  %v6425_v7 = vld [vmem:[%s8549_s4 + $0x624] ss:$8 sps:$4 sm:$0xff]  }
 0x4db   : > { %v2579_v28 = vmul.f32 0.01, %v2547_v15  ;;  %v2549_v29 = vadd.f32 %v7656_v57, %v2500_v19  ;;  %v2502_v30 = vpop.f32.mrb[91].mxu0  ;;  %3250 = vmatprep.subr.bf16.mxu1 %v6401_v11  ;;  %3625 = vmatpush1.bf16.msra.mxu0 %v6417_v23  ;;  %v6423_v11 = vld [vmem:[%s8549_s4 + $0x620] ss:$8 sps:$4 sm:$0xff]  }
 0x4dc   : > { %v2580_v32 = vmul.f32 0.01, %v2548_v18  ;;  %v2550_v33 = vadd.f32 %v7659_v58, %v2502_v30  ;;  %2918 = vmatprep.mubr.bf16.mxu1 %v2663_v26  ;;  %3626 = vmatprep.subr.bf16.mxu0 %v6422_v5  ;;  %v6428_v12 = vld [vmem:[%s8549_s4 + $0x634] ss:$8 sps:$4 sm:$0xff]   ;;  %v6426_v13 = vld [vmem:[%s8549_s4 + $0x630] ss:$8 sps:$4 sm:$0xff]  }
 0x4dd   : > { %v2581_v34 = vmul.f32 0.01, %v2549_v29  ;;  %2919 = vmatmul.mubr.bf16.gmra.mrb[84].mxu1 %v2662_v17  ;;  %v2611_v39 = vmax.f32 %v2547_v15, %v2579_v28  ;;  %v6431_v14 = vld [vmem:[%s8549_s4 + $0x644] ss:$8 sps:$4 sm:$0xff]   ;;  %v6429_v15 = vld [vmem:[%s8549_s4 + $0x640] ss:$8 sps:$4 sm:$0xff]  }
 0x4de   : > { %v2582_v9 = vmul.f32 0.01, %v2550_v33  ;;  %3251 = vmatpush1.bf16.msra.mxu1 %v6399_v27  ;;  %v2612_v61 = vmax.f32 %v2548_v18, %v2580_v32  ;;  %v6434_v16 = vld [vmem:[%s8549_s4 + $0x654] ss:$8 sps:$4 sm:$0xff]   ;;  %v6432_v17 = vld [vmem:[%s8549_s4 + $0x650] ss:$8 sps:$4 sm:$0xff]  }
 0x4df   : > { %v2613_v40 = vmax.f32 %v2549_v29, %v2581_v34  ;;  %3252 = vmatprep.subr.bf16.mxu1 %v6404_v31  ;;  %3627 = vmatpush1.bf16.msra.mxu0 %v6420_v6  ;;  %v6437_v18 = vld [vmem:[%s8549_s4 + $0x664] ss:$8 sps:$4 sm:$0xff]   ;;  %v6435_v19 = vld [vmem:[%s8549_s4 + $0x660] ss:$8 sps:$4 sm:$0xff]   ;;  %v6440_v26 = vld [vmem:[%s8549_s4 + $0x674] ss:$8 sps:$4 sm:$0xff]  }
 0x4e0   : > { %v2614_v41 = vmax.f32 %v2550_v33, %v2582_v9  ;;  %v2506_v42 = vpop.f32.mrb[92].mxu0  ;;  %3628 = vmatprep.subr.bf16.mxu0 %v6425_v7  ;;  %v6438_v27 = vld [vmem:[%s8549_s4 + $0x670] ss:$8 sps:$4 sm:$0xff]   ;;  %v6443_v28 = vld [vmem:[%s8549_s4 + $0x684] ss:$8 sps:$4 sm:$0xff]  }
 0x4e1   : > { %v2551_v43 = vadd.f32 %v7656_v57, %v2506_v42  ;;  %v2508_v44 = vpop.f32.mrb[93].mxu0  ;;  %v2664_v45 = vpack.c.bf16 %v2613_v40, %v2611_v39  ;;  %v6441_v29 = vld [vmem:[%s8549_s4 + $0x680] ss:$8 sps:$4 sm:$0xff]   ;;  %v6446_v30 = vld [vmem:[%s8549_s4 + $0x694] ss:$8 sps:$4 sm:$0xff]   ;;  %v2670_v40 = vsub.s32 5, %v7109_v20 }
 0x4e2   : > { %v2552_v46 = vadd.f32 %v7659_v58, %v2508_v44  ;;  %v2510_v47 = vpop.f32.mrb[94].mxu0  ;;  %v2665_v48 = vpack.c.bf16 %v2614_v41, %v2612_v61  ;;  %3253 = vmatpush1.bf16.msra.mxu1 %v6402_v38  ;;  %v6444_v31 = vld [vmem:[%s8549_s4 + $0x690] ss:$8 sps:$4 sm:$0xff]   ;;  %v6449_v32 = vld [vmem:[%s8549_s4 + $0x6a4] ss:$8 sps:$4 sm:$0xff]  }
 0x4e3   : > { %v2583_v50 = vmul.f32 0.01, %v2551_v43  ;;  %v2553_v10 = vadd.f32 %v7656_v57, %v2510_v47  ;;  %v2512_v37 = vpop.f32.mrb[95].mxu0  ;;  %3254 = vmatprep.subr.bf16.mxu1 %v6407_v25  ;;  %v6410_v57 = vld [vmem:[%s8549_s4 + $0x5d4] ss:$8 sps:$4 sm:$0xff]   ;;  %3629 = vmatpush1.bf16.msra.mxu0 %v6423_v11  ;;  %v7866_v25 = vrot.slane %v7588_v8, %v2670_v40  ;;  %v7869_v61 = vrot.slane %v7596_v36, %v2670_v40 }
 0x4e4   : > { %v2584_v51 = vmul.f32 0.01, %v2552_v46  ;;  %v2554_v52 = vadd.f32 %v7659_v58, %v2512_v37  ;;  %2928 = vmatprep.mubr.bf16.mxu1 %v2665_v48  ;;  %v6408_v58 = vld [vmem:[%s8549_s4 + $0x5d0] ss:$8 sps:$4 sm:$0xff]   ;;  %3630 = vmatprep.subr.bf16.mxu0 %v6428_v12  ;;  %v6447_v33 = vld [vmem:[%s8549_s4 + $0x6a0] ss:$8 sps:$4 sm:$0xff]  }
 0x4e5   : > { %v2585_v53 = vmul.f32 0.01, %v2553_v10  ;;  %2929 = vmatmul.mubr.bf16.gmra.mrb[88].mxu1 %v2664_v45  ;;  %v2615_v55 = vmax.f32 %v2551_v43, %v2583_v50  ;;  %v6452_v34 = vld [vmem:[%s8549_s4 + $0x6b4] ss:$8 sps:$4 sm:$0xff]   ;;  %v6450_v9 = vld [vmem:[%s8549_s4 + $0x6b0] ss:$8 sps:$4 sm:$0xff]  }
 0x4e6   : > { %v2586_v54 = vmul.f32 0.01, %v2554_v52  ;;  %3255 = vmatpush1.bf16.msra.mxu1 %v6405_v49  ;;  %v2616_v59 = vmax.f32 %v2552_v46, %v2584_v51  ;;  %v6455_v38 = vld [vmem:[%s8549_s4 + $0x6c4] ss:$8 sps:$4 sm:$0xff]   ;;  %v6453_v39 = vld [vmem:[%s8549_s4 + $0x6c0] ss:$8 sps:$4 sm:$0xff]  }
 0x4e7   : > { %v2617_v56 = vmax.f32 %v2553_v10, %v2585_v53  ;;  %3256 = vmatprep.subr.bf16.mxu1 %v6410_v57  ;;  %3631 = vmatpush1.bf16.msra.mxu0 %v6426_v13 }
 0x4e8   : > { %v2618_v24 = vmax.f32 %v2554_v52, %v2586_v54  ;;  %3632 = vmatprep.subr.bf16.mxu0 %v6431_v14 }
 0x4e9   : > { %v2666_v60 = vpack.c.bf16 %v2617_v56, %v2615_v55 }
 0x4ea   : > { %v2667_v62 = vpack.c.bf16 %v2618_v24, %v2616_v59  ;;  %3257 = vmatpush1.bf16.msra.mxu1 %v6408_v58 }
 0x4eb   : > { %3258 = vmatprep.subr.bf16.mxu1 %v6413_v63  ;;  %3633 = vmatpush1.bf16.msra.mxu0 %v6429_v15 }
 0x4ec   : > { %2938 = vmatprep.mubr.bf16.mxu1 %v2667_v62  ;;  %3634 = vmatprep.subr.bf16.mxu0 %v6434_v16 }
 0x4ed   : > { %2939 = vmatmul.mubr.bf16.gmra.mrb[92].mxu1 %v2666_v60 }
 0x4ee   : > { %3259 = vmatpush1.bf16.msra.mxu1 %v6411_v1 }
 0x4ef   : > { %3260 = vmatprep.subr.bf16.mxu1 %v6416_v22  ;;  %3635 = vmatpush1.bf16.msra.mxu0 %v6432_v17 }
 0x4f0   : > { %3636 = vmatprep.subr.bf16.mxu0 %v6437_v18 }
 0x4f2   : > { %3261 = vmatpush1.bf16.msra.mxu1 %v6414_v2 }
 0x4f3   : > { %3637 = vmatpush1.bf16.msra.mxu0 %v6435_v19 }
 0x4f4   : > { %3638 = vmatprep.subr.bf16.mxu0 %v6440_v26 }
 0x4f7   : > { %3639 = vmatpush1.bf16.msra.mxu0 %v6438_v27 }
 0x4f8   : > { %3640 = vmatprep.subr.bf16.mxu0 %v6443_v28 }
 0x4fb   : > { %3641 = vmatpush1.bf16.msra.mxu0 %v6441_v29 }
 0x4fc   : > { %3642 = vmatprep.subr.bf16.mxu0 %v6446_v30 }
 0x4ff   : > { %3643 = vmatpush1.bf16.msra.mxu0 %v6444_v31 }
 0x500   : > { %3644 = vmatprep.subr.bf16.mxu0 %v6449_v32 }
 0x503   : > { %3645 = vmatpush1.bf16.msra.mxu0 %v6447_v33 }
 0x504   : > { %3646 = vmatprep.subr.bf16.mxu0 %v6452_v34 }
 0x507   : > { %3647 = vmatpush1.bf16.msra.mxu0 %v6450_v9 }
 0x508   : > { %3648 = vmatprep.subr.bf16.mxu0 %v6455_v38 }
 0x50b   : > { %3649 = vmatpush1.bf16.msra.mxu0 %v6453_v39 }
 0x588   : > { %v2870_v41 = vpop.f32.mrb[64].mxu1 }
 0x589   : > { %v2871_v42 = vadd.f32 %v2870_v41, %v7866_v25  ;;  %v2872_v43 = vpop.f32.mrb[65].mxu1 }
 0x58a   : > { %v2873_v44 = vadd.f32 %v2872_v43, %v7869_v61  ;;  %v2874_v45 = vpop.f32.mrb[66].mxu1 }
 0x58b   : > { %v2949_v46 = vmul.f32 0.01, %v2871_v42  ;;  %v2875_v47 = vadd.f32 %v2874_v45, %v7866_v25  ;;  %v2876_v48 = vpop.f32.mrb[67].mxu1 }
 0x58c   : > { %v2950_v49 = vmul.f32 0.01, %v2873_v44  ;;  %v2877_v50 = vadd.f32 %v2876_v48, %v7869_v61 }
 0x58d   : > { %v2951_v10 = vmul.f32 0.01, %v2875_v47  ;;  %v2981_v37 = vmax.f32 %v2871_v42, %v2949_v46 }
 0x58e   : > { %v2952_v8 = vmul.f32 0.01, %v2877_v50  ;;  %v2982_v36 = vmax.f32 %v2873_v44, %v2950_v49 }
 0x58f   : > { %v2983_v51 = vmax.f32 %v2875_v47, %v2951_v10 }
 0x590   : > { %v2984_v52 = vmax.f32 %v2877_v50, %v2952_v8  ;;  %v2880_v53 = vpop.f32.mrb[68].mxu1 }
 0x591   : > { %v3046_v54 = vpack.c.bf16 %v2983_v51, %v2981_v37  ;;  %v2881_v55 = vadd.f32 %v2880_v53, %v7866_v25  ;;  %v2882_v56 = vpop.f32.mrb[69].mxu1 }
 0x592   : > { %v2883_v59 = vadd.f32 %v2882_v56, %v7869_v61  ;;  %v2884_v24 = vpop.f32.mrb[70].mxu1  ;;  %v3047_v60 = vpack.c.bf16 %v2984_v52, %v2982_v36 }
 0x593   : > { %v2953_v62 = vmul.f32 0.01, %v2881_v55  ;;  %v2885_v57 = vadd.f32 %v2884_v24, %v7866_v25  ;;  %v2886_v58 = vpop.f32.mrb[71].mxu1 }
 0x594   : > { %v2954_v63 = vmul.f32 0.01, %v2883_v59  ;;  %v2887_v1 = vadd.f32 %v2886_v58, %v7869_v61  ;;  %3262 = vmatprep.mubr.bf16.mxu1 %v3047_v60 }
 0x595   : > { %v2955_v22 = vmul.f32 0.01, %v2885_v57  ;;  %3263 = vmatmul.mubr.bf16.vlgmr.msra.gmra.mrb[96].mxu1 %v3046_v54  ;;  %v2985_v23 = vmax.f32 %v2881_v55, %v2953_v62 }
 0x596   : > { %v2956_v2 = vmul.f32 0.01, %v2887_v1  ;;  %v2986_v5 = vmax.f32 %v2883_v59, %v2954_v63 }
 0x597   : > { %v2987_v3 = vmax.f32 %v2885_v57, %v2955_v22 }
 0x598   : > { %v2988_v6 = vmax.f32 %v2887_v1, %v2956_v2  ;;  %v2890_v7 = vpop.f32.mrb[72].mxu1 }
 0x599   : > { %v2891_v11 = vadd.f32 %v2890_v7, %v7866_v25  ;;  %v2892_v12 = vpop.f32.mrb[73].mxu1  ;;  %v3048_v13 = vpack.c.bf16 %v2987_v3, %v2985_v23 }
 0x59a   : > { %v2893_v14 = vadd.f32 %v2892_v12, %v7869_v61  ;;  %v2894_v15 = vpop.f32.mrb[74].mxu1  ;;  %v3049_v16 = vpack.c.bf16 %v2988_v6, %v2986_v5 }
 0x59b   : > { %v2957_v17 = vmul.f32 0.01, %v2891_v11  ;;  %v2895_v18 = vadd.f32 %v2894_v15, %v7866_v25  ;;  %v2896_v19 = vpop.f32.mrb[75].mxu1 }
 0x59c   : > { %v2958_v26 = vmul.f32 0.01, %v2893_v14  ;;  %v2897_v27 = vadd.f32 %v2896_v19, %v7869_v61  ;;  %3272 = vmatprep.mubr.bf16.mxu1 %v3049_v16 }
 0x59d   : > { %v2959_v28 = vmul.f32 0.01, %v2895_v18  ;;  %3273 = vmatmul.mubr.bf16.gmra.mrb[100].mxu1 %v3048_v13  ;;  %v2989_v30 = vmax.f32 %v2891_v11, %v2957_v17 }
 0x59e   : > { %v2960_v29 = vmul.f32 0.01, %v2897_v27  ;;  %v2990_v32 = vmax.f32 %v2893_v14, %v2958_v26 }
 0x59f   : > { %v2991_v31 = vmax.f32 %v2895_v18, %v2959_v28 }
 0x5a0   : > { %v2992_v33 = vmax.f32 %v2897_v27, %v2960_v29  ;;  %v2900_v34 = vpop.f32.mrb[76].mxu1 }
 0x5a1   : > { %v2901_v9 = vadd.f32 %v2900_v34, %v7866_v25  ;;  %v2902_v38 = vpop.f32.mrb[77].mxu1  ;;  %v3050_v39 = vpack.c.bf16 %v2991_v31, %v2989_v30 }
 0x5a2   : > { %v2903_v40 = vadd.f32 %v2902_v38, %v7869_v61  ;;  %v2904_v41 = vpop.f32.mrb[78].mxu1  ;;  %v3051_v42 = vpack.c.bf16 %v2992_v33, %v2990_v32 }
 0x5a3   : > { %v2961_v43 = vmul.f32 0.01, %v2901_v9  ;;  %v2905_v44 = vadd.f32 %v2904_v41, %v7866_v25  ;;  %v2906_v45 = vpop.f32.mrb[79].mxu1 }
 0x5a4   : > { %v2962_v46 = vmul.f32 0.01, %v2903_v40  ;;  %v2907_v47 = vadd.f32 %v2906_v45, %v7869_v61  ;;  %3282 = vmatprep.mubr.bf16.mxu1 %v3051_v42 }
 0x5a5   : > { %v2963_v48 = vmul.f32 0.01, %v2905_v44  ;;  %3283 = vmatmul.mubr.bf16.gmra.mrb[104].mxu1 %v3050_v39  ;;  %v2993_v50 = vmax.f32 %v2901_v9, %v2961_v43 }
 0x5a6   : > { %v2964_v49 = vmul.f32 0.01, %v2907_v47  ;;  %v2994_v8 = vmax.f32 %v2903_v40, %v2962_v46 }
 0x5a7   : > { %v2995_v10 = vmax.f32 %v2905_v44, %v2963_v48 }
 0x5a8   : > { %v2996_v37 = vmax.f32 %v2907_v47, %v2964_v49  ;;  %v2910_v51 = vpop.f32.mrb[80].mxu1 }
 0x5a9   : > { %v2911_v36 = vadd.f32 %v2910_v51, %v7866_v25  ;;  %v2912_v52 = vpop.f32.mrb[81].mxu1  ;;  %v3052_v53 = vpack.c.bf16 %v2995_v10, %v2993_v50 }
 0x5aa   : > { %v2913_v54 = vadd.f32 %v2912_v52, %v7869_v61  ;;  %v2914_v55 = vpop.f32.mrb[82].mxu1  ;;  %v3053_v56 = vpack.c.bf16 %v2996_v37, %v2994_v8 }
 0x5ab   : > { %v2965_v59 = vmul.f32 0.01, %v2911_v36  ;;  %v2915_v24 = vadd.f32 %v2914_v55, %v7866_v25  ;;  %v2916_v60 = vpop.f32.mrb[83].mxu1 }
 0x5ac   : > { %v2966_v62 = vmul.f32 0.01, %v2913_v54  ;;  %v2917_v57 = vadd.f32 %v2916_v60, %v7869_v61  ;;  %3292 = vmatprep.mubr.bf16.mxu1 %v3053_v56 }
 0x5ad   : > { %v2967_v58 = vmul.f32 0.01, %v2915_v24  ;;  %3293 = vmatmul.mubr.bf16.gmra.mrb[108].mxu1 %v3052_v53  ;;  %v2997_v1 = vmax.f32 %v2911_v36, %v2965_v59 }
 0x5ae   : > { %v2968_v63 = vmul.f32 0.01, %v2917_v57  ;;  %v2998_v2 = vmax.f32 %v2913_v54, %v2966_v62 }
 0x5af   : > { %v2999_v22 = vmax.f32 %v2915_v24, %v2967_v58 }
 0x5b0   : > { %v3000_v23 = vmax.f32 %v2917_v57, %v2968_v63  ;;  %v2920_v3 = vpop.f32.mrb[84].mxu1 }
 0x5b1   : > { %v2921_v5 = vadd.f32 %v2920_v3, %v7866_v25  ;;  %v2922_v6 = vpop.f32.mrb[85].mxu1  ;;  %v3054_v7 = vpack.c.bf16 %v2999_v22, %v2997_v1  ;;  %v6459_v3 = vld [vmem:[%s8549_s4 + $0x6e0] ss:$8 sps:$4 sm:$0xff]  }
 0x5b2   : > { %v2923_v11 = vadd.f32 %v2922_v6, %v7869_v61  ;;  %v2924_v12 = vpop.f32.mrb[86].mxu1  ;;  %v3055_v13 = vpack.c.bf16 %v3000_v23, %v2998_v2  ;;  %v6461_v23 = vld [vmem:[%s8549_s4 + $0x6e4] ss:$8 sps:$4 sm:$0xff]   ;;  %v6462_v6 = vld [vmem:[%s8549_s4 + $0x6f0] ss:$8 sps:$4 sm:$0xff]  }
 0x5b3   : > { %v2969_v14 = vmul.f32 0.01, %v2921_v5  ;;  %v2925_v15 = vadd.f32 %v2924_v12, %v7866_v25  ;;  %v2926_v16 = vpop.f32.mrb[87].mxu1  ;;  %v7932_v12 = vld [vmem:[%s8551_s6 + $0x14] ss:$8 sps:$4 sm:$0xff]  }
 0x5b4   : > { %v2970_v17 = vmul.f32 0.01, %v2923_v11  ;;  %v2927_v18 = vadd.f32 %v2926_v16, %v7869_v61  ;;  %3302 = vmatprep.mubr.bf16.mxu1 %v3055_v13  ;;  %v7939_v13 = vld [vmem:[%s8551_s6 + $0x10] ss:$8 sps:$4 sm:$0xff]   ;;  %v7956_v16 = vld [vmem:[%s8551_s6 + $0x34] ss:$8 sps:$4 sm:$0xff]  }
 0x5b5   : > { %v2971_v19 = vmul.f32 0.01, %v2925_v15  ;;  %3303 = vmatmul.mubr.bf16.gmra.mrb[112].mxu1 %v3054_v7  ;;  %v3001_v27 = vmax.f32 %v2921_v5, %v2969_v14  ;;  %v6464_v5 = vld [vmem:[%s8549_s4 + $0x6f4] ss:$8 sps:$4 sm:$0xff]   ;;  %v6467_v7 = vld [vmem:[%s8551_s6 + $0x4] ss:$8 sps:$4 sm:$0xff]  }
 0x5b6   : > { %v2972_v26 = vmul.f32 0.01, %v2927_v18  ;;  %v3002_v29 = vmax.f32 %v2923_v11, %v2970_v17  ;;  %v7927_v11 = vld [vmem:[%s8551_s6] ss:$8 sps:$4 sm:$0xff]   ;;  %5999 = vmatprep.subr.bf16.mxu1 %v6467_v7  ;;  %v7944_v14 = vld [vmem:[%s8551_s6 + $0x24] ss:$8 sps:$4 sm:$0xff]  }
 0x5b7   : > { %v3003_v28 = vmax.f32 %v2925_v15, %v2971_v19  ;;  %6015 = vmatpush1.bf16.msra.mxu1 %v7927_v11  ;;  %v7951_v15 = vld [vmem:[%s8551_s6 + $0x20] ss:$8 sps:$4 sm:$0xff]   ;;  %v7963_v17 = vld [vmem:[%s8551_s6 + $0x30] ss:$8 sps:$4 sm:$0xff]  }
 0x5b8   : > { %v3004_v30 = vmax.f32 %v2927_v18, %v2972_v26  ;;  %v2930_v31 = vpop.f32.mrb[88].mxu1  ;;  %6000 = vmatprep.subr.bf16.mxu1 %v7932_v12  ;;  %v7968_v18 = vld [vmem:[%s8551_s6 + $0x44] ss:$8 sps:$4 sm:$0xff]   ;;  %v7975_v19 = vld [vmem:[%s8551_s6 + $0x40] ss:$8 sps:$4 sm:$0xff]  }
 0x5b9   : > { %v2931_v32 = vadd.f32 %v2930_v31, %v7866_v25  ;;  %v2932_v33 = vpop.f32.mrb[89].mxu1  ;;  %v3056_v34 = vpack.c.bf16 %v3003_v28, %v3001_v27  ;;  %v7980_v26 = vld [vmem:[%s8551_s6 + $0x54] ss:$8 sps:$4 sm:$0xff]   ;;  %v7987_v27 = vld [vmem:[%s8551_s6 + $0x50] ss:$8 sps:$4 sm:$0xff]  }
 0x5ba   : > { %v2933_v9 = vadd.f32 %v2932_v33, %v7869_v61  ;;  %v2934_v38 = vpop.f32.mrb[90].mxu1  ;;  %v3057_v39 = vpack.c.bf16 %v3004_v30, %v3002_v29  ;;  %v7992_v28 = vld [vmem:[%s8551_s6 + $0x64] ss:$8 sps:$4 sm:$0xff]   ;;  %v7999_v29 = vld [vmem:[%s8551_s6 + $0x60] ss:$8 sps:$4 sm:$0xff]  }
 0x5bb   : > { %v2973_v40 = vmul.f32 0.01, %v2931_v32  ;;  %v2935_v41 = vadd.f32 %v2934_v38, %v7866_v25  ;;  %v2936_v42 = vpop.f32.mrb[91].mxu1  ;;  %6016 = vmatpush1.bf16.msra.mxu1 %v7939_v13  ;;  %v8004_v30 = vld [vmem:[%s8551_s6 + $0x74] ss:$8 sps:$4 sm:$0xff]  }
 0x5bc   : > { %v2974_v43 = vmul.f32 0.01, %v2933_v9  ;;  %v2937_v44 = vadd.f32 %v2936_v42, %v7869_v61  ;;  %3312 = vmatprep.mubr.bf16.mxu1 %v3057_v39  ;;  %6001 = vmatprep.subr.bf16.mxu1 %v7944_v14  ;;  %v8011_v31 = vld [vmem:[%s8551_s6 + $0x70] ss:$8 sps:$4 sm:$0xff]   ;;  %v8023_v33 = vld [vmem:[%s8551_s6 + $0x80] ss:$8 sps:$4 sm:$0xff]  }
 0x5bd   : > { %v2975_v45 = vmul.f32 0.01, %v2935_v41  ;;  %3313 = vmatmul.mubr.bf16.gmra.mrb[116].mxu1 %v3056_v34  ;;  %v3005_v47 = vmax.f32 %v2931_v32, %v2973_v40  ;;  %v8016_v32 = vld [vmem:[%s8551_s6 + $0x84] ss:$8 sps:$4 sm:$0xff]   ;;  %v8028_v34 = vld [vmem:[%s8551_s6 + $0x94] ss:$8 sps:$4 sm:$0xff]  }
 0x5be   : > { %v2976_v46 = vmul.f32 0.01, %v2937_v44  ;;  %v3006_v49 = vmax.f32 %v2933_v9, %v2974_v43  ;;  %v8035_v9 = vld [vmem:[%s8551_s6 + $0x90] ss:$8 sps:$4 sm:$0xff]   ;;  %v8040_v38 = vld [vmem:[%s8551_s6 + $0xa4] ss:$8 sps:$4 sm:$0xff]  }
 0x5bf   : > { %v3007_v48 = vmax.f32 %v2935_v41, %v2975_v45  ;;  %6017 = vmatpush1.bf16.msra.mxu1 %v7951_v15  ;;  %v8047_v39 = vld [vmem:[%s8551_s6 + $0xa0] ss:$8 sps:$4 sm:$0xff]   ;;  %v8052_v40 = vld [vmem:[%s8551_s6 + $0xb4] ss:$8 sps:$4 sm:$0xff]   ;;  %v8059_v41 = vld [vmem:[%s8551_s6 + $0xb0] ss:$8 sps:$4 sm:$0xff]  }
 0x5c0   : > { %v3008_v50 = vmax.f32 %v2937_v44, %v2976_v46  ;;  %v2940_v10 = vpop.f32.mrb[92].mxu1  ;;  %6002 = vmatprep.subr.bf16.mxu1 %v7956_v16  ;;  %v8064_v42 = vld [vmem:[%s8551_s6 + $0xc4] ss:$8 sps:$4 sm:$0xff]   ;;  %v8071_v43 = vld [vmem:[%s8551_s6 + $0xc0] ss:$8 sps:$4 sm:$0xff]   ;;  %v3064_v44 = vsub.s32 6, %v7109_v20 }
 0x5c1   : > { %v2941_v8 = vadd.f32 %v2940_v10, %v7866_v25  ;;  %v2942_v37 = vpop.f32.mrb[93].mxu1  ;;  %v3058_v51 = vpack.c.bf16 %v3007_v48, %v3005_v47  ;;  %v8078_v45 = vld [vmem:[%s8550_s5] sm:$0xff]  ;;  %v8086_v47 = vld [vmem:[%s8550_s5 + $0x8] sm:$0xff] }
 0x5c2   : > { %v2943_v36 = vadd.f32 %v2942_v37, %v7869_v61  ;;  %v2944_v52 = vpop.f32.mrb[94].mxu1  ;;  %v3059_v53 = vpack.c.bf16 %v3008_v50, %v3006_v49  ;;  %v8081_v46 = vrot.slane %v8078_v45, %v3064_v44  ;;  %v8089_v48 = vrot.slane %v8086_v47, %v3064_v44 }
 0x5c3   : > { %v2977_v54 = vmul.f32 0.01, %v2941_v8  ;;  %v2945_v55 = vadd.f32 %v2944_v52, %v7866_v25  ;;  %v2946_v56 = vpop.f32.mrb[95].mxu1  ;;  %v6458_v25 = vld [vmem:[%s8549_s4 + $0x6d4] ss:$8 sps:$4 sm:$0xff]   ;;  %6018 = vmatpush1.bf16.msra.mxu1 %v7963_v17 }
 0x5c4   : > { %v2978_v59 = vmul.f32 0.01, %v2943_v36  ;;  %v2947_v24 = vadd.f32 %v2946_v56, %v7869_v61  ;;  %3322 = vmatprep.mubr.bf16.mxu1 %v3059_v53  ;;  %v6456_v61 = vld [vmem:[%s8549_s4 + $0x6d0] ss:$8 sps:$4 sm:$0xff]   ;;  %3650 = vmatprep.subr.bf16.mxu0 %v6458_v25 }
 0x5c5   : > { %v2979_v60 = vmul.f32 0.01, %v2945_v55  ;;  %3323 = vmatmul.mubr.bf16.gmra.mrb[120].mxu1 %v3058_v51  ;;  %v3009_v57 = vmax.f32 %v2941_v8, %v2977_v54  ;;  %3651 = vmatpush1.bf16.msra.mxu0 %v6456_v61 }
 0x5c6   : > { %v2980_v62 = vmul.f32 0.01, %v2947_v24  ;;  %v3010_v63 = vmax.f32 %v2943_v36, %v2978_v59  ;;  %3652 = vmatprep.subr.bf16.mxu0 %v6461_v23  ;;  %6003 = vmatprep.subr.bf16.mxu1 %v7968_v18 }
 0x5c7   : > { %v3011_v58 = vmax.f32 %v2945_v55, %v2979_v60  ;;  %6019 = vmatpush1.bf16.msra.mxu1 %v7975_v19 }
 0x5c8   : > { %v3012_v1 = vmax.f32 %v2947_v24, %v2980_v62  ;;  %6004 = vmatprep.subr.bf16.mxu1 %v7980_v26 }
 0x5c9   : > { %v3060_v22 = vpack.c.bf16 %v3011_v58, %v3009_v57  ;;  %3653 = vmatpush1.bf16.msra.mxu0 %v6459_v3 }
 0x5ca   : > { %v3061_v2 = vpack.c.bf16 %v3012_v1, %v3010_v63  ;;  %3654 = vmatprep.subr.bf16.mxu0 %v6464_v5 }
 0x5cb   : > { %6020 = vmatpush1.bf16.msra.mxu1 %v7987_v27 }
 0x5cc   : > { %3332 = vmatprep.mubr.bf16.mxu1 %v3061_v2  ;;  %6005 = vmatprep.subr.bf16.mxu1 %v7992_v28 }
 0x5cd   : > { %3333 = vmatmul.mubr.bf16.gmra.mrb[124].mxu1 %v3060_v22  ;;  %3655 = vmatpush1.bf16.msra.mxu0 %v6462_v6 }
 0x5ce   : > { %4021 = vmatprep.subr.bf16.mxu0 %v6467_v7 }
 0x5cf   : > { %6021 = vmatpush1.bf16.msra.mxu1 %v7999_v29 }
 0x5d0   : > { %6006 = vmatprep.subr.bf16.mxu1 %v8004_v30 }
 0x5d3   : > { %6022 = vmatpush1.bf16.msra.mxu1 %v8011_v31 }
 0x5d4   : > { %6007 = vmatprep.subr.bf16.mxu1 %v8016_v32 }
 0x5d7   : > { %6023 = vmatpush1.bf16.msra.mxu1 %v8023_v33 }
 0x5d8   : > { %6008 = vmatprep.subr.bf16.mxu1 %v8028_v34 }
 0x5db   : > { %6024 = vmatpush1.bf16.msra.mxu1 %v8035_v9 }
 0x5dc   : > { %6009 = vmatprep.subr.bf16.mxu1 %v8040_v38 }
 0x5df   : > { %6025 = vmatpush1.bf16.msra.mxu1 %v8047_v39 }
 0x5e0   : > { %6010 = vmatprep.subr.bf16.mxu1 %v8052_v40 }
 0x5e3   : > { %6026 = vmatpush1.bf16.msra.mxu1 %v8059_v41 }
 0x5e4   : > { %6011 = vmatprep.subr.bf16.mxu1 %v8064_v42 }
 0x5e7   : > { %6027 = vmatpush1.bf16.msra.mxu1 %v8071_v43 }
 0x668   : > { %v3264_v49 = vpop.f32.mrb[96].mxu1 }
 0x669   : > { %v3265_v50 = vadd.f32 %v3264_v49, %v8081_v46  ;;  %v3266_v10 = vpop.f32.mrb[97].mxu1 }
 0x66a   : > { %v3267_v8 = vadd.f32 %v3266_v10, %v8089_v48  ;;  %v3268_v37 = vpop.f32.mrb[98].mxu1 }
 0x66b   : > { %v3343_v51 = vmul.f32 0.01, %v3265_v50  ;;  %v3269_v36 = vadd.f32 %v3268_v37, %v8081_v46  ;;  %v3270_v52 = vpop.f32.mrb[99].mxu1 }
 0x66c   : > { %v3344_v53 = vmul.f32 0.01, %v3267_v8  ;;  %v3271_v54 = vadd.f32 %v3270_v52, %v8089_v48 }
 0x66d   : > { %v3345_v55 = vmul.f32 0.01, %v3269_v36  ;;  %v3375_v59 = vmax.f32 %v3265_v50, %v3343_v51 }
 0x66e   : > { %v3346_v56 = vmul.f32 0.01, %v3271_v54  ;;  %v3376_v60 = vmax.f32 %v3267_v8, %v3344_v53 }
 0x66f   : > { %v3377_v24 = vmax.f32 %v3269_v36, %v3345_v55 }
 0x670   : > { %v3378_v62 = vmax.f32 %v3271_v54, %v3346_v56  ;;  %v3274_v57 = vpop.f32.mrb[100].mxu1 }
 0x671   : > { %v3440_v58 = vpack.c.bf16 %v3377_v24, %v3375_v59  ;;  %v3275_v63 = vadd.f32 %v3274_v57, %v8081_v46  ;;  %v3276_v1 = vpop.f32.mrb[101].mxu1 }
 0x672   : > { %v3277_v22 = vadd.f32 %v3276_v1, %v8089_v48  ;;  %v3278_v2 = vpop.f32.mrb[102].mxu1  ;;  %v3441_v25 = vpack.c.bf16 %v3378_v62, %v3376_v60 }
 0x673   : > { %v3347_v61 = vmul.f32 0.01, %v3275_v63  ;;  %v3279_v23 = vadd.f32 %v3278_v2, %v8081_v46  ;;  %v3280_v3 = vpop.f32.mrb[103].mxu1 }
 0x674   : > { %v3348_v5 = vmul.f32 0.01, %v3277_v22  ;;  %v3281_v6 = vadd.f32 %v3280_v3, %v8089_v48  ;;  %3656 = vmatprep.mubr.bf16.mxu0 %v3441_v25 }
 0x675   : > { %v3349_v7 = vmul.f32 0.01, %v3279_v23  ;;  %3657 = vmatmul.mubr.bf16.vlgmr.msra.gmra.mrb[96].mxu0 %v3440_v58  ;;  %v3379_v49 = vmax.f32 %v3275_v63, %v3347_v61 }
 0x676   : > { %v3350_v44 = vmul.f32 0.01, %v3281_v6  ;;  %4022 = vmatpush1.bf16.msra.mxu0 %v7927_v11  ;;  %v3380_v10 = vmax.f32 %v3277_v22, %v3348_v5 }
 0x677   : > { %v3381_v50 = vmax.f32 %v3279_v23, %v3349_v7  ;;  %4023 = vmatprep.subr.bf16.mxu0 %v7932_v12 }
 0x678   : > { %v3382_v8 = vmax.f32 %v3281_v6, %v3350_v44  ;;  %v3284_v37 = vpop.f32.mrb[104].mxu1 }
 0x679   : > { %v3285_v51 = vadd.f32 %v3284_v37, %v8081_v46  ;;  %v3286_v36 = vpop.f32.mrb[105].mxu1  ;;  %v3442_v52 = vpack.c.bf16 %v3381_v50, %v3379_v49 }
 0x67a   : > { %v3287_v53 = vadd.f32 %v3286_v36, %v8089_v48  ;;  %v3288_v54 = vpop.f32.mrb[106].mxu1  ;;  %v3443_v55 = vpack.c.bf16 %v3382_v8, %v3380_v10  ;;  %4024 = vmatpush1.bf16.msra.mxu0 %v7939_v13 }
 0x67b   : > { %v3351_v56 = vmul.f32 0.01, %v3285_v51  ;;  %v3289_v11 = vadd.f32 %v3288_v54, %v8081_v46  ;;  %v3290_v59 = vpop.f32.mrb[107].mxu1  ;;  %4025 = vmatprep.subr.bf16.mxu0 %v7944_v14 }
 0x67c   : > { %v3352_v12 = vmul.f32 0.01, %v3287_v53  ;;  %v3291_v24 = vadd.f32 %v3290_v59, %v8089_v48  ;;  %3666 = vmatprep.mubr.bf16.mxu0 %v3443_v55 }
 0x67d   : > { %v3353_v60 = vmul.f32 0.01, %v3289_v11  ;;  %3667 = vmatmul.mubr.bf16.gmra.mrb[100].mxu0 %v3442_v52  ;;  %v3383_v57 = vmax.f32 %v3285_v51, %v3351_v56 }
 0x67e   : > { %v3354_v62 = vmul.f32 0.01, %v3291_v24  ;;  %4026 = vmatpush1.bf16.msra.mxu0 %v7951_v15  ;;  %v3384_v13 = vmax.f32 %v3287_v53, %v3352_v12 }
 0x67f   : > { %v3385_v58 = vmax.f32 %v3289_v11, %v3353_v60  ;;  %4027 = vmatprep.subr.bf16.mxu0 %v7956_v16 }
 0x680   : > { %v3386_v63 = vmax.f32 %v3291_v24, %v3354_v62  ;;  %v3294_v1 = vpop.f32.mrb[108].mxu1 }
 0x681   : > { %v3295_v22 = vadd.f32 %v3294_v1, %v8081_v46  ;;  %v3296_v2 = vpop.f32.mrb[109].mxu1  ;;  %v3444_v14 = vpack.c.bf16 %v3385_v58, %v3383_v57 }
 0x682   : > { %v3297_v25 = vadd.f32 %v3296_v2, %v8089_v48  ;;  %v3298_v61 = vpop.f32.mrb[110].mxu1  ;;  %v3445_v23 = vpack.c.bf16 %v3386_v63, %v3384_v13  ;;  %4028 = vmatpush1.bf16.msra.mxu0 %v7963_v17 }
 0x683   : > { %v3355_v3 = vmul.f32 0.01, %v3295_v22  ;;  %v3299_v15 = vadd.f32 %v3298_v61, %v8081_v46  ;;  %v3300_v5 = vpop.f32.mrb[111].mxu1  ;;  %4029 = vmatprep.subr.bf16.mxu0 %v7968_v18 }
 0x684   : > { %v3356_v16 = vmul.f32 0.01, %v3297_v25  ;;  %v3301_v6 = vadd.f32 %v3300_v5, %v8089_v48  ;;  %3676 = vmatprep.mubr.bf16.mxu0 %v3445_v23 }
 0x685   : > { %v3357_v7 = vmul.f32 0.01, %v3299_v15  ;;  %3677 = vmatmul.mubr.bf16.gmra.mrb[104].mxu0 %v3444_v14  ;;  %v3387_v49 = vmax.f32 %v3295_v22, %v3355_v3 }
 0x686   : > { %v3358_v44 = vmul.f32 0.01, %v3301_v6  ;;  %4030 = vmatpush1.bf16.msra.mxu0 %v7975_v19  ;;  %v3388_v17 = vmax.f32 %v3297_v25, %v3356_v16 }
 0x687   : > { %v3389_v50 = vmax.f32 %v3299_v15, %v3357_v7  ;;  %4031 = vmatprep.subr.bf16.mxu0 %v7980_v26 }
 0x688   : > { %v3390_v10 = vmax.f32 %v3301_v6, %v3358_v44  ;;  %v3304_v8 = vpop.f32.mrb[112].mxu1 }
 0x689   : > { %v3305_v37 = vadd.f32 %v3304_v8, %v8081_v46  ;;  %v3306_v51 = vpop.f32.mrb[113].mxu1  ;;  %v3446_v18 = vpack.c.bf16 %v3389_v50, %v3387_v49 }
 0x68a   : > { %v3307_v36 = vadd.f32 %v3306_v51, %v8089_v48  ;;  %v3308_v52 = vpop.f32.mrb[114].mxu1  ;;  %v3447_v53 = vpack.c.bf16 %v3390_v10, %v3388_v17  ;;  %4032 = vmatpush1.bf16.msra.mxu0 %v7987_v27 }
 0x68b   : > { %v3359_v54 = vmul.f32 0.01, %v3305_v37  ;;  %v3309_v19 = vadd.f32 %v3308_v52, %v8081_v46  ;;  %v3310_v55 = vpop.f32.mrb[115].mxu1  ;;  %4033 = vmatprep.subr.bf16.mxu0 %v7992_v28 }
 0x68c   : > { %v3360_v26 = vmul.f32 0.01, %v3307_v36  ;;  %v3311_v56 = vadd.f32 %v3310_v55, %v8089_v48  ;;  %3686 = vmatprep.mubr.bf16.mxu0 %v3447_v53 }
 0x68d   : > { %v3361_v11 = vmul.f32 0.01, %v3309_v19  ;;  %3687 = vmatmul.mubr.bf16.gmra.mrb[108].mxu0 %v3446_v18  ;;  %v3391_v12 = vmax.f32 %v3305_v37, %v3359_v54 }
 0x68e   : > { %v3362_v59 = vmul.f32 0.01, %v3311_v56  ;;  %4034 = vmatpush1.bf16.msra.mxu0 %v7999_v29  ;;  %v3392_v27 = vmax.f32 %v3307_v36, %v3360_v26 }
 0x68f   : > { %v3393_v24 = vmax.f32 %v3309_v19, %v3361_v11  ;;  %4035 = vmatprep.subr.bf16.mxu0 %v8004_v30 }
 0x690   : > { %v3394_v60 = vmax.f32 %v3311_v56, %v3362_v59  ;;  %v3314_v62 = vpop.f32.mrb[116].mxu1 }
 0x691   : > { %v3315_v57 = vadd.f32 %v3314_v62, %v8081_v46  ;;  %v3316_v58 = vpop.f32.mrb[117].mxu1  ;;  %v3448_v28 = vpack.c.bf16 %v3393_v24, %v3391_v12 }
 0x692   : > { %v3317_v13 = vadd.f32 %v3316_v58, %v8089_v48  ;;  %v3318_v63 = vpop.f32.mrb[118].mxu1  ;;  %v3449_v1 = vpack.c.bf16 %v3394_v60, %v3392_v27  ;;  %4036 = vmatpush1.bf16.msra.mxu0 %v8011_v31 }
 0x693   : > { %v3363_v22 = vmul.f32 0.01, %v3315_v57  ;;  %v3319_v29 = vadd.f32 %v3318_v63, %v8081_v46  ;;  %v3320_v2 = vpop.f32.mrb[119].mxu1  ;;  %4037 = vmatprep.subr.bf16.mxu0 %v8016_v32  ;;  %v6513_v63 = vld [vmem:[#allocation4] sm:$0xff]  }
 0x694   : > { %v3364_v30 = vmul.f32 0.01, %v3317_v13  ;;  %v3321_v14 = vadd.f32 %v3320_v2, %v8089_v48  ;;  %3696 = vmatprep.mubr.bf16.mxu0 %v3449_v1  ;;  %v3458_v1 = vsub.s32 7, %v7109_v20 }
 0x695   : > { %v3365_v25 = vmul.f32 0.01, %v3319_v29  ;;  %3697 = vmatmul.mubr.bf16.gmra.mrb[112].mxu0 %v3448_v28  ;;  %v3395_v23 = vmax.f32 %v3315_v57, %v3363_v22  ;;  %v6512_v28 = vld [vmem:[%s8551_s6 + $0xf4] ss:$8 sps:$4 sm:$0xff]  }
 0x696   : > { %v3366_v61 = vmul.f32 0.01, %v3321_v14  ;;  %4038 = vmatpush1.bf16.msra.mxu0 %v8023_v33  ;;  %v3396_v31 = vmax.f32 %v3317_v13, %v3364_v30  ;;  %v6510_v13 = vld [vmem:[%s8551_s6 + $0xf0] ss:$8 sps:$4 sm:$0xff]   ;;  %v8174_v22 = vrot.slane %v8078_v45, %v3458_v1 }
 0x697   : > { %v3397_v3 = vmax.f32 %v3319_v29, %v3365_v25  ;;  %4039 = vmatprep.subr.bf16.mxu0 %v8028_v34  ;;  %v8177_v29 = vrot.slane %v8086_v47, %v3458_v1  ;;  %v4216_v47 = vsel %vm4214_vm3, 4294967295, %v6711_v4  ;;  %v6521_v1 = vld [vmem:[%s8554_s9 + $0x10] ss:$8 sps:$4 sm:$0xff]  }
 0x698   : > { %v3398_v15 = vmax.f32 %v3321_v14, %v3366_v61  ;;  %v3324_v5 = vpop.f32.mrb[120].mxu1 }
 0x699   : > { %v3325_v16 = vadd.f32 %v3324_v5, %v8081_v46  ;;  %v3326_v6 = vpop.f32.mrb[121].mxu1  ;;  %v3450_v32 = vpack.c.bf16 %v3397_v3, %v3395_v23 }
 0x69a   : > { %v3327_v7 = vadd.f32 %v3326_v6, %v8089_v48  ;;  %v3328_v44 = vpop.f32.mrb[122].mxu1  ;;  %v3451_v49 = vpack.c.bf16 %v3398_v15, %v3396_v31  ;;  %4040 = vmatpush1.bf16.msra.mxu0 %v8035_v9 }
 0x69b   : > { %v3367_v50 = vmul.f32 0.01, %v3325_v16  ;;  %v3329_v33 = vadd.f32 %v3328_v44, %v8081_v46  ;;  %v3330_v17 = vpop.f32.mrb[123].mxu1  ;;  %4041 = vmatprep.subr.bf16.mxu0 %v8040_v38 }
 0x69c   : > { %v3368_v34 = vmul.f32 0.01, %v3327_v7  ;;  %v3331_v10 = vadd.f32 %v3330_v17, %v8089_v48  ;;  %3706 = vmatprep.mubr.bf16.mxu0 %v3451_v49 }
 0x69d   : > { %v3369_v8 = vmul.f32 0.01, %v3329_v33  ;;  %3707 = vmatmul.mubr.bf16.gmra.mrb[116].mxu0 %v3450_v32  ;;  %v3399_v51 = vmax.f32 %v3325_v16, %v3367_v50  ;;  %v6514_v32 = vld [vmem:[#allocation4 + $0x8] sm:$0x3f]   ;;  %v4217_v50 = vsel %vm4215_vm4, %v4216_v47, 0 }
 0x69e   : > { %v3370_v37 = vmul.f32 0.01, %v3331_v10  ;;  %4042 = vmatpush1.bf16.msra.mxu0 %v8047_v39  ;;  %v3400_v9 = vmax.f32 %v3327_v7, %v3368_v34 }
 0x69f   : > { %v3401_v18 = vmax.f32 %v3329_v33, %v3369_v8  ;;  %4043 = vmatprep.subr.bf16.mxu0 %v8052_v40 }
 0x6a0   : > { %v3402_v36 = vmax.f32 %v3331_v10, %v3370_v37  ;;  %v3334_v52 = vpop.f32.mrb[124].mxu1 }
 0x6a1   : > { %v3335_v53 = vadd.f32 %v3334_v52, %v8081_v46  ;;  %v3336_v54 = vpop.f32.mrb[125].mxu1  ;;  %v3452_v38 = vpack.c.bf16 %v3401_v18, %v3399_v51  ;;  %v6515_v51 = vld [vmem:[%s8170_s13] sm:$0xff]  }
 0x6a2   : > { %v3337_v19 = vadd.f32 %v3336_v54, %v8089_v48  ;;  %v3338_v55 = vpop.f32.mrb[126].mxu1  ;;  %v3453_v26 = vpack.c.bf16 %v3402_v36, %v3400_v9  ;;  %4044 = vmatpush1.bf16.msra.mxu0 %v8059_v41  ;;  %v4219_v36 = vand.u32 %v6514_v32, %v4217_v50  ;;  %v6526_v32 = vld [vmem:[%s8554_s9 + $0x20] ss:$8 sps:$4 sm:$0xff]  }
 0x6a3   : > { %v3371_v56 = vmul.f32 0.01, %v3335_v53  ;;  %v3339_v39 = vadd.f32 %v3338_v55, %v8081_v46  ;;  %v3340_v11 = vpop.f32.mrb[127].mxu1  ;;  %4045 = vmatprep.subr.bf16.mxu0 %v8064_v42  ;;  %v6506_v42 = vld [vmem:[%s8551_s6 + $0xd4] ss:$8 sps:$4 sm:$0xff]  }
 0x6a4   : > { %v3372_v40 = vmul.f32 0.01, %v3337_v19  ;;  %v3341_v59 = vadd.f32 %v3340_v11, %v8089_v48  ;;  %3716 = vmatprep.mubr.bf16.mxu0 %v3453_v26  ;;  %v6504_v46 = vld [vmem:[%s8551_s6 + $0xd0] ss:$8 sps:$4 sm:$0xff]   ;;  %6012 = vmatprep.subr.bf16.mxu1 %v6506_v42  ;;  %v6507_v48 = vld [vmem:[%s8551_s6 + $0xe0] ss:$8 sps:$4 sm:$0xff]  }
 0x6a5   : > { %v3373_v12 = vmul.f32 0.01, %v3339_v39  ;;  %3717 = vmatmul.mubr.bf16.gmra.mrb[120].mxu0 %v3452_v38  ;;  %v3403_v27 = vmax.f32 %v3335_v53, %v3371_v56  ;;  %6028 = vmatpush1.bf16.msra.mxu1 %v6504_v46  ;;  %v6518_v26 = vld [vmem:[%s8554_s9 + $0x4] ss:$8 sps:$4 sm:$0xff]  }
 0x6a6   : > { %v3374_v24 = vmul.f32 0.01, %v3341_v59  ;;  %4046 = vmatpush1.bf16.msra.mxu0 %v8071_v43  ;;  %v3404_v62 = vmax.f32 %v3337_v19, %v3372_v40  ;;  %v6509_v43 = vld [vmem:[%s8551_s6 + $0xe4] ss:$8 sps:$4 sm:$0xff]  }
 0x6a7   : > { %v3405_v60 = vmax.f32 %v3339_v39, %v3373_v12  ;;  %4047 = vmatprep.subr.bf16.mxu0 %v6506_v42  ;;  %6013 = vmatprep.subr.bf16.mxu1 %v6509_v43 }
 0x6a8   : > { %v3406_v57 = vmax.f32 %v3341_v59, %v3374_v24  ;;  %v6519_v24 = vld [vmem:[%s8170_s13 + $0x8] sm:$0xff]  }
 0x6a9   : > { %v3454_v41 = vpack.c.bf16 %v3405_v60, %v3403_v27  ;;  %6029 = vmatpush1.bf16.msra.mxu1 %v6507_v48 }
 0x6aa   : > { %v3455_v58 = vpack.c.bf16 %v3406_v57, %v3404_v62  ;;  %4048 = vmatpush1.bf16.msra.mxu0 %v6504_v46  ;;  %6014 = vmatprep.subr.bf16.mxu1 %v6512_v28  ;;  %v6516_v57 = vld [vmem:[%s8554_s9] ss:$8 sps:$4 sm:$0xff]  }
 0x6ab   : > { %4049 = vmatprep.subr.bf16.mxu0 %v6509_v43  ;;  %v6523_v43 = vld [vmem:[%s8554_s9 + $0x14] ss:$8 sps:$4 sm:$0xff]  }
 0x6ac   : > { %3726 = vmatprep.mubr.bf16.mxu0 %v3455_v58 }
 0x6ad   : > { %3727 = vmatmul.mubr.bf16.gmra.mrb[124].mxu0 %v3454_v41  ;;  %6030 = vmatpush1.bf16.msra.mxu1 %v6510_v13  ;;  %v6520_v41 = vld [vmem:[%s8170_s13 + $0x10] sm:$0xff]  }
 0x6ae   : > { %4050 = vmatpush1.bf16.msra.mxu0 %v6507_v48 }
 0x6af   : > { %4051 = vmatprep.subr.bf16.mxu0 %v6512_v28 }
 0x6b2   : > { %4052 = vmatpush1.bf16.msra.mxu0 %v6510_v13 }
 0x6b3   : > { %5979 = vmatprep.subr.bf16.mxu0 %v6513_v63 }
 0x748   : > { %v3658_v2 = vpop.f32.mrb[96].mxu0 }
 0x749   : > { %v3659_v30 = vadd.f32 %v3658_v2, %v8174_v22  ;;  %v3660_v14 = vpop.f32.mrb[97].mxu0 }
 0x74a   : > { %v3661_v25 = vadd.f32 %v3660_v14, %v8177_v29  ;;  %v3662_v61 = vpop.f32.mrb[98].mxu0  ;;  %v6528_v14 = vld [vmem:[%s8554_s9 + $0x24] ss:$8 sps:$4 sm:$0xff]  }
 0x74b   : > { %v3737_v23 = vmul.f32 0.01, %v3659_v30  ;;  %v3663_v3 = vadd.f32 %v3662_v61, %v8174_v22  ;;  %v3664_v31 = vpop.f32.mrb[99].mxu0 }
 0x74c   : > { %v3738_v15 = vmul.f32 0.01, %v3661_v25  ;;  %v3665_v20 = vadd.f32 %v3664_v31, %v8177_v29 }
 0x74d   : > { %v3739_v45 = vmul.f32 0.01, %v3663_v3  ;;  %v3769_v16 = vmax.f32 %v3659_v30, %v3737_v23 }
 0x74e   : > { %v3740_v5 = vmul.f32 0.01, %v3665_v20  ;;  %v3770_v7 = vmax.f32 %v3661_v25, %v3738_v15 }
 0x74f   : > { %v3771_v6 = vmax.f32 %v3663_v3, %v3739_v45  ;;  %v4340_v3 = vld [vmem:[%s8554_s9 + $0x30] sm:$0x77]  ;;  %v6524_v45 = vld [vmem:[%s8170_s13 + $0x18] sm:$0xff]  }
 0x750   : > { %v3772_v44 = vmax.f32 %v3665_v20, %v3740_v5  ;;  %v3668_v49 = vpop.f32.mrb[100].mxu0  ;;  %v5860_v50 = vcombine.high %v4340_v3, %v4340_v3 }
 0x751   : > { %v3833_v33 = vpack.c.bf16 %v3771_v6, %v3769_v16  ;;  %v3669_v17 = vadd.f32 %v3668_v49, %v8174_v22  ;;  %v3670_v34 = vpop.f32.mrb[101].mxu0  ;;  %v6525_v6 = vld [vmem:[%s8170_s13 + $0x20] sm:$0xff]  }
 0x752   : > { %v3671_v10 = vadd.f32 %v3670_v34, %v8177_v29  ;;  %v3672_v8 = vpop.f32.mrb[102].mxu0  ;;  %v3834_v37 = vpack.c.bf16 %v3772_v44, %v3770_v7 }
 0x753   : > { %v3741_v18 = vmul.f32 0.01, %v3669_v17  ;;  %v3673_v4 = vadd.f32 %v3672_v8, %v8174_v22  ;;  %v3674_v9 = vpop.f32.mrb[103].mxu0 }
 0x754   : > { %v3742_v52 = vmul.f32 0.01, %v3671_v10  ;;  %v3675_v53 = vadd.f32 %v3674_v9, %v8177_v29  ;;  %4053 = vmatprep.mubr.bf16.mxu0 %v3834_v37 }
 0x755   : > { %v3743_v54 = vmul.f32 0.01, %v3673_v4  ;;  %4054 = vmatmul.mubr.bf16.vlgmr.msra.gmra.mrb[128].mxu0 %v3833_v33  ;;  %v3773_v19 = vmax.f32 %v3669_v17, %v3741_v18  ;;  %v5859_v33 = vcombine.low %v4340_v3, %v4340_v3 }
 0x756   : > { %v3744_v38 = vmul.f32 0.01, %v3675_v53  ;;  %5980 = vmatpush3.bf16.msra.mxu0 %v6513_v63  ;;  %5983 = vmatprep.mubr.msk.bf16.mxu0 %vm4189_vm5, %v6515_v51  ;;  %v3774_v56 = vmax.f32 %v3671_v10, %v3742_v52 }
 0x757   : > { %v3775_v55 = vmax.f32 %v3673_v4, %v3743_v54  ;;  %5981 = vmatprep.subr.bf16.mxu0 %v4219_v36  ;;  %v4443_v18 = vsel %vm4441_vm6, %v5859_v33, 0 }
 0x758   : > { %v3776_v39 = vmax.f32 %v3675_v53, %v3744_v38  ;;  %v3678_v11 = vpop.f32.mrb[104].mxu0  ;;  %v6529_v38 = vld [vmem:[%s8170_s13 + $0x28] sm:$0xff]  }
 0x759   : > { %v3835_v40 = vpack.c.bf16 %v3775_v55, %v3773_v19  ;;  %v3679_v59 = vadd.f32 %v3678_v11, %v8174_v22  ;;  %v3680_v12 = vpop.f32.mrb[105].mxu0 }
 0x75a   : > { %v3681_v27 = vadd.f32 %v3680_v12, %v8177_v29  ;;  %5982 = vmatpush3.bf16.msra.mxu0 %v4219_v36  ;;  %v3682_v60 = vpop.f32.mrb[106].mxu0  ;;  %v3836_v62 = vpack.c.bf16 %v3776_v39, %v3774_v56  ;;  %v6530_v56 = vld [vmem:[%s8170_s13 + $0x30] sm:$0xff]  }
 0x75b   : > { %v3745_v58 = vmul.f32 0.01, %v3679_v59  ;;  %v3683_v42 = vadd.f32 %v3682_v60, %v8174_v22  ;;  %v3684_v46 = vpop.f32.mrb[107].mxu0  ;;  %4448 = vmatprep.subr.bf16.mxu0 %v6518_v26 }
 0x75c   : > { %v3746_v48 = vmul.f32 0.01, %v3681_v27  ;;  %v3685_v28 = vadd.f32 %v3684_v46, %v8177_v29  ;;  %4063 = vmatprep.mubr.bf16.mxu1 %v3836_v62 }
 0x75d   : > { %v3747_v13 = vmul.f32 0.01, %v3683_v42  ;;  %4064 = vmatmul.mubr.bf16.vlgmr.msra.gmra.mrb[128].mxu1 %v3835_v40  ;;  %5984 = vmatmul.mubr.msk.bf16.vlgmr.msra.gmra.mrb[132].mxu0 %vm4189_vm5, %v6519_v24  ;;  %v3777_v2 = vmax.f32 %v3679_v59, %v3745_v58 }
 0x75e   : > { %v3748_v63 = vmul.f32 0.01, %v3685_v28  ;;  %4449 = vmatpush1.bf16.msra.mxu0 %v6516_v57  ;;  %5987 = vmatprep.mubr.msk.bf16.mxu0 %vm4189_vm5, %v6520_v41  ;;  %v3778_v25 = vmax.f32 %v3681_v27, %v3746_v48  ;;  %v6532_v48 = vld [vmem:[%s8170_s13 + $0x38] sm:$0xff]   ;;  %s6712_s13 = smov 6  }
 0x75f   : > { %v3779_v30 = vmax.f32 %v3683_v42, %v3747_v13  ;;  %4450 = vmatprep.subr.bf16.mxu0 %v6523_v43 }
 0x760   : > { %v3780_v61 = vmax.f32 %v3685_v28, %v3748_v63  ;;  %v3688_v23 = vpop.f32.mrb[108].mxu0 }
 0x761   : > { %v3689_v31 = vadd.f32 %v3688_v23, %v8174_v22  ;;  %v3690_v15 = vpop.f32.mrb[109].mxu0  ;;  %v3837_v20 = vpack.c.bf16 %v3779_v30, %v3777_v2 }
 0x762   : > { %v3691_v47 = vadd.f32 %v3690_v15, %v8177_v29  ;;  %v3692_v5 = vpop.f32.mrb[110].mxu0  ;;  %v3838_v16 = vpack.c.bf16 %v3780_v61, %v3778_v25  ;;  %4451 = vmatpush1.bf16.msra.mxu0 %v6521_v1 }
 0x763   : > { %v3749_v7 = vmul.f32 0.01, %v3689_v31  ;;  %v3693_v44 = vadd.f32 %v3692_v5, %v8174_v22  ;;  %v3694_v49 = vpop.f32.mrb[111].mxu0  ;;  %4452 = vmatprep.subr.bf16.mxu0 %v6528_v14 }
 0x764   : > { %v3750_v17 = vmul.f32 0.01, %v3691_v47  ;;  %v3695_v34 = vadd.f32 %v3694_v49, %v8177_v29  ;;  %4073 = vmatprep.mubr.bf16.mxu1 %v3838_v16 }
 0x765   : > { %v3751_v10 = vmul.f32 0.01, %v3693_v44  ;;  %4074 = vmatmul.mubr.bf16.gmra.mrb[132].mxu1 %v3837_v20  ;;  %5988 = vmatmul.mubr.msk.bf16.gmra.mrb[136].mxu0 %vm4189_vm5, %v6524_v45  ;;  %v3781_v37 = vmax.f32 %v3689_v31, %v3749_v7 }
 0x766   : > { %v3752_v8 = vmul.f32 0.01, %v3695_v34  ;;  %5991 = vmatprep.mubr.msk.bf16.mxu0 %vm4189_vm5, %v6525_v6  ;;  %4453 = vmatpush1.bf16.msra.mxu0 %v6526_v32  ;;  %v3782_v4 = vmax.f32 %v3691_v47, %v3750_v17  ;;  %v6534_v6 = vld [vmem:[%s7029_s26] sm:$0xff]  }
 0x767   : > { %v3783_v51 = vmax.f32 %v3693_v44, %v3751_v10  ;;  %5861 = vmatprep.subr.msk.bf16.mxu0 %vm4441_vm6, %v5860_v50 }
 0x768   : > { %v3784_v9 = vmax.f32 %v3695_v34, %v3752_v8  ;;  %v3698_v36 = vpop.f32.mrb[112].mxu0 }
 0x769   : > { %v3699_v52 = vadd.f32 %v3698_v36, %v8174_v22  ;;  %v3700_v53 = vpop.f32.mrb[113].mxu0  ;;  %v3839_v54 = vpack.c.bf16 %v3783_v51, %v3781_v37 }
 0x76a   : > { %v3701_v19 = vadd.f32 %v3700_v53, %v8177_v29  ;;  %v3702_v55 = vpop.f32.mrb[114].mxu0  ;;  %v3840_v26 = vpack.c.bf16 %v3784_v9, %v3782_v4  ;;  %4455 = vmatpush1.bf16.msra.mxu0 %v4443_v18 }
 0x76b   : > { %v3753_v39 = vmul.f32 0.01, %v3699_v52  ;;  %v3703_v11 = vadd.f32 %v3702_v55, %v8174_v22  ;;  %v3704_v40 = vpop.f32.mrb[115].mxu0 }
 0x76c   : > { %v3754_v59 = vmul.f32 0.01, %v3701_v19  ;;  %v3705_v12 = vadd.f32 %v3704_v40, %v8177_v29  ;;  %4083 = vmatprep.mubr.bf16.mxu1 %v3840_v26 }
 0x76d   : > { %v3755_v24 = vmul.f32 0.01, %v3703_v11  ;;  %4084 = vmatmul.mubr.bf16.gmra.mrb[136].mxu1 %v3839_v54  ;;  %5992 = vmatmul.mubr.msk.bf16.gmra.mrb[140].mxu0 %vm4189_vm5, %v6529_v38  ;;  %v3785_v60 = vmax.f32 %v3699_v52, %v3753_v39  ;;  %v6535_v54 = vld [vmem:[%s7029_s26 + $0x8] sm:$0xff]  }
 0x76e   : > { %v3756_v27 = vmul.f32 0.01, %v3705_v12  ;;  %5995 = vmatprep.mubr.msk.bf16.mxu0 %vm4189_vm5, %v6530_v56  ;;  %v3786_v57 = vmax.f32 %v3701_v19, %v3754_v59 }
 0x76f   : > { %v3787_v62 = vmax.f32 %v3703_v11, %v3755_v24 }
 0x770   : > { %v3788_v41 = vmax.f32 %v3705_v12, %v3756_v27  ;;  %v3708_v58 = vpop.f32.mrb[116].mxu0 }
 0x771   : > { %v3709_v42 = vadd.f32 %v3708_v58, %v8174_v22  ;;  %v3710_v46 = vpop.f32.mrb[117].mxu0  ;;  %v3841_v43 = vpack.c.bf16 %v3787_v62, %v3785_v60  ;;  %v6538_v58 = vld [vmem:[%s7029_s26 + $0x20] sm:$0xff]  }
 0x772   : > { %v3711_v28 = vadd.f32 %v3710_v46, %v8177_v29  ;;  %v3712_v13 = vpop.f32.mrb[118].mxu0  ;;  %v3842_v63 = vpack.c.bf16 %v3788_v41, %v3786_v57  ;;  %v6536_v57 = vld [vmem:[%s7029_s26 + $0x10] sm:$0xff]  }
 0x773   : > { %v3757_v1 = vmul.f32 0.01, %v3709_v42  ;;  %v3713_v2 = vadd.f32 %v3712_v13, %v8174_v22  ;;  %v3714_v30 = vpop.f32.mrb[119].mxu0  ;;  %v6540_v46 = vld [vmem:[%s7029_s26 + $0x30] sm:$0xff]   ;;  %v6544_v13 = vld [vmem:[%s8555_s10 + $0x48] sm:$0xff]  }
 0x774   : > { %v3758_v14 = vmul.f32 0.01, %v3711_v28  ;;  %v3715_v25 = vadd.f32 %v3714_v30, %v8177_v29  ;;  %4093 = vmatprep.mubr.bf16.mxu1 %v3842_v63  ;;  %v6545_v63 = vld [vmem:[%s8555_s10 + $0x8] sm:$0xff]   ;;  %v6549_v30 = vld [vmem:[%s8555_s10 + $0x18] sm:$0xff]  }
 0x775   : > { %v3759_v61 = vmul.f32 0.01, %v3713_v2  ;;  %4094 = vmatmul.mubr.bf16.gmra.mrb[140].mxu1 %v3841_v43  ;;  %5996 = vmatmul.mubr.msk.bf16.gmra.mrb[144].mxu0 %vm4189_vm5, %v6532_v48  ;;  %v3789_v3 = vmax.f32 %v3709_v42, %v3757_v1  ;;  %v6539_v42 = vld [vmem:[%s7029_s26 + $0x28] sm:$0xff]   ;;  %v6542_v43 = vld [vmem:[%s8555_s10 + $0x40] sm:$0xff]   ;;  %v6546_v1 = vld [vmem:[%s8555_s10 + $0x50] sm:$0xff]  }
 0x776   : > { %v3760_v23 = vmul.f32 0.01, %v3715_v25  ;;  %4480 = vmatprep.mubr.bf16.mxu0 %v6710_v0  ;;  %v3790_v15 = vmax.f32 %v3711_v28, %v3758_v14  ;;  %v6543_v48 = vld [vmem:[%s8555_s10] sm:$0xff]   ;;  %5915 = vmatprep.subr.bf16.mxu1 %v6542_v43  ;;  %v6541_v28 = vld [vmem:[%s7029_s26 + $0x38] sm:$0xff]  }
 0x777   : > { %v3791_v31 = vmax.f32 %v3713_v2, %v3759_v61  ;;  %5916 = vmatpush3.bf16.msra.mxu1 %v6543_v48  ;;  %v6548_v2 = vld [vmem:[%s8555_s10 + $0x58] sm:$0xff]   ;;  %v6550_v14 = vld [vmem:[%s8555_s10 + $0x60] sm:$0xff]   ;;  %v6552_v61 = vld [vmem:[%s8555_s10 + $0x68] sm:$0xff]  }
 0x778   : > { %v3792_v20 = vmax.f32 %v3715_v25, %v3760_v23  ;;  %v3718_v45 = vpop.f32.mrb[120].mxu0  ;;  %5917 = vmatprep.subr.bf16.mxu1 %v6544_v13  ;;  %v6551_v25 = vld [vmem:[%s8555_s10 + $0x20] sm:$0xff]   ;;  %v6553_v23 = vld [vmem:[%s8555_s10 + $0x28] sm:$0xff]  }
 0x779   : > { %v3719_v47 = vadd.f32 %v3718_v45, %v8174_v22  ;;  %v3720_v5 = vpop.f32.mrb[121].mxu0  ;;  %v3843_v16 = vpack.c.bf16 %v3791_v31, %v3789_v3  ;;  %v6554_v3 = vld [vmem:[%s8555_s10 + $0x70] sm:$0xff]   ;;  %v3849_v45 = vld [vmem:[#allocation2] sm:$0x3] }
 0x77a   : > { %v3721_v32 = vadd.f32 %v3720_v5, %v8177_v29  ;;  %v3722_v7 = vpop.f32.mrb[122].mxu0  ;;  %v3844_v44 = vpack.c.bf16 %v3792_v20, %v3790_v15  ;;  %v6555_v31 = vld [vmem:[%s8555_s10 + $0x30] sm:$0xff]   ;;  %v6556_v15 = vld [vmem:[%s8555_s10 + $0x78] sm:$0xff]  }
 0x77b   : > { %v3761_v49 = vmul.f32 0.01, %v3719_v47  ;;  %v3723_v50 = vadd.f32 %v3722_v7, %v8174_v22  ;;  %v3724_v33 = vpop.f32.mrb[123].mxu0  ;;  %5918 = vmatpush3.bf16.msra.mxu1 %v6545_v63  ;;  %v6557_v20 = vld [vmem:[%s8555_s10 + $0x38] sm:$0xff]  }
 0x77c   : > { %v3762_v17 = vmul.f32 0.01, %v3721_v32  ;;  %v3725_v34 = vadd.f32 %v3724_v33, %v8177_v29  ;;  %4103 = vmatprep.mubr.bf16.mxu1 %v3844_v44  ;;  %5919 = vmatprep.subr.bf16.mxu1 %v6546_v1  ;;  %v8326_v44 = vrot.slane %v3849_v45, %v7112_v21 }
 0x77d   : > { %v3763_v10 = vmul.f32 0.01, %v3723_v50  ;;  %4104 = vmatmul.mubr.bf16.gmra.mrb[144].mxu1 %v3843_v16  ;;  %5862 = vmatmul.mubr.msk.bf16.vlgmr.msra.gmra.mrb[148].mxu0 %vm4416_vm7, %v6534_v6  ;;  %v3793_v37 = vmax.f32 %v3719_v47, %v3761_v49  ;;  %v8322_v47 = vrot.slane %v3849_v45, %v7261_v35 }
 0x77e   : > { %v3764_v8 = vmul.f32 0.01, %v3725_v34  ;;  %4490 = vmatprep.mubr.bf16.mxu0 %v6710_v0  ;;  %v3794_v18 = vmax.f32 %v3721_v32, %v3762_v17 }
 0x77f   : > { %v3795_v51 = vmax.f32 %v3723_v50, %v3763_v10 }
 0x780   : > { %v3796_v4 = vmax.f32 %v3725_v34, %v3764_v8  ;;  %v3728_v9 = vpop.f32.mrb[124].mxu0 }
 0x781   : > { %v3729_v36 = vadd.f32 %v3728_v9, %v8174_v22  ;;  %v3730_v52 = vpop.f32.mrb[125].mxu0  ;;  %v3845_v53 = vpack.c.bf16 %v3795_v51, %v3793_v37 }
 0x782   : > { %v3731_v38 = vadd.f32 %v3730_v52, %v8177_v29  ;;  %v3732_v19 = vpop.f32.mrb[126].mxu0  ;;  %v3846_v55 = vpack.c.bf16 %v3796_v4, %v3794_v18 }
 0x783   : > { %v3765_v26 = vmul.f32 0.01, %v3729_v36  ;;  %v3733_v56 = vadd.f32 %v3732_v19, %v8174_v22  ;;  %v3734_v39 = vpop.f32.mrb[127].mxu0 }
 0x784   : > { %v3766_v11 = vmul.f32 0.01, %v3731_v38  ;;  %v3735_v40 = vadd.f32 %v3734_v39, %v8177_v29  ;;  %4113 = vmatprep.mubr.bf16.mxu1 %v3846_v55  ;;  %v6537_v29 = vld [vmem:[%s7029_s26 + $0x18] sm:$0xff]  }
 0x785   : > { %v3767_v59 = vmul.f32 0.01, %v3733_v56  ;;  %4114 = vmatmul.mubr.bf16.gmra.mrb[148].mxu1 %v3845_v53  ;;  %5863 = vmatmul.mubr.msk.bf16.gmra.mrb[152].mxu0 %vm4416_vm7, %v6535_v54  ;;  %v3797_v24 = vmax.f32 %v3729_v36, %v3765_v26 }
 0x786   : > { %v3768_v12 = vmul.f32 0.01, %v3735_v40  ;;  %4500 = vmatprep.mubr.bf16.mxu0 %v6710_v0  ;;  %v3798_v60 = vmax.f32 %v3731_v38, %v3766_v11 }
 0x787   : > { %v3799_v27 = vmax.f32 %v3733_v56, %v3767_v59 }
 0x788   : > { %v3800_v62 = vmax.f32 %v3735_v40, %v3768_v12 }
 0x789   : > { %v3847_v22 = vpack.c.bf16 %v3799_v27, %v3797_v24 }
 0x78a   : > { %v3848_v41 = vpack.c.bf16 %v3800_v62, %v3798_v60 }
 0x78c   : > { %4123 = vmatprep.mubr.bf16.mxu1 %v3848_v41 }
 0x78d   : > { %4124 = vmatmul.mubr.bf16.gmra.mrb[152].mxu1 %v3847_v22  ;;  %5864 = vmatmul.mubr.msk.bf16.gmra.mrb[156].mxu0 %vm4416_vm7, %v6536_v57 }
 0x78e   : > { %4510 = vmatprep.mubr.bf16.mxu0 %v6710_v0 }
 0x795   : > { %5865 = vmatmul.mubr.msk.bf16.gmra.mrb[160].mxu0 %vm4416_vm7, %v6537_v29 }
 0x796   : > { %4520 = vmatprep.mubr.bf16.mxu0 %v6710_v0 }
 0x79d   : > { %5866 = vmatmul.mubr.msk.bf16.gmra.mrb[164].mxu0 %vm4416_vm7, %v6538_v58 }
 0x79e   : > { %4530 = vmatprep.mubr.bf16.mxu0 %v6710_v0 }
 0x7a5   : > { %5867 = vmatmul.mubr.msk.bf16.gmra.mrb[168].mxu0 %vm4416_vm7, %v6539_v42 }
 0x7a6   : > { %4540 = vmatprep.mubr.bf16.mxu0 %v6710_v0 }
 0x7ad   : > { %5868 = vmatmul.mubr.msk.bf16.gmra.mrb[172].mxu0 %vm4416_vm7, %v6540_v46 }
 0x7ae   : > { %4550 = vmatprep.mubr.bf16.mxu0 %v6710_v0  ;;  %v6547_v0 = vld [vmem:[%s8555_s10 + $0x10] sm:$0xff]  }
 0x7af   : > { %5920 = vmatpush3.bf16.msra.mxu1 %v6547_v0 }
 0x7b0   : > { %5921 = vmatprep.subr.bf16.mxu1 %v6548_v2 }
 0x7b3   : > { %5922 = vmatpush3.bf16.msra.mxu1 %v6549_v30 }
 0x7b4   : > { %5923 = vmatprep.subr.bf16.mxu1 %v6550_v14 }
 0x7b5   : > { %5869 = vmatmul.mubr.msk.bf16.gmra.mrb[176].mxu0 %vm4416_vm7, %v6541_v28 }
 0x7b7   : > { %5924 = vmatpush3.bf16.msra.mxu1 %v6551_v25 }
 0x7b8   : > { %5925 = vmatprep.subr.bf16.mxu1 %v6552_v61 }
 0x7bb   : > { %5926 = vmatpush3.bf16.msra.mxu1 %v6553_v23 }
 0x7bc   : > { %5927 = vmatprep.subr.bf16.mxu1 %v6554_v3 }
 0x7bf   : > { %5928 = vmatpush3.bf16.msra.mxu1 %v6555_v31 }
 0x7c0   : > { %5929 = vmatprep.subr.bf16.mxu1 %v6556_v15 }
 0x7c3   : > { %5930 = vmatpush3.bf16.msra.mxu1 %v6557_v20 }
 0x828   : > { %v4055_v5 = vpop.f32.mrb[128].mxu0 }
 0x829   : > { %v4057_v16 = vpop.f32.mrb[129].mxu0  ;;  %v4056_v50 = vadd.f32 %v4055_v5, %v8326_v44 }
 0x82a   : > { %v4058_v6 = vadd.f32 %v4057_v16, %v8322_v47  ;;  %v4059_v32 = vpop.f32.mrb[130].mxu0 }
 0x82b   : > { %v4061_v7 = vpop.f32.mrb[131].mxu0  ;;  %v4060_v8 = vadd.f32 %v4059_v32, %v8326_v44 }
 0x82c   : > { %5113 = vrot.lane.b32.xlu0 %v4058_v6, %s6712_s13  ;;  %v4062_v49 = vadd.f32 %v4061_v7, %v8322_v47 }
 0x830   : > { %v4065_v33 = vpop.f32.mrb[128].mxu1  ;;  %v5985_v17 = vpop.f32.mrb[132].mxu0  ;;  %5115 = vrot.lane.b32.xlu0 %v4062_v49, %s6712_s13 }
 0x831   : > { %v4066_v35 = vadd.f32 %v4065_v33, %v8326_v44  ;;  %v4067_v34 = vpop.f32.mrb[129].mxu1  ;;  %v4255_v10 = vpop.f32.mrb[133].mxu0 }
 0x832   : > { %v4068_v21 = vadd.f32 %v4067_v34, %v8322_v47  ;;  %v8335_v37 = vadd.f32 %v4255_v10, %v4056_v50  ;;  %v4069_v51 = vpop.f32.mrb[130].mxu1  ;;  %v5986_v18 = vpop.f32.mrb[134].mxu0 }
 0x833   : > { %v8337_v4 = vadd.f32 %v5985_v17, %v4066_v35  ;;  %v4070_v9 = vadd.f32 %v4069_v51, %v8326_v44  ;;  %v4071_v36 = vpop.f32.mrb[131].mxu1  ;;  %v4258_v52 = vpop.f32.mrb[135].mxu0 }
 0x834   : > { %v8340_v53 = vadd.f32 %v4258_v52, %v4060_v8  ;;  %5117 = vrot.lane.b32.xlu1 %v4068_v21, %s6712_s13  ;;  %v4072_v38 = vadd.f32 %v4071_v36, %v8322_v47 }
 0x835   : > { %v8343_v54 = vadd.f32 %v5986_v18, %v4070_v9 }
 0x838   : > { %v4075_v19 = vpop.f32.mrb[132].mxu1  ;;  %5119 = vrot.lane.b32.xlu1 %v4072_v38, %s6712_s13  ;;  %v5989_v55 = vpop.f32.mrb[136].mxu0 }
 0x839   : > { %v4076_v26 = vadd.f32 %v4075_v19, %v8326_v44  ;;  %v4077_v56 = vpop.f32.mrb[133].mxu1  ;;  %v4271_v39 = vpop.f32.mrb[137].mxu0 }
 0x83a   : > { %v4078_v11 = vadd.f32 %v4077_v56, %v8322_v47  ;;  %v4079_v40 = vpop.f32.mrb[134].mxu1  ;;  %v5990_v59 = vpop.f32.mrb[138].mxu0 }
 0x83b   : > { %v8349_v12 = vadd.f32 %v4271_v39, %v4076_v26  ;;  %v4080_v24 = vadd.f32 %v4079_v40, %v8326_v44  ;;  %v4081_v27 = vpop.f32.mrb[135].mxu1  ;;  %v4274_v60 = vpop.f32.mrb[139].mxu0 }
 0x83c   : > { %v4082_v62 = vadd.f32 %v4081_v27, %v8322_v47  ;;  %5121 = vrot.lane.b32.xlu0 %v4078_v11, %s6712_s13 }
 0x83d   : > { %v8354_v22 = vadd.f32 %v4274_v60, %v4080_v24 }
 0x83e   : > { %5123 = vrot.lane.b32.xlu1 %v4082_v62, %s6712_s13 }
 0x840   : > { %v4085_v57 = vpop.f32.mrb[136].mxu1  ;;  %v5993_v41 = vpop.f32.mrb[140].mxu0 }
 0x841   : > { %v4086_v29 = vadd.f32 %v4085_v57, %v8326_v44  ;;  %v4087_v58 = vpop.f32.mrb[137].mxu1  ;;  %v4287_v42 = vpop.f32.mrb[141].mxu0 }
 0x842   : > { %v4088_v46 = vadd.f32 %v4087_v58, %v8322_v47  ;;  %v4089_v43 = vpop.f32.mrb[138].mxu1  ;;  %v5994_v48 = vpop.f32.mrb[142].mxu0 }
 0x843   : > { %v4090_v28 = vadd.f32 %v4089_v43, %v8326_v44  ;;  %v4091_v13 = vpop.f32.mrb[139].mxu1  ;;  %v4290_v63 = vpop.f32.mrb[143].mxu0  ;;  %v8360_v1 = vadd.f32 %v5989_v55, %v4086_v29 }
 0x844   : > { %v4092_v0 = vadd.f32 %v4091_v13, %v8322_v47  ;;  %5125 = vrot.lane.b32.xlu0 %v4088_v46, %s6712_s13 }
 0x845   : > { %v8364_v2 = vadd.f32 %v5990_v59, %v4090_v28 }
 0x846   : > { %5127 = vrot.lane.b32.xlu1 %v4092_v0, %s6712_s13 }
 0x848   : > { %v4095_v30 = vpop.f32.mrb[140].mxu1  ;;  %v8367_v14 = vpop.f32.mrb[144].mxu0 }
 0x849   : > { %v4096_v25 = vadd.f32 %v4095_v30, %v8326_v44  ;;  %v4097_v61 = vpop.f32.mrb[141].mxu1  ;;  %v8370_v23 = vpop.f32.mrb[145].mxu0 }
 0x84a   : > { %v4098_v3 = vadd.f32 %v4097_v61, %v8322_v47  ;;  %v4099_v31 = vpop.f32.mrb[142].mxu1  ;;  %v8373_v15 = vpop.f32.mrb[146].mxu0 }
 0x84b   : > { %v4100_v20 = vadd.f32 %v4099_v31, %v8326_v44  ;;  %v4101_v45 = vpop.f32.mrb[143].mxu1  ;;  %v8376_v5 = vpop.f32.mrb[147].mxu0  ;;  %v8378_v16 = vadd.f32 %v4287_v42, %v4096_v25 }
 0x84c   : > { %v4102_v6 = vadd.f32 %v4101_v45, %v8322_v47  ;;  %5129 = vrot.lane.b32.xlu0 %v4098_v3, %s6712_s13 }
 0x84d   : > { %v8382_v32 = vadd.f32 %v4290_v63, %v4100_v20 }
 0x84e   : > { %5131 = vrot.lane.b32.xlu1 %v4102_v6, %s6712_s13 }
 0x850   : > { %v4105_v7 = vpop.f32.mrb[144].mxu1  ;;  %v4482_v49 = vpop.f32.mrb[148].mxu0 }
 0x851   : > { %v4106_v50 = vadd.f32 %v4105_v7, %v8326_v44  ;;  %v4561_v33 = vadd.f32 %v4482_v49, %v8335_v37  ;;  %v4107_v17 = vpop.f32.mrb[145].mxu1  ;;  %v4484_v35 = vpop.f32.mrb[149].mxu0 }
 0x852   : > { %v4108_v34 = vadd.f32 %v4107_v17, %v8322_v47  ;;  %v4562_v10 = vadd.f32 %v4484_v35, %v8335_v37  ;;  %v4109_v8 = vpop.f32.mrb[146].mxu1  ;;  %v4486_v21 = vpop.f32.mrb[150].mxu0 }
 0x853   : > { %v4593_v51 = vmul.f32 0.01, %v4561_v33  ;;  %v4110_v18 = vadd.f32 %v4109_v8, %v8326_v44  ;;  %v4563_v9 = vadd.f32 %v4486_v21, %v8340_v53  ;;  %v4111_v36 = vpop.f32.mrb[147].mxu1  ;;  %v4488_v52 = vpop.f32.mrb[151].mxu0  ;;  %v8391_v38 = vadd.f32 %v5993_v41, %v4106_v50 }
 0x854   : > { %v4594_v19 = vmul.f32 0.01, %v4562_v10  ;;  %v4112_v55 = vadd.f32 %v4111_v36, %v8322_v47  ;;  %v4564_v26 = vadd.f32 %v4488_v52, %v8340_v53  ;;  %5133 = vrot.lane.b32.xlu0 %v4108_v34, %s6712_s13 }
 0x855   : > { %v4625_v56 = vmax.f32 %v4561_v33, %v4593_v51  ;;  %v4595_v37 = vmul.f32 0.01, %v4563_v9  ;;  %v8396_v39 = vadd.f32 %v5994_v48, %v4110_v18 }
 0x856   : > { %v4626_v11 = vmax.f32 %v4562_v10, %v4594_v19  ;;  %v4596_v40 = vmul.f32 0.01, %v4564_v26  ;;  %5135 = vrot.lane.b32.xlu1 %v4112_v55, %s6712_s13 }
 0x857   : > { %v4657_v59 = vadd.f32 %v4625_v56, %v4625_v56  ;;  %v4627_v24 = vmax.f32 %v4563_v9, %v4595_v37 }
 0x858   : > { %v4658_v27 = vadd.f32 %v4626_v11, %v4626_v11  ;;  %v4628_v60 = vmax.f32 %v4564_v26, %v4596_v40  ;;  %v4115_v62 = vpop.f32.mrb[148].mxu1  ;;  %v4492_v57 = vpop.f32.mrb[152].mxu0 }
 0x859   : > { %v4689_v41 = vmul.f32 0.01, %v4657_v59  ;;  %v4659_v29 = vadd.f32 %v4627_v24, %v4627_v24  ;;  %v4116_v53 = vadd.f32 %v4115_v62, %v8326_v44  ;;  %v4565_v58 = vadd.f32 %v4492_v57, %v8337_v4  ;;  %v4117_v42 = vpop.f32.mrb[149].mxu1  ;;  %v4494_v46 = vpop.f32.mrb[153].mxu0 }
 0x85a   : > { %v4690_v43 = vmul.f32 0.01, %v4658_v27  ;;  %v4660_v48 = vadd.f32 %v4628_v60, %v4628_v60  ;;  %v4118_v28 = vadd.f32 %v4117_v42, %v8322_v47  ;;  %v4566_v13 = vadd.f32 %v4494_v46, %v8337_v4  ;;  %v4119_v63 = vpop.f32.mrb[150].mxu1  ;;  %v4496_v0 = vpop.f32.mrb[154].mxu0 }
 0x85b   : > { %v4721_v30 = vmax.f32 %v4657_v59, %v4689_v41  ;;  %v4691_v25 = vmul.f32 0.01, %v4659_v29  ;;  %v4597_v61 = vmul.f32 0.01, %v4565_v58  ;;  %v4120_v3 = vadd.f32 %v4119_v63, %v8326_v44  ;;  %v4121_v31 = vpop.f32.mrb[151].mxu1  ;;  %v4498_v20 = vpop.f32.mrb[155].mxu0 }
 0x85c   : > { %v4722_v45 = vmax.f32 %v4658_v27, %v4690_v43  ;;  %v4692_v6 = vmul.f32 0.01, %v4660_v48  ;;  %v4598_v7 = vmul.f32 0.01, %v4566_v13  ;;  %v4567_v49 = vadd.f32 %v4496_v0, %v8343_v54  ;;  %5137 = vrot.lane.b32.xlu0 %v4118_v28, %s6712_s13 }
 0x85d   : > { %v4723_v50 = vmax.f32 %v4659_v29, %v4691_v25  ;;  %v4629_v33 = vmax.f32 %v4565_v58, %v4597_v61  ;;  %v4122_v4 = vadd.f32 %v4121_v31, %v8322_v47  ;;  %v4568_v17 = vadd.f32 %v4498_v20, %v8343_v54 }
 0x85e   : > { %v4724_v35 = vmax.f32 %v4660_v48, %v4692_v6  ;;  %v4630_v34 = vmax.f32 %v4566_v13, %v4598_v7  ;;  %v4599_v10 = vmul.f32 0.01, %v4567_v49  ;;  %v8409_v8 = vadd.f32 %v8370_v23, %v4116_v53 }
 0x85f   : > { %v4785_v21 = vpack.c.bf16 %v4723_v50, %v4721_v30  ;;  %v4661_v51 = vadd.f32 %v4629_v33, %v4629_v33  ;;  %v4600_v18 = vmul.f32 0.01, %v4568_v17  ;;  %5139 = vrot.lane.b32.xlu1 %v4122_v4, %s6712_s13  ;;  %v8413_v9 = vadd.f32 %v8376_v5, %v4120_v3 }
 0x860   : > { %v4662_v36 = vadd.f32 %v4630_v34, %v4630_v34  ;;  %v4631_v52 = vmax.f32 %v4567_v49, %v4599_v10  ;;  %v4125_v19 = vpop.f32.mrb[152].mxu1  ;;  %v4502_v55 = vpop.f32.mrb[156].mxu0  ;;  %v4786_v26 = vpack.c.bf16 %v4724_v35, %v4722_v45 }
 0x861   : > { %v4693_v54 = vmul.f32 0.01, %v4661_v51  ;;  %v4632_v56 = vmax.f32 %v4568_v17, %v4600_v18  ;;  %v4126_v37 = vadd.f32 %v4125_v19, %v8326_v44  ;;  %v4569_v23 = vadd.f32 %v4502_v55, %v8349_v12  ;;  %v4127_v11 = vpop.f32.mrb[153].mxu1  ;;  %v4504_v40 = vpop.f32.mrb[157].mxu0 }
 0x862   : > { %v4694_v59 = vmul.f32 0.01, %v4662_v36  ;;  %v4663_v24 = vadd.f32 %v4631_v52, %v4631_v52  ;;  %v4128_v27 = vadd.f32 %v4127_v11, %v8322_v47  ;;  %v4570_v5 = vadd.f32 %v4504_v40, %v8349_v12  ;;  %v4129_v60 = vpop.f32.mrb[154].mxu1  ;;  %v4506_v62 = vpop.f32.mrb[158].mxu0  ;;  %4936 = vmatprep.mubr.bf16.mxu1 %v4786_v26 }
 0x863   : > { %v4725_v57 = vmax.f32 %v4661_v51, %v4693_v54  ;;  %v4664_v41 = vadd.f32 %v4632_v56, %v4632_v56  ;;  %v4601_v29 = vmul.f32 0.01, %v4569_v23  ;;  %v4130_v53 = vadd.f32 %v4129_v60, %v8326_v44  ;;  %v4131_v58 = vpop.f32.mrb[155].mxu1  ;;  %v4508_v42 = vpop.f32.mrb[159].mxu0  ;;  %4937 = vmatmul.mubr.bf16.vlgmr.msra.gmra.mrb[156].mxu1 %v4785_v21 }
 0x864   : > { %v4726_v46 = vmax.f32 %v4662_v36, %v4694_v59  ;;  %v4695_v43 = vmul.f32 0.01, %v4663_v24  ;;  %v4602_v48 = vmul.f32 0.01, %v4570_v5  ;;  %v4571_v28 = vadd.f32 %v4506_v62, %v8354_v22  ;;  %5141 = vrot.lane.b32.xlu0 %v4128_v27, %s6712_s13 }
 0x865   : > { %v4696_v13 = vmul.f32 0.01, %v4664_v41  ;;  %v4633_v12 = vmax.f32 %v4569_v23, %v4601_v29  ;;  %v4132_v63 = vadd.f32 %v4131_v58, %v8322_v47  ;;  %v4572_v0 = vadd.f32 %v4508_v42, %v8354_v22 }
 0x866   : > { %v4727_v30 = vmax.f32 %v4663_v24, %v4695_v43  ;;  %v4634_v25 = vmax.f32 %v4570_v5, %v4602_v48  ;;  %v4603_v61 = vmul.f32 0.01, %v4571_v28  ;;  %v8425_v44 = vadd.f32 %v8367_v14, %v4126_v37 }
 0x867   : > { %v4728_v3 = vmax.f32 %v4664_v41, %v4696_v13  ;;  %v4665_v31 = vadd.f32 %v4633_v12, %v4633_v12  ;;  %v4604_v20 = vmul.f32 0.01, %v4572_v0  ;;  %5143 = vrot.lane.b32.xlu1 %v4132_v63, %s6712_s13  ;;  %v8429_v45 = vadd.f32 %v8373_v15, %v4130_v53 }
 0x868   : > { %v4666_v6 = vadd.f32 %v4634_v25, %v4634_v25  ;;  %v4635_v7 = vmax.f32 %v4571_v28, %v4603_v61  ;;  %v4512_v49 = vpop.f32.mrb[160].mxu0  ;;  %v4787_v47 = vpack.c.bf16 %v4727_v30, %v4725_v57 }
 0x869   : > { %v4636_v50 = vmax.f32 %v4572_v0, %v4604_v20  ;;  %v4573_v22 = vadd.f32 %v4512_v49, %v8360_v1  ;;  %v4514_v33 = vpop.f32.mrb[161].mxu0  ;;  %v4788_v4 = vpack.c.bf16 %v4728_v3, %v4726_v46  ;;  %v4697_v17 = vmul.f32 0.01, %v4665_v31 }
 0x86a   : > { %v4667_v14 = vadd.f32 %v4635_v7, %v4635_v7  ;;  %v4574_v35 = vadd.f32 %v4514_v33, %v8360_v1  ;;  %v4516_v34 = vpop.f32.mrb[162].mxu0  ;;  %v4698_v10 = vmul.f32 0.01, %v4666_v6 }
 0x86b   : > { %v4668_v21 = vadd.f32 %v4636_v50, %v4636_v50  ;;  %v4605_v51 = vmul.f32 0.01, %v4573_v22  ;;  %v4575_v15 = vadd.f32 %v4516_v34, %v8364_v2  ;;  %4944 = vmatprep.mubr.bf16.mxu1 %v4788_v4  ;;  %v4518_v18 = vpop.f32.mrb[163].mxu0  ;;  %v4729_v56 = vmax.f32 %v4665_v31, %v4697_v17 }
 0x86c   : > { %v4699_v36 = vmul.f32 0.01, %v4667_v14  ;;  %v4606_v52 = vmul.f32 0.01, %v4574_v35  ;;  %v4576_v19 = vadd.f32 %v4518_v18, %v8364_v2  ;;  %4945 = vmatmul.mubr.bf16.gmra.mrb[160].mxu1 %v4787_v47  ;;  %v4730_v11 = vmax.f32 %v4666_v6, %v4698_v10 }
 0x86d   : > { %v4700_v55 = vmul.f32 0.01, %v4668_v21  ;;  %v4637_v26 = vmax.f32 %v4573_v22, %v4605_v51  ;;  %v4607_v54 = vmul.f32 0.01, %v4575_v15 }
 0x86e   : > { %v4731_v37 = vmax.f32 %v4667_v14, %v4699_v36  ;;  %v4638_v23 = vmax.f32 %v4574_v35, %v4606_v52  ;;  %v4608_v1 = vmul.f32 0.01, %v4576_v19 }
 0x86f   : > { %v4732_v40 = vmax.f32 %v4668_v21, %v4700_v55  ;;  %v4669_v59 = vadd.f32 %v4637_v26, %v4637_v26  ;;  %v4639_v24 = vmax.f32 %v4575_v15, %v4607_v54 }
 0x870   : > { %v4670_v27 = vadd.f32 %v4638_v23, %v4638_v23  ;;  %v4640_v5 = vmax.f32 %v4576_v19, %v4608_v1  ;;  %v4522_v60 = vpop.f32.mrb[164].mxu0  ;;  %v4789_v62 = vpack.c.bf16 %v4731_v37, %v4729_v56 }
 0x871   : > { %v4701_v57 = vmul.f32 0.01, %v4669_v59  ;;  %v4671_v41 = vadd.f32 %v4639_v24, %v4639_v24  ;;  %v4577_v2 = vadd.f32 %v4522_v60, %v8378_v16  ;;  %v4524_v29 = vpop.f32.mrb[165].mxu0  ;;  %v4790_v53 = vpack.c.bf16 %v4732_v40, %v4730_v11 }
 0x872   : > { %v4702_v58 = vmul.f32 0.01, %v4670_v27  ;;  %v4672_v42 = vadd.f32 %v4640_v5, %v4640_v5  ;;  %v4578_v46 = vadd.f32 %v4524_v29, %v8378_v16  ;;  %v4526_v43 = vpop.f32.mrb[166].mxu0 }
 0x873   : > { %v4703_v48 = vmul.f32 0.01, %v4671_v41  ;;  %v4609_v28 = vmul.f32 0.01, %v4577_v2  ;;  %v4579_v13 = vadd.f32 %v4526_v43, %v8382_v32  ;;  %4952 = vmatprep.mubr.bf16.mxu1 %v4790_v53  ;;  %v4528_v12 = vpop.f32.mrb[167].mxu0  ;;  %v4733_v25 = vmax.f32 %v4669_v59, %v4701_v57 }
 0x874   : > { %v4704_v63 = vmul.f32 0.01, %v4672_v42  ;;  %v4610_v0 = vmul.f32 0.01, %v4578_v46  ;;  %v4580_v30 = vadd.f32 %v4528_v12, %v8382_v32  ;;  %4953 = vmatmul.mubr.bf16.gmra.mrb[164].mxu1 %v4789_v62  ;;  %v4734_v20 = vmax.f32 %v4670_v27, %v4702_v58 }
 0x875   : > { %v4735_v61 = vmax.f32 %v4671_v41, %v4703_v48  ;;  %v4641_v3 = vmax.f32 %v4577_v2, %v4609_v28  ;;  %v4611_v31 = vmul.f32 0.01, %v4579_v13 }
 0x876   : > { %v4736_v6 = vmax.f32 %v4672_v42, %v4704_v63  ;;  %v4642_v7 = vmax.f32 %v4578_v46, %v4610_v0  ;;  %v4612_v16 = vmul.f32 0.01, %v4580_v30 }
 0x877   : > { %v4673_v49 = vadd.f32 %v4641_v3, %v4641_v3  ;;  %v4643_v47 = vmax.f32 %v4579_v13, %v4611_v31  ;;  %v4791_v50 = vpack.c.bf16 %v4735_v61, %v4733_v25 }
 0x878   : > { %v4674_v22 = vadd.f32 %v4642_v7, %v4642_v7  ;;  %v4644_v33 = vmax.f32 %v4580_v30, %v4612_v16  ;;  %v4532_v4 = vpop.f32.mrb[168].mxu0  ;;  %v4792_v17 = vpack.c.bf16 %v4736_v6, %v4734_v20 }
 0x879   : > { %v4705_v14 = vmul.f32 0.01, %v4673_v49  ;;  %v4675_v35 = vadd.f32 %v4643_v47, %v4643_v47  ;;  %v4581_v32 = vadd.f32 %v4532_v4, %v8391_v38  ;;  %v4534_v34 = vpop.f32.mrb[169].mxu0 }
 0x87a   : > { %v4706_v10 = vmul.f32 0.01, %v4674_v22  ;;  %v4676_v21 = vadd.f32 %v4644_v33, %v4644_v33  ;;  %v4582_v51 = vadd.f32 %v4534_v34, %v8391_v38  ;;  %v4536_v15 = vpop.f32.mrb[170].mxu0  ;;  %4960 = vmatprep.mubr.bf16.mxu1 %v4792_v17 }
 0x87b   : > { %v4707_v18 = vmul.f32 0.01, %v4675_v35  ;;  %v4613_v36 = vmul.f32 0.01, %v4581_v32  ;;  %v4583_v52 = vadd.f32 %v4536_v15, %v8396_v39  ;;  %v4538_v19 = vpop.f32.mrb[171].mxu0  ;;  %v4737_v56 = vmax.f32 %v4673_v49, %v4705_v14 }
 0x87c   : > { %v4708_v55 = vmul.f32 0.01, %v4676_v21  ;;  %v4614_v26 = vmul.f32 0.01, %v4582_v51  ;;  %v4584_v54 = vadd.f32 %v4538_v19, %v8396_v39  ;;  %4961 = vmatmul.mubr.bf16.gmra.mrb[168].mxu1 %v4791_v50  ;;  %v4738_v11 = vmax.f32 %v4674_v22, %v4706_v10 }
 0x87d   : > { %v4739_v37 = vmax.f32 %v4675_v35, %v4707_v18  ;;  %v4645_v23 = vmax.f32 %v4581_v32, %v4613_v36  ;;  %v4615_v1 = vmul.f32 0.01, %v4583_v52 }
 0x87e   : > { %v4740_v40 = vmax.f32 %v4676_v21, %v4708_v55  ;;  %v4646_v59 = vmax.f32 %v4582_v51, %v4614_v26  ;;  %v4616_v38 = vmul.f32 0.01, %v4584_v54 }
 0x87f   : > { %v4677_v24 = vadd.f32 %v4645_v23, %v4645_v23  ;;  %v4647_v27 = vmax.f32 %v4583_v52, %v4615_v1  ;;  %v4793_v5 = vpack.c.bf16 %v4739_v37, %v4737_v56 }
 0x880   : > { %v4678_v60 = vadd.f32 %v4646_v59, %v4646_v59  ;;  %v4648_v62 = vmax.f32 %v4584_v54, %v4616_v38  ;;  %v4542_v57 = vpop.f32.mrb[172].mxu0  ;;  %v4794_v41 = vpack.c.bf16 %v4740_v40, %v4738_v11 }
 0x881   : > { %v4709_v2 = vmul.f32 0.01, %v4677_v24  ;;  %v4679_v29 = vadd.f32 %v4647_v27, %v4647_v27  ;;  %v4585_v39 = vadd.f32 %v4542_v57, %v8409_v8  ;;  %v4544_v53 = vpop.f32.mrb[173].mxu0 }
 0x882   : > { %v4710_v58 = vmul.f32 0.01, %v4678_v60  ;;  %v4680_v42 = vadd.f32 %v4648_v62, %v4648_v62  ;;  %v4586_v46 = vadd.f32 %v4544_v53, %v8409_v8  ;;  %v4546_v43 = vpop.f32.mrb[174].mxu0  ;;  %4968 = vmatprep.mubr.bf16.mxu1 %v4794_v41 }
 0x883   : > { %v4711_v48 = vmul.f32 0.01, %v4679_v29  ;;  %v4617_v28 = vmul.f32 0.01, %v4585_v39  ;;  %v4587_v13 = vadd.f32 %v4546_v43, %v8413_v9  ;;  %v4548_v12 = vpop.f32.mrb[175].mxu0  ;;  %v4741_v25 = vmax.f32 %v4677_v24, %v4709_v2 }
 0x884   : > { %v4712_v63 = vmul.f32 0.01, %v4680_v42  ;;  %v4618_v0 = vmul.f32 0.01, %v4586_v46  ;;  %v4588_v30 = vadd.f32 %v4548_v12, %v8413_v9  ;;  %4969 = vmatmul.mubr.bf16.gmra.mrb[172].mxu1 %v4793_v5  ;;  %v4742_v20 = vmax.f32 %v4678_v60, %v4710_v58 }
 0x885   : > { %v4743_v61 = vmax.f32 %v4679_v29, %v4711_v48  ;;  %v4649_v3 = vmax.f32 %v4585_v39, %v4617_v28  ;;  %v4619_v31 = vmul.f32 0.01, %v4587_v13  ;;  %v8454_v48 = vld [vmem:[%s8556_s11] ss:$0 sm:$0xff] }
 0x886   : > { %v4744_v6 = vmax.f32 %v4680_v42, %v4712_v63  ;;  %v4650_v7 = vmax.f32 %v4586_v46, %v4618_v0  ;;  %v4620_v8 = vmul.f32 0.01, %v4588_v30 }
 0x887   : > { %v4681_v16 = vadd.f32 %v4649_v3, %v4649_v3  ;;  %v4651_v49 = vmax.f32 %v4587_v13, %v4619_v31  ;;  %v4795_v47 = vpack.c.bf16 %v4743_v61, %v4741_v25 }
 0x888   : > { %v4682_v50 = vadd.f32 %v4650_v7, %v4650_v7  ;;  %v4652_v22 = vmax.f32 %v4588_v30, %v4620_v8  ;;  %v4552_v33 = vpop.f32.mrb[176].mxu0  ;;  %v4796_v4 = vpack.c.bf16 %v4744_v6, %v4742_v20 }
 0x889   : > { %v4713_v17 = vmul.f32 0.01, %v4681_v16  ;;  %v4683_v14 = vadd.f32 %v4651_v49, %v4651_v49  ;;  %v4589_v9 = vadd.f32 %v4552_v33, %v8425_v44  ;;  %v4554_v35 = vpop.f32.mrb[177].mxu0 }
 0x88a   : > { %v4714_v32 = vmul.f32 0.01, %v4682_v50  ;;  %v4684_v34 = vadd.f32 %v4652_v22, %v4652_v22  ;;  %v4590_v10 = vadd.f32 %v4554_v35, %v8425_v44  ;;  %v4556_v21 = vpop.f32.mrb[178].mxu0  ;;  %4976 = vmatprep.mubr.bf16.mxu1 %v4796_v4 }
 0x88b   : > { %v4715_v51 = vmul.f32 0.01, %v4683_v14  ;;  %v4621_v15 = vmul.f32 0.01, %v4589_v9  ;;  %v4591_v18 = vadd.f32 %v4556_v21, %v8429_v45  ;;  %v4558_v36 = vpop.f32.mrb[179].mxu0  ;;  %v4745_v26 = vmax.f32 %v4681_v16, %v4713_v17 }
 0x88c   : > { %v4716_v52 = vmul.f32 0.01, %v4684_v34  ;;  %v4622_v19 = vmul.f32 0.01, %v4590_v10  ;;  %v4592_v55 = vadd.f32 %v4558_v36, %v8429_v45  ;;  %4977 = vmatmul.mubr.bf16.gmra.mrb[176].mxu1 %v4795_v47  ;;  %v4746_v23 = vmax.f32 %v4682_v50, %v4714_v32 }
 0x88d   : > { %v4747_v54 = vmax.f32 %v4683_v14, %v4715_v51  ;;  %v4653_v56 = vmax.f32 %v4589_v9, %v4621_v15  ;;  %v4623_v37 = vmul.f32 0.01, %v4591_v18 }
 0x88e   : > { %v4748_v1 = vmax.f32 %v4684_v34, %v4716_v52  ;;  %v4654_v11 = vmax.f32 %v4590_v10, %v4622_v19  ;;  %v4624_v44 = vmul.f32 0.01, %v4592_v55 }
 0x88f   : > { %v4685_v40 = vadd.f32 %v4653_v56, %v4653_v56  ;;  %v4655_v59 = vmax.f32 %v4591_v18, %v4623_v37  ;;  %v4797_v38 = vpack.c.bf16 %v4747_v54, %v4745_v26 }
 0x890   : > { %v4686_v24 = vadd.f32 %v4654_v11, %v4654_v11  ;;  %v4656_v27 = vmax.f32 %v4592_v55, %v4624_v44  ;;  %v4798_v5 = vpack.c.bf16 %v4748_v1, %v4746_v23 }
 0x891   : > { %v4717_v60 = vmul.f32 0.01, %v4685_v40  ;;  %v4687_v62 = vadd.f32 %v4655_v59, %v4655_v59 }
 0x892   : > { %v4718_v57 = vmul.f32 0.01, %v4686_v24  ;;  %v4688_v41 = vadd.f32 %v4656_v27, %v4656_v27  ;;  %4984 = vmatprep.mubr.bf16.mxu1 %v4798_v5 }
 0x893   : > { %v4719_v45 = vmul.f32 0.01, %v4687_v62  ;;  %v4749_v29 = vmax.f32 %v4685_v40, %v4717_v60 }
 0x894   : > { %v4720_v2 = vmul.f32 0.01, %v4688_v41  ;;  %4985 = vmatmul.mubr.bf16.gmra.mrb[180].mxu1 %v4797_v38  ;;  %v4750_v53 = vmax.f32 %v4686_v24, %v4718_v57 }
 0x895   : > { %v4751_v39 = vmax.f32 %v4687_v62, %v4719_v45 }
 0x896   : > { %v4752_v58 = vmax.f32 %v4688_v41, %v4720_v2 }
 0x897   : > { %v4799_v42 = vpack.c.bf16 %v4751_v39, %v4749_v29 }
 0x898   : > { %v4800_v46 = vpack.c.bf16 %v4752_v58, %v4750_v53 }
 0x89a   : > { %4992 = vmatprep.mubr.bf16.mxu1 %v4800_v46 }
 0x89c   : > { %4993 = vmatmul.mubr.bf16.gmra.mrb[184].mxu1 %v4799_v42 }
 0x89e   : > { %v5114_v26 = vpop.permute.xlu0 %5113 }
 0x8a2   : > { %v5116_v60 = vpop.permute.xlu0 %5115 }
 0x8a6   : > { %v5118_v42 = vpop.permute.xlu1 %5117 }
 0x936   : > { %v5931_v43 = vpop.f32.mrb[156].mxu1 }
 0x937   : > { %v5932_v28 = vpop.f32.mrb[157].mxu1 }
 0x938   : > { %v5933_v13 = vadd.f32 %v5932_v28, %v5931_v43  ;;  %v5934_v12 = vpop.f32.mrb[158].mxu1 }
 0x939   : > { %v5935_v63 = vpop.f32.mrb[159].mxu1 }
 0x93a   : > { %v4939_v0 = vadd.f32 %v5933_v13, %v8454_v48  ;;  %v5936_v30 = vadd.f32 %v5935_v63, %v5934_v12 }
 0x93c   : > { %v5887_v25 = vmul.f32 -1.442695, %v4939_v0  ;;  %v4942_v61 = vadd.f32 %v5936_v30, %v8454_v48 }
 0x93e   : > { %6558 = vpow2.f32 %v5887_v25  ;;  %v5888_v3 = vmul.f32 -1.442695, %v4942_v61 }
 0x93f   : > { %v5937_v31 = vpop.f32.mrb[160].mxu1 }
 0x940   : > { %6560 = vpow2.f32 %v5888_v3  ;;  %v5938_v20 = vpop.f32.mrb[161].mxu1 }
 0x941   : > { %v5939_v6 = vadd.f32 %v5938_v20, %v5937_v31  ;;  %v5940_v7 = vpop.f32.mrb[162].mxu1 }
 0x942   : > { %v5941_v8 = vpop.f32.mrb[163].mxu1 }
 0x943   : > { %v4947_v16 = vadd.f32 %v5939_v6, %v8454_v48  ;;  %v5942_v49 = vadd.f32 %v5941_v8, %v5940_v7  ;;  %v5120_v6 = vpop.permute.xlu1 %5119 }
 0x945   : > { %v5889_v47 = vmul.f32 -1.442695, %v4947_v16  ;;  %v4950_v50 = vadd.f32 %v5942_v49, %v8454_v48 }
 0x947   : > { %6562 = vpow2.f32 %v5889_v47  ;;  %v5890_v22 = vmul.f32 -1.442695, %v4950_v50  ;;  %v5943_v33 = vpop.f32.mrb[164].mxu1 }
 0x948   : > { %v6559_v4 = vpop.eup %6558  ;;  %v5944_v17 = vpop.f32.mrb[165].mxu1 }
 0x949   : > { %v5049_v14 = vadd.f32 1.0, %v6559_v4  ;;  %6564 = vpow2.f32 %v5890_v22  ;;  %v5945_v9 = vadd.f32 %v5944_v17, %v5943_v33  ;;  %v5946_v35 = vpop.f32.mrb[166].mxu1 }
 0x94a   : > { %v6561_v32 = vpop.eup %6560  ;;  %v5947_v34 = vpop.f32.mrb[167].mxu1 }
 0x94b   : > { %6566 = vrcp.f32 %v5049_v14  ;;  %v5050_v10 = vadd.f32 1.0, %v6561_v32  ;;  %v4955_v21 = vadd.f32 %v5945_v9, %v8454_v48  ;;  %v5948_v51 = vadd.f32 %v5947_v34, %v5946_v35 }
 0x94d   : > { %6568 = vrcp.f32 %v5050_v10  ;;  %v5891_v15 = vmul.f32 -1.442695, %v4955_v21  ;;  %v4958_v18 = vadd.f32 %v5948_v51, %v8454_v48  ;;  %v5122_v21 = vpop.permute.xlu0 %5121 }
 0x94f   : > { %6570 = vpow2.f32 %v5891_v15  ;;  %v5892_v36 = vmul.f32 -1.442695, %v4958_v18  ;;  %v5949_v52 = vpop.f32.mrb[168].mxu1 }
 0x950   : > { %v5950_v19 = vpop.f32.mrb[169].mxu1 }
 0x951   : > { %v6563_v55 = vpop.eup %6562  ;;  %6572 = vpow2.f32 %v5892_v36  ;;  %v5951_v54 = vadd.f32 %v5950_v19, %v5949_v52  ;;  %v5952_v56 = vpop.f32.mrb[170].mxu1 }
 0x952   : > { %v5051_v37 = vadd.f32 1.0, %v6563_v55  ;;  %v5953_v23 = vpop.f32.mrb[171].mxu1  ;;  %v5124_v52 = vpop.permute.xlu1 %5123 }
 0x953   : > { %v6565_v1 = vpop.eup %6564  ;;  %v4963_v11 = vadd.f32 %v5951_v54, %v8454_v48  ;;  %v5954_v44 = vadd.f32 %v5953_v23, %v5952_v56 }
 0x954   : > { %6574 = vrcp.f32 %v5051_v37  ;;  %v5052_v40 = vadd.f32 1.0, %v6565_v1 }
 0x955   : > { %v6567_v59 = vpop.eup %6566  ;;  %v5893_v38 = vmul.f32 -1.442695, %v4963_v11  ;;  %v4966_v24 = vadd.f32 %v5954_v44, %v8454_v48 }
 0x956   : > { %v5162_v27 = vsel %vm5161_vm8, %v6567_v59, %v5114_v26  ;;  %6576 = vrcp.f32 %v5052_v40 }
 0x957   : > { %v6569_v5 = vpop.eup %6568  ;;  %v5179_v62 = vsel %vm5178_vm9, %v5162_v27, 0.0  ;;  %6578 = vpow2.f32 %v5893_v38  ;;  %v5894_v57 = vmul.f32 -1.442695, %v4966_v24  ;;  %v5955_v41 = vpop.f32.mrb[172].mxu1 }
 0x958   : > { %5196 = vst.msk [vmem:[%s8467_s16] sm:$0xff] %vm5195_vm10, %v5179_v62  ;;  %v5163_v45 = vsel %vm5161_vm8, %v6569_v5, %v5116_v60  ;;  %v5956_v2 = vpop.f32.mrb[173].mxu1  ;;  %v5126_v60 = vpop.permute.xlu0 %5125 }
 0x959   : > { %v6571_v29 = vpop.eup %6570  ;;  %v5180_v39 = vsel %vm5178_vm9, %v5163_v45, 0.0  ;;  %6580 = vpow2.f32 %v5894_v57  ;;  %v5957_v53 = vadd.f32 %v5956_v2, %v5955_v41  ;;  %v5958_v58 = vpop.f32.mrb[174].mxu1 }
 0x95a   : > { %5197 = vst.msk [vmem:[%s8467_s16 + $0x8] sm:$0xff] %vm5195_vm10, %v5180_v39  ;;  %v5053_v46 = vadd.f32 1.0, %v6571_v29  ;;  %v5959_v43 = vpop.f32.mrb[175].mxu1  ;;  %v5128_v2 = vpop.permute.xlu1 %5127 }
 0x95b   : > { %v6573_v28 = vpop.eup %6572  ;;  %v4971_v13 = vadd.f32 %v5957_v53, %v8454_v48  ;;  %v5960_v12 = vadd.f32 %v5959_v43, %v5958_v58 }
 0x95c   : > { %6582 = vrcp.f32 %v5053_v46  ;;  %v5054_v63 = vadd.f32 1.0, %v6573_v28 }
 0x95d   : > { %v5895_v0 = vmul.f32 -1.442695, %v4971_v13  ;;  %v4974_v30 = vadd.f32 %v5960_v12, %v8454_v48 }
 0x95e   : > { %v6575_v25 = vpop.eup %6574  ;;  %6584 = vrcp.f32 %v5054_v63 }
 0x95f   : > { %v5164_v61 = vsel %vm5161_vm8, %v6575_v25, %v5118_v42  ;;  %6586 = vpow2.f32 %v5895_v0  ;;  %v5896_v3 = vmul.f32 -1.442695, %v4974_v30  ;;  %v5961_v31 = vpop.f32.mrb[176].mxu1 }
 0x960   : > { %v6577_v20 = vpop.eup %6576  ;;  %v5181_v7 = vsel %vm5178_vm9, %v5164_v61, 0.0  ;;  %v5962_v8 = vpop.f32.mrb[177].mxu1 }
 0x961   : > { %v6579_v16 = vpop.eup %6578  ;;  %5198 = vst.msk [vmem:[%s8467_s16 + $0x10] sm:$0xff] %vm5195_vm10, %v5181_v7  ;;  %v5165_v49 = vsel %vm5161_vm8, %v6577_v20, %v5120_v6  ;;  %6588 = vpow2.f32 %v5896_v3  ;;  %v5963_v47 = vadd.f32 %v5962_v8, %v5961_v31  ;;  %v5964_v50 = vpop.f32.mrb[178].mxu1 }
 0x962   : > { %v5182_v22 = vsel %vm5178_vm9, %v5165_v49, 0.0  ;;  %v5055_v33 = vadd.f32 1.0, %v6579_v16  ;;  %v5965_v4 = vpop.f32.mrb[179].mxu1  ;;  %v5130_v31 = vpop.permute.xlu0 %5129 }
 0x963   : > { %v6581_v17 = vpop.eup %6580  ;;  %5199 = vst.msk [vmem:[%s8467_s16 + $0x18] sm:$0xff] %vm5195_vm10, %v5182_v22  ;;  %v4979_v14 = vadd.f32 %v5963_v47, %v8454_v48  ;;  %v5966_v9 = vadd.f32 %v5965_v4, %v5964_v50  ;;  %v5132_v8 = vpop.permute.xlu1 %5131 }
 0x964   : > { %6590 = vrcp.f32 %v5055_v33  ;;  %v5056_v35 = vadd.f32 1.0, %v6581_v17 }
 0x965   : > { %v5897_v32 = vmul.f32 -1.442695, %v4979_v14  ;;  %v4982_v34 = vadd.f32 %v5966_v9, %v8454_v48 }
 0x966   : > { %v6583_v10 = vpop.eup %6582  ;;  %6592 = vrcp.f32 %v5056_v35  ;;  %v5134_v17 = vpop.permute.xlu0 %5133 }
 0x967   : > { %v5166_v51 = vsel %vm5161_vm8, %v6583_v10, %v5122_v21  ;;  %6594 = vpow2.f32 %v5897_v32  ;;  %v5898_v15 = vmul.f32 -1.442695, %v4982_v34  ;;  %v5967_v18 = vpop.f32.mrb[180].mxu1  ;;  %v5136_v35 = vpop.permute.xlu1 %5135 }
 0x968   : > { %v6585_v36 = vpop.eup %6584  ;;  %v5183_v19 = vsel %vm5178_vm9, %v5166_v51, 0.0  ;;  %v5968_v55 = vpop.f32.mrb[181].mxu1 }
 0x969   : > { %v6587_v26 = vpop.eup %6586  ;;  %5200 = vst.msk [vmem:[%s8467_s16 + $0x20] sm:$0xff] %vm5195_vm10, %v5183_v19  ;;  %v5167_v54 = vsel %vm5161_vm8, %v6585_v36, %v5124_v52  ;;  %6596 = vpow2.f32 %v5898_v15  ;;  %v5969_v56 = vadd.f32 %v5968_v55, %v5967_v18  ;;  %v5970_v37 = vpop.f32.mrb[182].mxu1 }
 0x96a   : > { %v5184_v23 = vsel %vm5178_vm9, %v5167_v54, 0.0  ;;  %v5057_v1 = vadd.f32 1.0, %v6587_v26  ;;  %v5971_v11 = vpop.f32.mrb[183].mxu1  ;;  %v5138_v52 = vpop.permute.xlu0 %5137 }
 0x96b   : > { %v6589_v44 = vpop.eup %6588  ;;  %5201 = vst.msk [vmem:[%s8467_s16 + $0x28] sm:$0xff] %vm5195_vm10, %v5184_v23  ;;  %v4987_v40 = vadd.f32 %v5969_v56, %v8454_v48  ;;  %v5972_v59 = vadd.f32 %v5971_v11, %v5970_v37  ;;  %v5140_v26 = vpop.permute.xlu1 %5139 }
 0x96c   : > { %6598 = vrcp.f32 %v5057_v1  ;;  %v5058_v38 = vadd.f32 1.0, %v6589_v44 }
 0x96d   : > { %v5899_v24 = vmul.f32 -1.442695, %v4987_v40  ;;  %v4990_v27 = vadd.f32 %v5972_v59, %v8454_v48 }
 0x96e   : > { %v6591_v5 = vpop.eup %6590  ;;  %6600 = vrcp.f32 %v5058_v38  ;;  %v5142_v1 = vpop.permute.xlu0 %5141 }
 0x96f   : > { %v5168_v62 = vsel %vm5161_vm8, %v6591_v5, %v5126_v60  ;;  %6602 = vpow2.f32 %v5899_v24  ;;  %v5900_v57 = vmul.f32 -1.442695, %v4990_v27  ;;  %v5973_v41 = vpop.f32.mrb[184].mxu1  ;;  %v5144_v40 = vpop.permute.xlu1 %5143 }
 0x970   : > { %v6593_v45 = vpop.eup %6592  ;;  %v5185_v29 = vsel %vm5178_vm9, %v5168_v62, 0.0  ;;  %v5974_v39 = vpop.f32.mrb[185].mxu1 }
 0x971   : > { %v6595_v53 = vpop.eup %6594  ;;  %5202 = vst.msk [vmem:[%s8467_s16 + $0x30] sm:$0xff] %vm5195_vm10, %v5185_v29  ;;  %v5169_v58 = vsel %vm5161_vm8, %v6593_v45, %v5128_v2  ;;  %6604 = vpow2.f32 %v5900_v57  ;;  %v5975_v42 = vadd.f32 %v5974_v39, %v5973_v41  ;;  %v5976_v46 = vpop.f32.mrb[186].mxu1 }
 0x972   : > { %v5186_v43 = vsel %vm5178_vm9, %v5169_v58, 0.0  ;;  %v5059_v28 = vadd.f32 1.0, %v6595_v53  ;;  %v5977_v13 = vpop.f32.mrb[187].mxu1 }
 0x973   : > { %v6597_v12 = vpop.eup %6596  ;;  %5203 = vst.msk [vmem:[%s8467_s16 + $0x38] sm:$0xff] %vm5195_vm10, %v5186_v43  ;;  %v4995_v63 = vadd.f32 %v5975_v42, %v8454_v48  ;;  %v5978_v0 = vadd.f32 %v5977_v13, %v5976_v46 }
 0x974   : > { %6606 = vrcp.f32 %v5059_v28  ;;  %v5060_v30 = vadd.f32 1.0, %v6597_v12 }
 0x975   : > { %v5901_v25 = vmul.f32 -1.442695, %v4995_v63  ;;  %v4998_v61 = vadd.f32 %v5978_v0, %v8454_v48 }
 0x976   : > { %v6599_v3 = vpop.eup %6598  ;;  %6608 = vrcp.f32 %v5060_v30 }
 0x977   : > { %v5170_v20 = vsel %vm5161_vm8, %v6599_v3, %v5130_v31  ;;  %6610 = vpow2.f32 %v5901_v25  ;;  %v5902_v6 = vmul.f32 -1.442695, %v4998_v61 }
 0x978   : > { %v6601_v7 = vpop.eup %6600  ;;  %v5187_v16 = vsel %vm5178_vm9, %v5170_v20, 0.0 }
 0x979   : > { %v6603_v49 = vpop.eup %6602  ;;  %5204 = vst.msk [vmem:[%s8467_s16 + $0x40] sm:$0xff] %vm5195_vm10, %v5187_v16  ;;  %v5171_v47 = vsel %vm5161_vm8, %v6601_v7, %v5132_v8  ;;  %6612 = vpow2.f32 %v5902_v6 }
 0x97a   : > { %v5188_v48 = vsel %vm5178_vm9, %v5171_v47, 0.0  ;;  %v5061_v50 = vadd.f32 1.0, %v6603_v49 }
 0x97b   : > { %v6605_v22 = vpop.eup %6604  ;;  %5205 = vst.msk [vmem:[%s8467_s16 + $0x48] sm:$0xff] %vm5195_vm10, %v5188_v48 }
 0x97c   : > { %6614 = vrcp.f32 %v5061_v50  ;;  %v5062_v33 = vadd.f32 1.0, %v6605_v22 }
 0x97e   : > { %v6607_v4 = vpop.eup %6606  ;;  %6616 = vrcp.f32 %v5062_v33 }
 0x97f   : > { %v5172_v14 = vsel %vm5161_vm8, %v6607_v4, %v5134_v17 }
 0x980   : > { %v6609_v9 = vpop.eup %6608  ;;  %v5189_v32 = vsel %vm5178_vm9, %v5172_v14, 0.0 }
 0x981   : > { %v6611_v34 = vpop.eup %6610  ;;  %5206 = vst.msk [vmem:[%s8467_s16 + $0x50] sm:$0xff] %vm5195_vm10, %v5189_v32  ;;  %v5173_v10 = vsel %vm5161_vm8, %v6609_v9, %v5136_v35 }
 0x982   : > { %v5190_v21 = vsel %vm5178_vm9, %v5173_v10, 0.0  ;;  %v5063_v51 = vadd.f32 1.0, %v6611_v34 }
 0x983   : > { %v6613_v15 = vpop.eup %6612  ;;  %5207 = vst.msk [vmem:[%s8467_s16 + $0x58] sm:$0xff] %vm5195_vm10, %v5190_v21 }
 0x984   : > { %6618 = vrcp.f32 %v5063_v51  ;;  %v5064_v18 = vadd.f32 1.0, %v6613_v15 }
 0x986   : > { %v6615_v36 = vpop.eup %6614  ;;  %6620 = vrcp.f32 %v5064_v18 }
 0x987   : > { %v5174_v19 = vsel %vm5161_vm8, %v6615_v36, %v5138_v52 }
 0x988   : > { %v6617_v55 = vpop.eup %6616  ;;  %v5191_v54 = vsel %vm5178_vm9, %v5174_v19, 0.0 }
 0x989   : > { %5208 = vst.msk [vmem:[%s8467_s16 + $0x60] sm:$0xff] %vm5195_vm10, %v5191_v54  ;;  %v5175_v56 = vsel %vm5161_vm8, %v6617_v55, %v5140_v26 }
 0x98a   : > { %v5192_v37 = vsel %vm5178_vm9, %v5175_v56, 0.0 }
 0x98b   : > { %5209 = vst.msk [vmem:[%s8467_s16 + $0x68] sm:$0xff] %vm5195_vm10, %v5192_v37 }
 0x98e   : > { %v6619_v23 = vpop.eup %6618 }
 0x98f   : > { %v5176_v11 = vsel %vm5161_vm8, %v6619_v23, %v5142_v1 }
 0x990   : > { %v6621_v44 = vpop.eup %6620  ;;  %v5193_v59 = vsel %vm5178_vm9, %v5176_v11, 0.0 }
 0x991   : > { %5210 = vst.msk [vmem:[%s8467_s16 + $0x70] sm:$0xff] %vm5195_vm10, %v5193_v59  ;;  %v5177_v38 = vsel %vm5161_vm8, %v6621_v44, %v5144_v40 }
 0x992   : > { %v5194_v24 = vsel %vm5178_vm9, %v5177_v38, 0.0 }
 0x993   : > { %5211 = vst.msk [vmem:[%s8467_s16 + $0x78] sm:$0xff] %vm5195_vm10, %v5194_v24 }
 0x994 PF: > { %s24_s21 = sadd.s32 1, %s6704_s21  }
 0x995   : > { %p21_p8 = scmp.ge.s32.totalorder %s24_s21, 6  }
 0x997   :  { %23 = sbr.rel (!%p21_p8) target bundleno = 2 (0x2), region = 120 }
 0x99e   :  { %5234 = vsyncpa [#allocation3], 1 }
 0x99f   :  { %5236 = vsyncpa [#allocation3 + $0x1], 1 }
 0x9a0   :  { %5237 = vsyncpa [#allocation5], 1 }

</bundles_post_ra>
